<compile_context>
chip_gen: v6e
topology: v6e:2x2x1
jax: 0.10.0
libtpu: 0.0.40
codegen_flags: <defaults>
</compile_context>

<pallas_src>
import math

import jax
import jax.numpy as jnp
import numpy as np
from jax.experimental import pallas as pl
from jax.experimental.pallas import tpu as pltpu


def _latent_scan_kernel(init_ref, x_ref, temb_ref, wq_ref, wkv_ref, wp_ref,
                        state_out_ref, pred_out_ref,
                        kT_scr, v_scr, states_scr):
    # Static shapes from the refs.
    BB, S, Ds = init_ref.shape            # batch block, slots, slot dim
    T = temb_ref.shape[0]                 # time steps
    TN = x_ref.shape[1]                   # T * N
    N = TN // T                           # inputs per step
    Da = wq_ref.shape[1]                  # attention dim
    scale = 1.0 / math.sqrt(Da)

    wq = wq_ref[...].astype(jnp.float32)

    # ---------------- Prologue (all off the serial chain) --------------------
    # Hoisted time-embedding projection: qte[t] = temb[t] @ wq.
    qte = jnp.dot(temb_ref[...].astype(jnp.float32), wq,
                  preferred_element_type=jnp.float32)               # (T, Da)

    # Fused K / (Wo-folded) V projection: one MXU matmul per batch element over
    # all T steps, parked in VMEM scratch.  wkv = [wv @ wo | wk]  (wrapper).
    for b in range(BB):
        kv = jnp.dot(x_ref[b].astype(jnp.float32),
                     wkv_ref[...].astype(jnp.float32),
                     preferred_element_type=jnp.float32)            # (T*N, Ds+Da)
        v_scr[pl.ds(b * TN, TN), :] = kv[:, :Ds]                    # V (Wo folded)
        # Park K pre-transposed per (b, t): per-step logits become a plain NN
        # matmul — no per-step XLU transpose / lane-offset slice on the chain.
        for t in range(T):
            kT_scr[b * T + t] = kv[t * N:(t + 1) * N, Ds:Ds + Da].T  # (Da, N)

    # ---------------- Serial recurrence over time ----------------------------
    # Fully unrolled at trace time; the BB batch chains are independent so the
    # LLO scheduler interleaves them and hides per-matmul latency.
    states = [init_ref[b].astype(jnp.float32) for b in range(BB)]   # each (S, Ds)
    for t in range(T):
        for b in range(BB):
            q = jnp.dot(states[b], wq,
                        preferred_element_type=jnp.float32) + qte[t:t + 1, :]
            kT = kT_scr[b * T + t]                                   # (Da, N)
            v_t = v_scr[pl.ds((b * T + t) * N, N), :]                # (N, Ds)
            logits = jnp.dot(q, kT,
                             preferred_element_type=jnp.float32) * scale  # (S, N)
            attn = jax.nn.softmax(logits, axis=0)                    # over slots
            denom = jnp.sum(attn, axis=-1, keepdims=True) + 1e-8
            attn = attn * pl.reciprocal(denom, approx=False)         # over inputs
            # Wo already folded into V: the slot update is a single matmul.
            new_state = states[b] + jnp.dot(attn, v_t,
                                            preferred_element_type=jnp.float32)
            states_scr[pl.ds((b * T + t) * S, S), :] = new_state
            states[b] = new_state

    # ---------------- Epilogue: hoisted predictor + bulk output stores -------
    states_all = states_scr[...]                                     # (BB*T*S, Ds)
    preds_all = states_all + jnp.dot(states_all,
                                     wp_ref[...].astype(jnp.float32),
                                     preferred_element_type=jnp.float32)
    for b in range(BB):
        lo, hi = b * T * S, (b + 1) * T * S
        state_out_ref[b] = states_all[lo:hi, :].astype(state_out_ref.dtype)
        pred_out_ref[b] = preds_all[lo:hi, :].astype(pred_out_ref.dtype)


def _tensorcores_per_pallas_device() -> int:
    """Best-effort count of TensorCores behind one Pallas device."""
    try:
        kind = jax.devices()[0].device_kind.lower()
    except Exception:
        return 1
    if "7" in kind:                                   # v7x: 2 TCs per chip.
        return 2
    if "v4" in kind:                                  # v4 megacore.
        return 2
    if "v5p" in kind or kind.strip().endswith("v5"):  # v5p megacore.
        return 2
    return 1                                          # v2/v3 per-core, v5e, v6e.


def latent_processor_scan(initial_state, inputs, params, batch_block=None):
    """Apply LatentProcessor (corrector + predictor) over the time axis.

    initial_state: (B, S, D_slot)   inputs: (B, T, N, D_in)
    params: (wq, wk, wv, wo, wp, temb)
    Returns {'state': (B,T,S,D_slot), 'state_predicted': (B,T,S,D_slot)}.
    """
    B, S, Ds = initial_state.shape
    _, T, N, Di = inputs.shape
    wq, wk, wv, wo, wp, temb = params
    Da = wq.shape[1]
    f32 = jnp.float32

    # Device-aware batch blocking: fold the whole batch into one kernel body on
    # single-TC chips (interleaved chains); one batch element per "parallel"
    # grid step on multi-TC devices.
    if batch_block is None:
        batch_block = 1 if (_tensorcores_per_pallas_device() > 1 and B > 1) else B
    assert B % batch_block == 0
    BB = batch_block

    # Fold Wo into V and fuse the K/V projection weights:  wkv = [wv@wo | wk].
    wvo = jnp.dot(wv.astype(f32), wo.astype(f32))                  # (Di, Ds)
    wkv = jnp.concatenate([wvo, wk.astype(f32)], axis=1)           # (Di, Ds+Da)

    # Metadata-only contiguous collapse — no HBM transpose pass.
    x = inputs.reshape(B, T * N, Di)

    out_shapes = (jax.ShapeDtypeStruct((B, T * S, Ds), f32),
                  jax.ShapeDtypeStruct((B, T * S, Ds), f32))

    grid_spec = pltpu.PrefetchScalarGridSpec(
        num_scalar_prefetch=0,
        grid=(B // BB,),
        in_specs=[
            pl.BlockSpec((BB, S, Ds), lambda g: (g, 0, 0)),         # initial state
            pl.BlockSpec((BB, T * N, Di), lambda g: (g, 0, 0)),     # inputs
            pl.BlockSpec((T, Ds), lambda g: (0, 0)),                # time embeddings
            pl.BlockSpec((Ds, Da), lambda g: (0, 0)),               # Wq
            pl.BlockSpec((Di, Ds + Da), lambda g: (0, 0)),          # [wv@wo | wk]
            pl.BlockSpec((Ds, Ds), lambda g: (0, 0)),               # Wp (predictor)
        ],
        out_specs=[
            pl.BlockSpec((BB, T * S, Ds), lambda g: (g, 0, 0)),     # corrected
            pl.BlockSpec((BB, T * S, Ds), lambda g: (g, 0, 0)),     # predicted
        ],
        scratch_shapes=[
            pltpu.VMEM((BB * T, Da, N), f32),     # K, pre-transposed per (b, t)
            pltpu.VMEM((BB * T * N, Ds), f32),    # V with Wo folded in
            pltpu.VMEM((BB * T * S, Ds), f32),    # per-step corrected states
        ],
    )

    states, preds = pl.pallas_call(
        _latent_scan_kernel,
        out_shape=out_shapes,
        grid_spec=grid_spec,
        compiler_params=pltpu.CompilerParams(
            dimension_semantics=("parallel",)),
    )(initial_state, x, temb, wq, wkv, wp)

    # Metadata-only reshapes back to the module's (B, T, S, D_slot) layout.
    return {"state": states.reshape(B, T, S, Ds),
            "state_predicted": preds.reshape(B, T, S, Ds)}


def ref_forward(initial_state, inputs, params):
    """Pure-JAX reference (mirrors the torch per-step module with lax.scan)."""
    wq, wk, wv, wo, wp, temb = params
    x_tb = jnp.transpose(inputs, (1, 0, 2, 3)).astype(jnp.float32)
    scale = 1.0 / math.sqrt(wq.shape[1])

    def step(state, xs):
        x, te = xs
        q = jnp.einsum('bsd,de->bse', state + te[None, None, :], wq)
        k = jnp.einsum('bnd,de->bne', x, wk)
        v = jnp.einsum('bnd,de->bne', x, wv)
        logits = jnp.einsum('bse,bne->bsn', q, k) * scale
        attn = jax.nn.softmax(logits, axis=1)
        attn = attn / (attn.sum(-1, keepdims=True) + 1e-8)
        updates = jnp.einsum('bsn,bne->bse', attn, v)
        new_state = state + jnp.einsum('bse,ed->bsd', updates, wo)
        pred = new_state + jnp.einsum('bsd,de->bse', new_state, wp)
        return new_state, (new_state, pred)

    _, (states, preds) = jax.lax.scan(
        step, initial_state.astype(jnp.float32), (x_tb, temb))
    return {
        "state": jnp.transpose(states, (1, 0, 2, 3)),
        "state_predicted": jnp.transpose(preds, (1, 0, 2, 3)),
    }


if __name__ == "__main__":
    # Small shapes consistent with the module's forward:
    #   initial_state: (B, S, D_slot) = (2, 8, 32)
    #   inputs:        (B, T, N, D_in) = (2, 8, 16, 32)
    B, T, N, Di = 2, 8, 16, 32
    S, Ds = 8, 32

    key = jax.random.PRNGKey(0)
    k0, k1, k2, k3, k4, k5, k6, k7 = jax.random.split(key, 8)

    initial_state = jax.random.normal(k0, (B, S, Ds), jnp.float32)
    inputs = jax.random.normal(k1, (B, T, N, Di), jnp.float32)

    # Deterministic synthetic parameters for the corrector / predictor.
    wq = jax.random.normal(k2, (Ds, Ds), jnp.float32) * (1.0 / math.sqrt(Ds))
    wk = jax.random.normal(k3, (Di, Ds), jnp.float32) * (1.0 / math.sqrt(Di))
    wv = jax.random.normal(k4, (Di, Ds), jnp.float32) * (1.0 / math.sqrt(Di))
    wo = jax.random.normal(k5, (Ds, Ds), jnp.float32) * (1.0 / math.sqrt(Ds))
    wp = jax.random.normal(k6, (Ds, Ds), jnp.float32) * (1.0 / math.sqrt(Ds))
    temb = jax.random.normal(k7, (T, Ds), jnp.float32) * 0.1
    params = (wq, wk, wv, wo, wp, temb)

    out = latent_processor_scan(initial_state, inputs, params)
    out = jax.tree_util.tree_map(jax.block_until_ready, out)

    ref = ref_forward(initial_state, inputs, params)
    np.testing.assert_allclose(np.asarray(out["state"]),
                               np.asarray(ref["state"]), rtol=1e-4, atol=1e-5)
    np.testing.assert_allclose(np.asarray(out["state_predicted"]),
                               np.asarray(ref["state_predicted"]), rtol=1e-4, atol=1e-5)

    assert out["state"].shape == (B, T, S, Ds)
    assert out["state_predicted"].shape == (B, T, S, Ds)
    print("KERNEL_OK")
</pallas_src>

<mosaic_0001>
module attributes {stable_mosaic.version = 11 : i64} {
  func.func @_latent_scan_kernel(%arg0: i32, %arg1: memref<2x8x32xf32, #tpu.memory_space<vmem>>, %arg2: memref<2x128x32xf32, #tpu.memory_space<vmem>>, %arg3: memref<8x32xf32, #tpu.memory_space<vmem>>, %arg4: memref<32x32xf32, #tpu.memory_space<vmem>>, %arg5: memref<32x64xf32, #tpu.memory_space<vmem>>, %arg6: memref<32x32xf32, #tpu.memory_space<vmem>>, %arg7: memref<2x64x32xf32, #tpu.memory_space<vmem>>, %arg8: memref<2x64x32xf32, #tpu.memory_space<vmem>>, %arg9: memref<16x32x16xf32, #tpu.memory_space<vmem>>, %arg10: memref<256x32xf32, #tpu.memory_space<vmem>>, %arg11: memref<128x32xf32, #tpu.memory_space<vmem>>) attributes {dimension_semantics = [#tpu.dimension_semantics<parallel>], iteration_bounds = array<i64: 1>, scalar_prefetch = 0 : i64, scratch_operands = 3 : i64, tpu.core_type = #tpu.core_type<tc>, window_params = [{transform_indices = @transform_0, window_bounds = array<i64: 2, 8, 32>}, {transform_indices = @transform_1, window_bounds = array<i64: 2, 128, 32>}, {pipeline_mode = #tpu.pipeline_mode<synchronous>, transform_indices = @transform_2, window_bounds = array<i64: 8, 32>}, {pipeline_mode = #tpu.pipeline_mode<synchronous>, transform_indices = @transform_3, window_bounds = array<i64: 32, 32>}, {pipeline_mode = #tpu.pipeline_mode<synchronous>, transform_indices = @transform_4, window_bounds = array<i64: 32, 64>}, {pipeline_mode = #tpu.pipeline_mode<synchronous>, transform_indices = @transform_5, window_bounds = array<i64: 32, 32>}, {transform_indices = @transform_6, window_bounds = array<i64: 2, 64, 32>}, {transform_indices = @transform_7, window_bounds = array<i64: 2, 64, 32>}]} {
    %c0 = arith.constant 0 : index
    %c0_0 = arith.constant 0 : index
    %0 = vector.load %arg4[%c0, %c0_0] : memref<32x32xf32, #tpu.memory_space<vmem>>, vector<32x32xf32>
    %c0_1 = arith.constant 0 : index
    %c0_2 = arith.constant 0 : index
    %1 = vector.load %arg3[%c0_1, %c0_2] : memref<8x32xf32, #tpu.memory_space<vmem>>, vector<8x32xf32>
    %cst = arith.constant dense<0.000000e+00> : vector<8x32xf32>
    %2 = tpu.matmul %1, %0, %cst {dimension_numbers = #tpu.dot_dimension_numbers<[1], [0], [0], [1], [0, 0, 1, 1], [], []>} : vector<8x32xf32>, vector<32x32xf32>, vector<8x32xf32> -> vector<8x32xf32>
    %c0_3 = arith.constant 0 : index
    %c0_4 = arith.constant 0 : index
    %c0_5 = arith.constant 0 : index
    %3 = vector.load %arg2[%c0_3, %c0_4, %c0_5] : memref<2x128x32xf32, #tpu.memory_space<vmem>>, vector<1x128x32xf32>
    %4 = vector.shape_cast %3 : vector<1x128x32xf32> to vector<128x32xf32>
    %c0_6 = arith.constant 0 : index
    %c0_7 = arith.constant 0 : index
    %5 = vector.load %arg5[%c0_6, %c0_7] : memref<32x64xf32, #tpu.memory_space<vmem>>, vector<32x64xf32>
    %cst_8 = arith.constant dense<0.000000e+00> : vector<128x64xf32>
    %6 = tpu.matmul %4, %5, %cst_8 {dimension_numbers = #tpu.dot_dimension_numbers<[1], [0], [0], [1], [0, 0, 1, 1], [], []>} : vector<128x32xf32>, vector<32x64xf32>, vector<128x64xf32> -> vector<128x64xf32>
    %7 = vector.extract_strided_slice %6 {offsets = [0, 0], sizes = [128, 32], strides = [1, 1]} : vector<128x64xf32> to vector<128x32xf32>
    %c0_9 = arith.constant 0 : index
    %c0_10 = arith.constant 0 : index
    %8 = vector.load %arg10[%c0_9, %c0_10] : memref<256x32xf32, #tpu.memory_space<vmem>>, vector<128x32xf32>
    tpu.vector_store %arg10[%c0_9, %c0_10], %7 {strides = array<i32>} : memref<256x32xf32, #tpu.memory_space<vmem>>, vector<128x32xf32>,
    %9 = vector.extract_strided_slice %6 {offsets = [0, 32], sizes = [16, 32], strides = [1, 1]} : vector<128x64xf32> to vector<16x32xf32>
    %10 = tpu.transpose %9, [1, 0] : vector<16x32xf32> -> vector<32x16xf32>
    %c0_11 = arith.constant 0 : index
    %c0_12 = arith.constant 0 : index
    %c0_13 = arith.constant 0 : index
    %11 = vector.load %arg9[%c0_11, %c0_12, %c0_13] : memref<16x32x16xf32, #tpu.memory_space<vmem>>, vector<1x32x16xf32>
    %12 = vector.shape_cast %11 : vector<1x32x16xf32> to vector<32x16xf32>
    %13 = vector.shape_cast %10 : vector<32x16xf32> to vector<1x32x16xf32>
    tpu.vector_store %arg9[%c0_11, %c0_12, %c0_13], %13 {strides = array<i32>} : memref<16x32x16xf32, #tpu.memory_space<vmem>>, vector<1x32x16xf32>,
    %14 = vector.extract_strided_slice %6 {offsets = [16, 32], sizes = [16, 32], strides = [1, 1]} : vector<128x64xf32> to vector<16x32xf32>
    %15 = tpu.transpose %14, [1, 0] : vector<16x32xf32> -> vector<32x16xf32>
    %c1 = arith.constant 1 : index
    %c0_14 = arith.constant 0 : index
    %c0_15 = arith.constant 0 : index
    %16 = vector.load %arg9[%c1, %c0_14, %c0_15] : memref<16x32x16xf32, #tpu.memory_space<vmem>>, vector<1x32x16xf32>
    %17 = vector.shape_cast %16 : vector<1x32x16xf32> to vector<32x16xf32>
    %18 = vector.shape_cast %15 : vector<32x16xf32> to vector<1x32x16xf32>
    tpu.vector_store %arg9[%c1, %c0_14, %c0_15], %18 {strides = array<i32>} : memref<16x32x16xf32, #tpu.memory_space<vmem>>, vector<1x32x16xf32>,
    %19 = vector.extract_strided_slice %6 {offsets = [32, 32], sizes = [16, 32], strides = [1, 1]} : vector<128x64xf32> to vector<16x32xf32>
    %20 = tpu.transpose %19, [1, 0] : vector<16x32xf32> -> vector<32x16xf32>
    %c2 = arith.constant 2 : index
    %c0_16 = arith.constant 0 : index
    %c0_17 = arith.constant 0 : index
    %21 = vector.load %arg9[%c2, %c0_16, %c0_17] : memref<16x32x16xf32, #tpu.memory_space<vmem>>, vector<1x32x16xf32>
    %22 = vector.shape_cast %21 : vector<1x32x16xf32> to vector<32x16xf32>
    %23 = vector.shape_cast %20 : vector<32x16xf32> to vector<1x32x16xf32>
    tpu.vector_store %arg9[%c2, %c0_16, %c0_17], %23 {strides = array<i32>} : memref<16x32x16xf32, #tpu.memory_space<vmem>>, vector<1x32x16xf32>,
    %24 = vector.extract_strided_slice %6 {offsets = [48, 32], sizes = [16, 32], strides = [1, 1]} : vector<128x64xf32> to vector<16x32xf32>
    %25 = tpu.transpose %24, [1, 0] : vector<16x32xf32> -> vector<32x16xf32>
    %c3 = arith.constant 3 : index
    %c0_18 = arith.constant 0 : index
    %c0_19 = arith.constant 0 : index
    %26 = vector.load %arg9[%c3, %c0_18, %c0_19] : memref<16x32x16xf32, #tpu.memory_space<vmem>>, vector<1x32x16xf32>
    %27 = vector.shape_cast %26 : vector<1x32x16xf32> to vector<32x16xf32>
    %28 = vector.shape_cast %25 : vector<32x16xf32> to vector<1x32x16xf32>
    tpu.vector_store %arg9[%c3, %c0_18, %c0_19], %28 {strides = array<i32>} : memref<16x32x16xf32, #tpu.memory_space<vmem>>, vector<1x32x16xf32>,
    %29 = vector.extract_strided_slice %6 {offsets = [64, 32], sizes = [16, 32], strides = [1, 1]} : vector<128x64xf32> to vector<16x32xf32>
    %30 = tpu.transpose %29, [1, 0] : vector<16x32xf32> -> vector<32x16xf32>
    %c4 = arith.constant 4 : index
    %c0_20 = arith.constant 0 : index
    %c0_21 = arith.constant 0 : index
    %31 = vector.load %arg9[%c4, %c0_20, %c0_21] : memref<16x32x16xf32, #tpu.memory_space<vmem>>, vector<1x32x16xf32>
    %32 = vector.shape_cast %31 : vector<1x32x16xf32> to vector<32x16xf32>
    %33 = vector.shape_cast %30 : vector<32x16xf32> to vector<1x32x16xf32>
    tpu.vector_store %arg9[%c4, %c0_20, %c0_21], %33 {strides = array<i32>} : memref<16x32x16xf32, #tpu.memory_space<vmem>>, vector<1x32x16xf32>,
    %34 = vector.extract_strided_slice %6 {offsets = [80, 32], sizes = [16, 32], strides = [1, 1]} : vector<128x64xf32> to vector<16x32xf32>
    %35 = tpu.transpose %34, [1, 0] : vector<16x32xf32> -> vector<32x16xf32>
    %c5 = arith.constant 5 : index
    %c0_22 = arith.constant 0 : index
    %c0_23 = arith.constant 0 : index
    %36 = vector.load %arg9[%c5, %c0_22, %c0_23] : memref<16x32x16xf32, #tpu.memory_space<vmem>>, vector<1x32x16xf32>
    %37 = vector.shape_cast %36 : vector<1x32x16xf32> to vector<32x16xf32>
    %38 = vector.shape_cast %35 : vector<32x16xf32> to vector<1x32x16xf32>
    tpu.vector_store %arg9[%c5, %c0_22, %c0_23], %38 {strides = array<i32>} : memref<16x32x16xf32, #tpu.memory_space<vmem>>, vector<1x32x16xf32>,
    %39 = vector.extract_strided_slice %6 {offsets = [96, 32], sizes = [16, 32], strides = [1, 1]} : vector<128x64xf32> to vector<16x32xf32>
    %40 = tpu.transpose %39, [1, 0] : vector<16x32xf32> -> vector<32x16xf32>
    %c6 = arith.constant 6 : index
    %c0_24 = arith.constant 0 : index
    %c0_25 = arith.constant 0 : index
    %41 = vector.load %arg9[%c6, %c0_24, %c0_25] : memref<16x32x16xf32, #tpu.memory_space<vmem>>, vector<1x32x16xf32>
    %42 = vector.shape_cast %41 : vector<1x32x16xf32> to vector<32x16xf32>
    %43 = vector.shape_cast %40 : vector<32x16xf32> to vector<1x32x16xf32>
    tpu.vector_store %arg9[%c6, %c0_24, %c0_25], %43 {strides = array<i32>} : memref<16x32x16xf32, #tpu.memory_space<vmem>>, vector<1x32x16xf32>,
    %44 = vector.extract_strided_slice %6 {offsets = [112, 32], sizes = [16, 32], strides = [1, 1]} : vector<128x64xf32> to vector<16x32xf32>
    %45 = tpu.transpose %44, [1, 0] : vector<16x32xf32> -> vector<32x16xf32>
    %c7 = arith.constant 7 : index
    %c0_26 = arith.constant 0 : index
    %c0_27 = arith.constant 0 : index
    %46 = vector.load %arg9[%c7, %c0_26, %c0_27] : memref<16x32x16xf32, #tpu.memory_space<vmem>>, vector<1x32x16xf32>
    %47 = vector.shape_cast %46 : vector<1x32x16xf32> to vector<32x16xf32>
    %48 = vector.shape_cast %45 : vector<32x16xf32> to vector<1x32x16xf32>
    tpu.vector_store %arg9[%c7, %c0_26, %c0_27], %48 {strides = array<i32>} : memref<16x32x16xf32, #tpu.memory_space<vmem>>, vector<1x32x16xf32>,
    %c1_28 = arith.constant 1 : index
    %c0_29 = arith.constant 0 : index
    %c0_30 = arith.constant 0 : index
    %49 = vector.load %arg2[%c1_28, %c0_29, %c0_30] : memref<2x128x32xf32, #tpu.memory_space<vmem>>, vector<1x128x32xf32>
    %50 = vector.shape_cast %49 : vector<1x128x32xf32> to vector<128x32xf32>
    %c0_31 = arith.constant 0 : index
    %c0_32 = arith.constant 0 : index
    %51 = vector.load %arg5[%c0_31, %c0_32] : memref<32x64xf32, #tpu.memory_space<vmem>>, vector<32x64xf32>
    %cst_33 = arith.constant dense<0.000000e+00> : vector<128x64xf32>
    %52 = tpu.matmul %50, %51, %cst_33 {dimension_numbers = #tpu.dot_dimension_numbers<[1], [0], [0], [1], [0, 0, 1, 1], [], []>} : vector<128x32xf32>, vector<32x64xf32>, vector<128x64xf32> -> vector<128x64xf32>
    %53 = vector.extract_strided_slice %52 {offsets = [0, 0], sizes = [128, 32], strides = [1, 1]} : vector<128x64xf32> to vector<128x32xf32>
    %c128 = arith.constant 128 : index
    %c0_34 = arith.constant 0 : index
    %54 = vector.load %arg10[%c128, %c0_34] : memref<256x32xf32, #tpu.memory_space<vmem>>, vector<128x32xf32>
    tpu.vector_store %arg10[%c128, %c0_34], %53 {strides = array<i32>} : memref<256x32xf32, #tpu.memory_space<vmem>>, vector<128x32xf32>,
    %55 = vector.extract_strided_slice %52 {offsets = [0, 32], sizes = [16, 32], strides = [1, 1]} : vector<128x64xf32> to vector<16x32xf32>
    %56 = tpu.transpose %55, [1, 0] : vector<16x32xf32> -> vector<32x16xf32>
    %c8 = arith.constant 8 : index
    %c0_35 = arith.constant 0 : index
    %c0_36 = arith.constant 0 : index
    %57 = vector.load %arg9[%c8, %c0_35, %c0_36] : memref<16x32x16xf32, #tpu.memory_space<vmem>>, vector<1x32x16xf32>
    %58 = vector.shape_cast %57 : vector<1x32x16xf32> to vector<32x16xf32>
    %59 = vector.shape_cast %56 : vector<32x16xf32> to vector<1x32x16xf32>
    tpu.vector_store %arg9[%c8, %c0_35, %c0_36], %59 {strides = array<i32>} : memref<16x32x16xf32, #tpu.memory_space<vmem>>, vector<1x32x16xf32>,
    %60 = vector.extract_strided_slice %52 {offsets = [16, 32], sizes = [16, 32], strides = [1, 1]} : vector<128x64xf32> to vector<16x32xf32>
    %61 = tpu.transpose %60, [1, 0] : vector<16x32xf32> -> vector<32x16xf32>
    %c9 = arith.constant 9 : index
    %c0_37 = arith.constant 0 : index
    %c0_38 = arith.constant 0 : index
    %62 = vector.load %arg9[%c9, %c0_37, %c0_38] : memref<16x32x16xf32, #tpu.memory_space<vmem>>, vector<1x32x16xf32>
    %63 = vector.shape_cast %62 : vector<1x32x16xf32> to vector<32x16xf32>
    %64 = vector.shape_cast %61 : vector<32x16xf32> to vector<1x32x16xf32>
    tpu.vector_store %arg9[%c9, %c0_37, %c0_38], %64 {strides = array<i32>} : memref<16x32x16xf32, #tpu.memory_space<vmem>>, vector<1x32x16xf32>,
    %65 = vector.extract_strided_slice %52 {offsets = [32, 32], sizes = [16, 32], strides = [1, 1]} : vector<128x64xf32> to vector<16x32xf32>
    %66 = tpu.transpose %65, [1, 0] : vector<16x32xf32> -> vector<32x16xf32>
    %c10 = arith.constant 10 : index
    %c0_39 = arith.constant 0 : index
    %c0_40 = arith.constant 0 : index
    %67 = vector.load %arg9[%c10, %c0_39, %c0_40] : memref<16x32x16xf32, #tpu.memory_space<vmem>>, vector<1x32x16xf32>
    %68 = vector.shape_cast %67 : vector<1x32x16xf32> to vector<32x16xf32>
    %69 = vector.shape_cast %66 : vector<32x16xf32> to vector<1x32x16xf32>
    tpu.vector_store %arg9[%c10, %c0_39, %c0_40], %69 {strides = array<i32>} : memref<16x32x16xf32, #tpu.memory_space<vmem>>, vector<1x32x16xf32>,
    %70 = vector.extract_strided_slice %52 {offsets = [48, 32], sizes = [16, 32], strides = [1, 1]} : vector<128x64xf32> to vector<16x32xf32>
    %71 = tpu.transpose %70, [1, 0] : vector<16x32xf32> -> vector<32x16xf32>
    %c11 = arith.constant 11 : index
    %c0_41 = arith.constant 0 : index
    %c0_42 = arith.constant 0 : index
    %72 = vector.load %arg9[%c11, %c0_41, %c0_42] : memref<16x32x16xf32, #tpu.memory_space<vmem>>, vector<1x32x16xf32>
    %73 = vector.shape_cast %72 : vector<1x32x16xf32> to vector<32x16xf32>
    %74 = vector.shape_cast %71 : vector<32x16xf32> to vector<1x32x16xf32>
    tpu.vector_store %arg9[%c11, %c0_41, %c0_42], %74 {strides = array<i32>} : memref<16x32x16xf32, #tpu.memory_space<vmem>>, vector<1x32x16xf32>,
    %75 = vector.extract_strided_slice %52 {offsets = [64, 32], sizes = [16, 32], strides = [1, 1]} : vector<128x64xf32> to vector<16x32xf32>
    %76 = tpu.transpose %75, [1, 0] : vector<16x32xf32> -> vector<32x16xf32>
    %c12 = arith.constant 12 : index
    %c0_43 = arith.constant 0 : index
    %c0_44 = arith.constant 0 : index
    %77 = vector.load %arg9[%c12, %c0_43, %c0_44] : memref<16x32x16xf32, #tpu.memory_space<vmem>>, vector<1x32x16xf32>
    %78 = vector.shape_cast %77 : vector<1x32x16xf32> to vector<32x16xf32>
    %79 = vector.shape_cast %76 : vector<32x16xf32> to vector<1x32x16xf32>
    tpu.vector_store %arg9[%c12, %c0_43, %c0_44], %79 {strides = array<i32>} : memref<16x32x16xf32, #tpu.memory_space<vmem>>, vector<1x32x16xf32>,
    %80 = vector.extract_strided_slice %52 {offsets = [80, 32], sizes = [16, 32], strides = [1, 1]} : vector<128x64xf32> to vector<16x32xf32>
    %81 = tpu.transpose %80, [1, 0] : vector<16x32xf32> -> vector<32x16xf32>
    %c13 = arith.constant 13 : index
    %c0_45 = arith.constant 0 : index
    %c0_46 = arith.constant 0 : index
    %82 = vector.load %arg9[%c13, %c0_45, %c0_46] : memref<16x32x16xf32, #tpu.memory_space<vmem>>, vector<1x32x16xf32>
    %83 = vector.shape_cast %82 : vector<1x32x16xf32> to vector<32x16xf32>
    %84 = vector.shape_cast %81 : vector<32x16xf32> to vector<1x32x16xf32>
    tpu.vector_store %arg9[%c13, %c0_45, %c0_46], %84 {strides = array<i32>} : memref<16x32x16xf32, #tpu.memory_space<vmem>>, vector<1x32x16xf32>,
    %85 = vector.extract_strided_slice %52 {offsets = [96, 32], sizes = [16, 32], strides = [1, 1]} : vector<128x64xf32> to vector<16x32xf32>
    %86 = tpu.transpose %85, [1, 0] : vector<16x32xf32> -> vector<32x16xf32>
    %c14 = arith.constant 14 : index
    %c0_47 = arith.constant 0 : index
    %c0_48 = arith.constant 0 : index
    %87 = vector.load %arg9[%c14, %c0_47, %c0_48] : memref<16x32x16xf32, #tpu.memory_space<vmem>>, vector<1x32x16xf32>
    %88 = vector.shape_cast %87 : vector<1x32x16xf32> to vector<32x16xf32>
    %89 = vector.shape_cast %86 : vector<32x16xf32> to vector<1x32x16xf32>
    tpu.vector_store %arg9[%c14, %c0_47, %c0_48], %89 {strides = array<i32>} : memref<16x32x16xf32, #tpu.memory_space<vmem>>, vector<1x32x16xf32>,
    %90 = vector.extract_strided_slice %52 {offsets = [112, 32], sizes = [16, 32], strides = [1, 1]} : vector<128x64xf32> to vector<16x32xf32>
    %91 = tpu.transpose %90, [1, 0] : vector<16x32xf32> -> vector<32x16xf32>
    %c15 = arith.constant 15 : index
    %c0_49 = arith.constant 0 : index
    %c0_50 = arith.constant 0 : index
    %92 = vector.load %arg9[%c15, %c0_49, %c0_50] : memref<16x32x16xf32, #tpu.memory_space<vmem>>, vector<1x32x16xf32>
    %93 = vector.shape_cast %92 : vector<1x32x16xf32> to vector<32x16xf32>
    %94 = vector.shape_cast %91 : vector<32x16xf32> to vector<1x32x16xf32>
    tpu.vector_store %arg9[%c15, %c0_49, %c0_50], %94 {strides = array<i32>} : memref<16x32x16xf32, #tpu.memory_space<vmem>>, vector<1x32x16xf32>,
    %c0_51 = arith.constant 0 : index
    %c0_52 = arith.constant 0 : index
    %c0_53 = arith.constant 0 : index
    %95 = vector.load %arg1[%c0_51, %c0_52, %c0_53] : memref<2x8x32xf32, #tpu.memory_space<vmem>>, vector<1x8x32xf32>
    %96 = vector.shape_cast %95 : vector<1x8x32xf32> to vector<8x32xf32>
    %c1_54 = arith.constant 1 : index
    %c0_55 = arith.constant 0 : index
    %c0_56 = arith.constant 0 : index
    %97 = vector.load %arg1[%c1_54, %c0_55, %c0_56] : memref<2x8x32xf32, #tpu.memory_space<vmem>>, vector<1x8x32xf32>
    %98 = vector.shape_cast %97 : vector<1x8x32xf32> to vector<8x32xf32>
    %cst_57 = arith.constant dense<0.000000e+00> : vector<8x32xf32>
    %99 = tpu.matmul %96, %0, %cst_57 {dimension_numbers = #tpu.dot_dimension_numbers<[1], [0], [0], [1], [0, 0, 1, 1], [], []>} : vector<8x32xf32>, vector<32x32xf32>, vector<8x32xf32> -> vector<8x32xf32>
    %100 = vector.extract_strided_slice %2 {offsets = [0, 0], sizes = [1, 32], strides = [1, 1]} : vector<8x32xf32> to vector<1x32xf32>
    %101 = vector.broadcast %100 : vector<1x32xf32> to vector<8x32xf32>
    %102 = arith.addf %99, %101 : vector<8x32xf32>
    %c0_58 = arith.constant 0 : index
    %c0_59 = arith.constant 0 : index
    %c0_60 = arith.constant 0 : index
    %103 = vector.load %arg9[%c0_58, %c0_59, %c0_60] : memref<16x32x16xf32, #tpu.memory_space<vmem>>, vector<1x32x16xf32>
    %104 = vector.shape_cast %103 : vector<1x32x16xf32> to vector<32x16xf32>
    %c0_61 = arith.constant 0 : index
    %c0_62 = arith.constant 0 : index
    %105 = vector.load %arg10[%c0_61, %c0_62] : memref<256x32xf32, #tpu.memory_space<vmem>>, vector<16x32xf32>
    %cst_63 = arith.constant dense<0.000000e+00> : vector<8x16xf32>
    %106 = tpu.matmul %102, %104, %cst_63 {dimension_numbers = #tpu.dot_dimension_numbers<[1], [0], [0], [1], [0, 0, 1, 1], [], []>} : vector<8x32xf32>, vector<32x16xf32>, vector<8x16xf32> -> vector<8x16xf32>
    %cst_64 = arith.constant 0.176776692 : f32
    %107 = vector.broadcast %cst_64 : f32 to vector<8x16xf32>
    %108 = arith.mulf %106, %107 : vector<8x16xf32>
    %cst_65 = arith.constant dense<0xFF800000> : vector<16xf32>
    %109 = vector.multi_reduction <maximumf>, %108, %cst_65 [0] : vector<8x16xf32> to vector<16xf32>
    %cst_66 = arith.constant 0xFF800000 : f32
    %110 = vector.broadcast %cst_66 : f32 to vector<16xf32>
    %111 = arith.maximumf %110, %109 : vector<16xf32>
    %112 = vector.shape_cast %111 : vector<16xf32> to vector<1x16xf32>
    %113 = vector.broadcast %112 : vector<1x16xf32> to vector<8x16xf32>
    %114 = arith.subf %108, %113 : vector<8x16xf32>
    %115 = math.exp %114 : vector<8x16xf32>
    %cst_67 = arith.constant dense<0.000000e+00> : vector<16xf32>
    %116 = vector.multi_reduction <add>, %115, %cst_67 [0] : vector<8x16xf32> to vector<16xf32>
    %117 = vector.shape_cast %116 : vector<16xf32> to vector<1x16xf32>
    %118 = vector.broadcast %117 : vector<1x16xf32> to vector<8x16xf32>
    %119 = arith.divf %115, %118 : vector<8x16xf32>
    %cst_68 = arith.constant dense<0.000000e+00> : vector<8xf32>
    %120 = vector.multi_reduction <add>, %119, %cst_68 [1] : vector<8x16xf32> to vector<8xf32>
    %121 = vector.shape_cast %120 : vector<8xf32> to vector<8x1xf32>
    %cst_69 = arith.constant 9.99999993E-9 : f32
    %122 = vector.broadcast %cst_69 : f32 to vector<8x1xf32>
    %123 = arith.addf %121, %122 : vector<8x1xf32>
    %124 = tpu.reciprocal %123 : vector<8x1xf32> -> vector<8x1xf32>
    %125 = vector.broadcast %124 : vector<8x1xf32> to vector<8x16xf32>
    %126 = arith.mulf %119, %125 : vector<8x16xf32>
    %cst_70 = arith.constant dense<0.000000e+00> : vector<8x32xf32>
    %127 = tpu.matmul %126, %105, %cst_70 {dimension_numbers = #tpu.dot_dimension_numbers<[1], [0], [0], [1], [0, 0, 1, 1], [], []>} : vector<8x16xf32>, vector<16x32xf32>, vector<8x32xf32> -> vector<8x32xf32>
    %128 = arith.addf %96, %127 : vector<8x32xf32>
    %c0_71 = arith.constant 0 : index
    %c0_72 = arith.constant 0 : index
    %129 = vector.load %arg11[%c0_71, %c0_72] : memref<128x32xf32, #tpu.memory_space<vmem>>, vector<8x32xf32>
    tpu.vector_store %arg11[%c0_71, %c0_72], %128 {strides = array<i32>} : memref<128x32xf32, #tpu.memory_space<vmem>>, vector<8x32xf32>,
    %cst_73 = arith.constant dense<0.000000e+00> : vector<8x32xf32>
    %130 = tpu.matmul %98, %0, %cst_73 {dimension_numbers = #tpu.dot_dimension_numbers<[1], [0], [0], [1], [0, 0, 1, 1], [], []>} : vector<8x32xf32>, vector<32x32xf32>, vector<8x32xf32> -> vector<8x32xf32>
    %131 = vector.extract_strided_slice %2 {offsets = [0, 0], sizes = [1, 32], strides = [1, 1]} : vector<8x32xf32> to vector<1x32xf32>
    %132 = vector.broadcast %131 : vector<1x32xf32> to vector<8x32xf32>
    %133 = arith.addf %130, %132 : vector<8x32xf32>
    %c8_74 = arith.constant 8 : index
    %c0_75 = arith.constant 0 : index
    %c0_76 = arith.constant 0 : index
    %134 = vector.load %arg9[%c8_74, %c0_75, %c0_76] : memref<16x32x16xf32, #tpu.memory_space<vmem>>, vector<1x32x16xf32>
    %135 = vector.shape_cast %134 : vector<1x32x16xf32> to vector<32x16xf32>
    %c128_77 = arith.constant 128 : index
    %c0_78 = arith.constant 0 : index
    %136 = vector.load %arg10[%c128_77, %c0_78] : memref<256x32xf32, #tpu.memory_space<vmem>>, vector<16x32xf32>
    %cst_79 = arith.constant dense<0.000000e+00> : vector<8x16xf32>
    %137 = tpu.matmul %133, %135, %cst_79 {dimension_numbers = #tpu.dot_dimension_numbers<[1], [0], [0], [1], [0, 0, 1, 1], [], []>} : vector<8x32xf32>, vector<32x16xf32>, vector<8x16xf32> -> vector<8x16xf32>
    %cst_80 = arith.constant 0.176776692 : f32
    %138 = vector.broadcast %cst_80 : f32 to vector<8x16xf32>
    %139 = arith.mulf %137, %138 : vector<8x16xf32>
    %cst_81 = arith.constant dense<0xFF800000> : vector<16xf32>
    %140 = vector.multi_reduction <maximumf>, %139, %cst_81 [0] : vector<8x16xf32> to vector<16xf32>
    %cst_82 = arith.constant 0xFF800000 : f32
    %141 = vector.broadcast %cst_82 : f32 to vector<16xf32>
    %142 = arith.maximumf %141, %140 : vector<16xf32>
    %143 = vector.shape_cast %142 : vector<16xf32> to vector<1x16xf32>
    %144 = vector.broadcast %143 : vector<1x16xf32> to vector<8x16xf32>
    %145 = arith.subf %139, %144 : vector<8x16xf32>
    %146 = math.exp %145 : vector<8x16xf32>
    %cst_83 = arith.constant dense<0.000000e+00> : vector<16xf32>
    %147 = vector.multi_reduction <add>, %146, %cst_83 [0] : vector<8x16xf32> to vector<16xf32>
    %148 = vector.shape_cast %147 : vector<16xf32> to vector<1x16xf32>
    %149 = vector.broadcast %148 : vector<1x16xf32> to vector<8x16xf32>
    %150 = arith.divf %146, %149 : vector<8x16xf32>
    %cst_84 = arith.constant dense<0.000000e+00> : vector<8xf32>
    %151 = vector.multi_reduction <add>, %150, %cst_84 [1] : vector<8x16xf32> to vector<8xf32>
    %152 = vector.shape_cast %151 : vector<8xf32> to vector<8x1xf32>
    %cst_85 = arith.constant 9.99999993E-9 : f32
    %153 = vector.broadcast %cst_85 : f32 to vector<8x1xf32>
    %154 = arith.addf %152, %153 : vector<8x1xf32>
    %155 = tpu.reciprocal %154 : vector<8x1xf32> -> vector<8x1xf32>
    %156 = vector.broadcast %155 : vector<8x1xf32> to vector<8x16xf32>
    %157 = arith.mulf %150, %156 : vector<8x16xf32>
    %cst_86 = arith.constant dense<0.000000e+00> : vector<8x32xf32>
    %158 = tpu.matmul %157, %136, %cst_86 {dimension_numbers = #tpu.dot_dimension_numbers<[1], [0], [0], [1], [0, 0, 1, 1], [], []>} : vector<8x16xf32>, vector<16x32xf32>, vector<8x32xf32> -> vector<8x32xf32>
    %159 = arith.addf %98, %158 : vector<8x32xf32>
    %c64 = arith.constant 64 : index
    %c0_87 = arith.constant 0 : index
    %160 = vector.load %arg11[%c64, %c0_87] : memref<128x32xf32, #tpu.memory_space<vmem>>, vector<8x32xf32>
    tpu.vector_store %arg11[%c64, %c0_87], %159 {strides = array<i32>} : memref<128x32xf32, #tpu.memory_space<vmem>>, vector<8x32xf32>,
    %cst_88 = arith.constant dense<0.000000e+00> : vector<8x32xf32>
    %161 = tpu.matmul %128, %0, %cst_88 {dimension_numbers = #tpu.dot_dimension_numbers<[1], [0], [0], [1], [0, 0, 1, 1], [], []>} : vector<8x32xf32>, vector<32x32xf32>, vector<8x32xf32> -> vector<8x32xf32>
    %162 = vector.extract_strided_slice %2 {offsets = [1, 0], sizes = [1, 32], strides = [1, 1]} : vector<8x32xf32> to vector<1x32xf32>
    %163 = vector.broadcast %162 : vector<1x32xf32> to vector<8x32xf32>
    %164 = arith.addf %161, %163 : vector<8x32xf32>
    %c1_89 = arith.constant 1 : index
    %c0_90 = arith.constant 0 : index
    %c0_91 = arith.constant 0 : index
    %165 = vector.load %arg9[%c1_89, %c0_90, %c0_91] : memref<16x32x16xf32, #tpu.memory_space<vmem>>, vector<1x32x16xf32>
    %166 = vector.shape_cast %165 : vector<1x32x16xf32> to vector<32x16xf32>
    %c16 = arith.constant 16 : index
    %c0_92 = arith.constant 0 : index
    %167 = vector.load %arg10[%c16, %c0_92] : memref<256x32xf32, #tpu.memory_space<vmem>>, vector<16x32xf32>
    %cst_93 = arith.constant dense<0.000000e+00> : vector<8x16xf32>
    %168 = tpu.matmul %164, %166, %cst_93 {dimension_numbers = #tpu.dot_dimension_numbers<[1], [0], [0], [1], [0, 0, 1, 1], [], []>} : vector<8x32xf32>, vector<32x16xf32>, vector<8x16xf32> -> vector<8x16xf32>
    %cst_94 = arith.constant 0.176776692 : f32
    %169 = vector.broadcast %cst_94 : f32 to vector<8x16xf32>
    %170 = arith.mulf %168, %169 : vector<8x16xf32>
    %cst_95 = arith.constant dense<0xFF800000> : vector<16xf32>
    %171 = vector.multi_reduction <maximumf>, %170, %cst_95 [0] : vector<8x16xf32> to vector<16xf32>
    %cst_96 = arith.constant 0xFF800000 : f32
    %172 = vector.broadcast %cst_96 : f32 to vector<16xf32>
    %173 = arith.maximumf %172, %171 : vector<16xf32>
    %174 = vector.shape_cast %173 : vector<16xf32> to vector<1x16xf32>
    %175 = vector.broadcast %174 : vector<1x16xf32> to vector<8x16xf32>
    %176 = arith.subf %170, %175 : vector<8x16xf32>
    %177 = math.exp %176 : vector<8x16xf32>
    %cst_97 = arith.constant dense<0.000000e+00> : vector<16xf32>
    %178 = vector.multi_reduction <add>, %177, %cst_97 [0] : vector<8x16xf32> to vector<16xf32>
    %179 = vector.shape_cast %178 : vector<16xf32> to vector<1x16xf32>
    %180 = vector.broadcast %179 : vector<1x16xf32> to vector<8x16xf32>
    %181 = arith.divf %177, %180 : vector<8x16xf32>
    %cst_98 = arith.constant dense<0.000000e+00> : vector<8xf32>
    %182 = vector.multi_reduction <add>, %181, %cst_98 [1] : vector<8x16xf32> to vector<8xf32>
    %183 = vector.shape_cast %182 : vector<8xf32> to vector<8x1xf32>
    %cst_99 = arith.constant 9.99999993E-9 : f32
    %184 = vector.broadcast %cst_99 : f32 to vector<8x1xf32>
    %185 = arith.addf %183, %184 : vector<8x1xf32>
    %186 = tpu.reciprocal %185 : vector<8x1xf32> -> vector<8x1xf32>
    %187 = vector.broadcast %186 : vector<8x1xf32> to vector<8x16xf32>
    %188 = arith.mulf %181, %187 : vector<8x16xf32>
    %cst_100 = arith.constant dense<0.000000e+00> : vector<8x32xf32>
    %189 = tpu.matmul %188, %167, %cst_100 {dimension_numbers = #tpu.dot_dimension_numbers<[1], [0], [0], [1], [0, 0, 1, 1], [], []>} : vector<8x16xf32>, vector<16x32xf32>, vector<8x32xf32> -> vector<8x32xf32>
    %190 = arith.addf %128, %189 : vector<8x32xf32>
    %c8_101 = arith.constant 8 : index
    %c0_102 = arith.constant 0 : index
    %191 = vector.load %arg11[%c8_101, %c0_102] : memref<128x32xf32, #tpu.memory_space<vmem>>, vector<8x32xf32>
    tpu.vector_store %arg11[%c8_101, %c0_102], %190 {strides = array<i32>} : memref<128x32xf32, #tpu.memory_space<vmem>>, vector<8x32xf32>,
    %cst_103 = arith.constant dense<0.000000e+00> : vector<8x32xf32>
    %192 = tpu.matmul %159, %0, %cst_103 {dimension_numbers = #tpu.dot_dimension_numbers<[1], [0], [0], [1], [0, 0, 1, 1], [], []>} : vector<8x32xf32>, vector<32x32xf32>, vector<8x32xf32> -> vector<8x32xf32>
    %193 = vector.extract_strided_slice %2 {offsets = [1, 0], sizes = [1, 32], strides = [1, 1]} : vector<8x32xf32> to vector<1x32xf32>
    %194 = vector.broadcast %193 : vector<1x32xf32> to vector<8x32xf32>
    %195 = arith.addf %192, %194 : vector<8x32xf32>
    %c9_104 = arith.constant 9 : index
    %c0_105 = arith.constant 0 : index
    %c0_106 = arith.constant 0 : index
    %196 = vector.load %arg9[%c9_104, %c0_105, %c0_106] : memref<16x32x16xf32, #tpu.memory_space<vmem>>, vector<1x32x16xf32>
    %197 = vector.shape_cast %196 : vector<1x32x16xf32> to vector<32x16xf32>
    %c144 = arith.constant 144 : index
    %c0_107 = arith.constant 0 : index
    %198 = vector.load %arg10[%c144, %c0_107] : memref<256x32xf32, #tpu.memory_space<vmem>>, vector<16x32xf32>
    %cst_108 = arith.constant dense<0.000000e+00> : vector<8x16xf32>
    %199 = tpu.matmul %195, %197, %cst_108 {dimension_numbers = #tpu.dot_dimension_numbers<[1], [0], [0], [1], [0, 0, 1, 1], [], []>} : vector<8x32xf32>, vector<32x16xf32>, vector<8x16xf32> -> vector<8x16xf32>
    %cst_109 = arith.constant 0.176776692 : f32
    %200 = vector.broadcast %cst_109 : f32 to vector<8x16xf32>
    %201 = arith.mulf %199, %200 : vector<8x16xf32>
    %cst_110 = arith.constant dense<0xFF800000> : vector<16xf32>
    %202 = vector.multi_reduction <maximumf>, %201, %cst_110 [0] : vector<8x16xf32> to vector<16xf32>
    %cst_111 = arith.constant 0xFF800000 : f32
    %203 = vector.broadcast %cst_111 : f32 to vector<16xf32>
    %204 = arith.maximumf %203, %202 : vector<16xf32>
    %205 = vector.shape_cast %204 : vector<16xf32> to vector<1x16xf32>
    %206 = vector.broadcast %205 : vector<1x16xf32> to vector<8x16xf32>
    %207 = arith.subf %201, %206 : vector<8x16xf32>
    %208 = math.exp %207 : vector<8x16xf32>
    %cst_112 = arith.constant dense<0.000000e+00> : vector<16xf32>
    %209 = vector.multi_reduction <add>, %208, %cst_112 [0] : vector<8x16xf32> to vector<16xf32>
    %210 = vector.shape_cast %209 : vector<16xf32> to vector<1x16xf32>
    %211 = vector.broadcast %210 : vector<1x16xf32> to vector<8x16xf32>
    %212 = arith.divf %208, %211 : vector<8x16xf32>
    %cst_113 = arith.constant dense<0.000000e+00> : vector<8xf32>
    %213 = vector.multi_reduction <add>, %212, %cst_113 [1] : vector<8x16xf32> to vector<8xf32>
    %214 = vector.shape_cast %213 : vector<8xf32> to vector<8x1xf32>
    %cst_114 = arith.constant 9.99999993E-9 : f32
    %215 = vector.broadcast %cst_114 : f32 to vector<8x1xf32>
    %216 = arith.addf %214, %215 : vector<8x1xf32>
    %217 = tpu.reciprocal %216 : vector<8x1xf32> -> vector<8x1xf32>
    %218 = vector.broadcast %217 : vector<8x1xf32> to vector<8x16xf32>
    %219 = arith.mulf %212, %218 : vector<8x16xf32>
    %cst_115 = arith.constant dense<0.000000e+00> : vector<8x32xf32>
    %220 = tpu.matmul %219, %198, %cst_115 {dimension_numbers = #tpu.dot_dimension_numbers<[1], [0], [0], [1], [0, 0, 1, 1], [], []>} : vector<8x16xf32>, vector<16x32xf32>, vector<8x32xf32> -> vector<8x32xf32>
    %221 = arith.addf %159, %220 : vector<8x32xf32>
    %c72 = arith.constant 72 : index
    %c0_116 = arith.constant 0 : index
    %222 = vector.load %arg11[%c72, %c0_116] : memref<128x32xf32, #tpu.memory_space<vmem>>, vector<8x32xf32>
    tpu.vector_store %arg11[%c72, %c0_116], %221 {strides = array<i32>} : memref<128x32xf32, #tpu.memory_space<vmem>>, vector<8x32xf32>,
    %cst_117 = arith.constant dense<0.000000e+00> : vector<8x32xf32>
    %223 = tpu.matmul %190, %0, %cst_117 {dimension_numbers = #tpu.dot_dimension_numbers<[1], [0], [0], [1], [0, 0, 1, 1], [], []>} : vector<8x32xf32>, vector<32x32xf32>, vector<8x32xf32> -> vector<8x32xf32>
    %224 = vector.extract_strided_slice %2 {offsets = [2, 0], sizes = [1, 32], strides = [1, 1]} : vector<8x32xf32> to vector<1x32xf32>
    %225 = vector.broadcast %224 : vector<1x32xf32> to vector<8x32xf32>
    %226 = arith.addf %223, %225 : vector<8x32xf32>
    %c2_118 = arith.constant 2 : index
    %c0_119 = arith.constant 0 : index
    %c0_120 = arith.constant 0 : index
    %227 = vector.load %arg9[%c2_118, %c0_119, %c0_120] : memref<16x32x16xf32, #tpu.memory_space<vmem>>, vector<1x32x16xf32>
    %228 = vector.shape_cast %227 : vector<1x32x16xf32> to vector<32x16xf32>
    %c32 = arith.constant 32 : index
    %c0_121 = arith.constant 0 : index
    %229 = vector.load %arg10[%c32, %c0_121] : memref<256x32xf32, #tpu.memory_space<vmem>>, vector<16x32xf32>
    %cst_122 = arith.constant dense<0.000000e+00> : vector<8x16xf32>
    %230 = tpu.matmul %226, %228, %cst_122 {dimension_numbers = #tpu.dot_dimension_numbers<[1], [0], [0], [1], [0, 0, 1, 1], [], []>} : vector<8x32xf32>, vector<32x16xf32>, vector<8x16xf32> -> vector<8x16xf32>
    %cst_123 = arith.constant 0.176776692 : f32
    %231 = vector.broadcast %cst_123 : f32 to vector<8x16xf32>
    %232 = arith.mulf %230, %231 : vector<8x16xf32>
    %cst_124 = arith.constant dense<0xFF800000> : vector<16xf32>
    %233 = vector.multi_reduction <maximumf>, %232, %cst_124 [0] : vector<8x16xf32> to vector<16xf32>
    %cst_125 = arith.constant 0xFF800000 : f32
    %234 = vector.broadcast %cst_125 : f32 to vector<16xf32>
    %235 = arith.maximumf %234, %233 : vector<16xf32>
    %236 = vector.shape_cast %235 : vector<16xf32> to vector<1x16xf32>
    %237 = vector.broadcast %236 : vector<1x16xf32> to vector<8x16xf32>
    %238 = arith.subf %232, %237 : vector<8x16xf32>
    %239 = math.exp %238 : vector<8x16xf32>
    %cst_126 = arith.constant dense<0.000000e+00> : vector<16xf32>
    %240 = vector.multi_reduction <add>, %239, %cst_126 [0] : vector<8x16xf32> to vector<16xf32>
    %241 = vector.shape_cast %240 : vector<16xf32> to vector<1x16xf32>
    %242 = vector.broadcast %241 : vector<1x16xf32> to vector<8x16xf32>
    %243 = arith.divf %239, %242 : vector<8x16xf32>
    %cst_127 = arith.constant dense<0.000000e+00> : vector<8xf32>
    %244 = vector.multi_reduction <add>, %243, %cst_127 [1] : vector<8x16xf32> to vector<8xf32>
    %245 = vector.shape_cast %244 : vector<8xf32> to vector<8x1xf32>
    %cst_128 = arith.constant 9.99999993E-9 : f32
    %246 = vector.broadcast %cst_128 : f32 to vector<8x1xf32>
    %247 = arith.addf %245, %246 : vector<8x1xf32>
    %248 = tpu.reciprocal %247 : vector<8x1xf32> -> vector<8x1xf32>
    %249 = vector.broadcast %248 : vector<8x1xf32> to vector<8x16xf32>
    %250 = arith.mulf %243, %249 : vector<8x16xf32>
    %cst_129 = arith.constant dense<0.000000e+00> : vector<8x32xf32>
    %251 = tpu.matmul %250, %229, %cst_129 {dimension_numbers = #tpu.dot_dimension_numbers<[1], [0], [0], [1], [0, 0, 1, 1], [], []>} : vector<8x16xf32>, vector<16x32xf32>, vector<8x32xf32> -> vector<8x32xf32>
    %252 = arith.addf %190, %251 : vector<8x32xf32>
    %c16_130 = arith.constant 16 : index
    %c0_131 = arith.constant 0 : index
    %253 = vector.load %arg11[%c16_130, %c0_131] : memref<128x32xf32, #tpu.memory_space<vmem>>, vector<8x32xf32>
    tpu.vector_store %arg11[%c16_130, %c0_131], %252 {strides = array<i32>} : memref<128x32xf32, #tpu.memory_space<vmem>>, vector<8x32xf32>,
    %cst_132 = arith.constant dense<0.000000e+00> : vector<8x32xf32>
    %254 = tpu.matmul %221, %0, %cst_132 {dimension_numbers = #tpu.dot_dimension_numbers<[1], [0], [0], [1], [0, 0, 1, 1], [], []>} : vector<8x32xf32>, vector<32x32xf32>, vector<8x32xf32> -> vector<8x32xf32>
    %255 = vector.extract_strided_slice %2 {offsets = [2, 0], sizes = [1, 32], strides = [1, 1]} : vector<8x32xf32> to vector<1x32xf32>
    %256 = vector.broadcast %255 : vector<1x32xf32> to vector<8x32xf32>
    %257 = arith.addf %254, %256 : vector<8x32xf32>
    %c10_133 = arith.constant 10 : index
    %c0_134 = arith.constant 0 : index
    %c0_135 = arith.constant 0 : index
    %258 = vector.load %arg9[%c10_133, %c0_134, %c0_135] : memref<16x32x16xf32, #tpu.memory_space<vmem>>, vector<1x32x16xf32>
    %259 = vector.shape_cast %258 : vector<1x32x16xf32> to vector<32x16xf32>
    %c160 = arith.constant 160 : index
    %c0_136 = arith.constant 0 : index
    %260 = vector.load %arg10[%c160, %c0_136] : memref<256x32xf32, #tpu.memory_space<vmem>>, vector<16x32xf32>
    %cst_137 = arith.constant dense<0.000000e+00> : vector<8x16xf32>
    %261 = tpu.matmul %257, %259, %cst_137 {dimension_numbers = #tpu.dot_dimension_numbers<[1], [0], [0], [1], [0, 0, 1, 1], [], []>} : vector<8x32xf32>, vector<32x16xf32>, vector<8x16xf32> -> vector<8x16xf32>
    %cst_138 = arith.constant 0.176776692 : f32
    %262 = vector.broadcast %cst_138 : f32 to vector<8x16xf32>
    %263 = arith.mulf %261, %262 : vector<8x16xf32>
    %cst_139 = arith.constant dense<0xFF800000> : vector<16xf32>
    %264 = vector.multi_reduction <maximumf>, %263, %cst_139 [0] : vector<8x16xf32> to vector<16xf32>
    %cst_140 = arith.constant 0xFF800000 : f32
    %265 = vector.broadcast %cst_140 : f32 to vector<16xf32>
    %266 = arith.maximumf %265, %264 : vector<16xf32>
    %267 = vector.shape_cast %266 : vector<16xf32> to vector<1x16xf32>
    %268 = vector.broadcast %267 : vector<1x16xf32> to vector<8x16xf32>
    %269 = arith.subf %263, %268 : vector<8x16xf32>
    %270 = math.exp %269 : vector<8x16xf32>
    %cst_141 = arith.constant dense<0.000000e+00> : vector<16xf32>
    %271 = vector.multi_reduction <add>, %270, %cst_141 [0] : vector<8x16xf32> to vector<16xf32>
    %272 = vector.shape_cast %271 : vector<16xf32> to vector<1x16xf32>
    %273 = vector.broadcast %272 : vector<1x16xf32> to vector<8x16xf32>
    %274 = arith.divf %270, %273 : vector<8x16xf32>
    %cst_142 = arith.constant dense<0.000000e+00> : vector<8xf32>
    %275 = vector.multi_reduction <add>, %274, %cst_142 [1] : vector<8x16xf32> to vector<8xf32>
    %276 = vector.shape_cast %275 : vector<8xf32> to vector<8x1xf32>
    %cst_143 = arith.constant 9.99999993E-9 : f32
    %277 = vector.broadcast %cst_143 : f32 to vector<8x1xf32>
    %278 = arith.addf %276, %277 : vector<8x1xf32>
    %279 = tpu.reciprocal %278 : vector<8x1xf32> -> vector<8x1xf32>
    %280 = vector.broadcast %279 : vector<8x1xf32> to vector<8x16xf32>
    %281 = arith.mulf %274, %280 : vector<8x16xf32>
    %cst_144 = arith.constant dense<0.000000e+00> : vector<8x32xf32>
    %282 = tpu.matmul %281, %260, %cst_144 {dimension_numbers = #tpu.dot_dimension_numbers<[1], [0], [0], [1], [0, 0, 1, 1], [], []>} : vector<8x16xf32>, vector<16x32xf32>, vector<8x32xf32> -> vector<8x32xf32>
    %283 = arith.addf %221, %282 : vector<8x32xf32>
    %c80 = arith.constant 80 : index
    %c0_145 = arith.constant 0 : index
    %284 = vector.load %arg11[%c80, %c0_145] : memref<128x32xf32, #tpu.memory_space<vmem>>, vector<8x32xf32>
    tpu.vector_store %arg11[%c80, %c0_145], %283 {strides = array<i32>} : memref<128x32xf32, #tpu.memory_space<vmem>>, vector<8x32xf32>,
    %cst_146 = arith.constant dense<0.000000e+00> : vector<8x32xf32>
    %285 = tpu.matmul %252, %0, %cst_146 {dimension_numbers = #tpu.dot_dimension_numbers<[1], [0], [0], [1], [0, 0, 1, 1], [], []>} : vector<8x32xf32>, vector<32x32xf32>, vector<8x32xf32> -> vector<8x32xf32>
    %286 = vector.extract_strided_slice %2 {offsets = [3, 0], sizes = [1, 32], strides = [1, 1]} : vector<8x32xf32> to vector<1x32xf32>
    %287 = vector.broadcast %286 : vector<1x32xf32> to vector<8x32xf32>
    %288 = arith.addf %285, %287 : vector<8x32xf32>
    %c3_147 = arith.constant 3 : index
    %c0_148 = arith.constant 0 : index
    %c0_149 = arith.constant 0 : index
    %289 = vector.load %arg9[%c3_147, %c0_148, %c0_149] : memref<16x32x16xf32, #tpu.memory_space<vmem>>, vector<1x32x16xf32>
    %290 = vector.shape_cast %289 : vector<1x32x16xf32> to vector<32x16xf32>
    %c48 = arith.constant 48 : index
    %c0_150 = arith.constant 0 : index
    %291 = vector.load %arg10[%c48, %c0_150] : memref<256x32xf32, #tpu.memory_space<vmem>>, vector<16x32xf32>
    %cst_151 = arith.constant dense<0.000000e+00> : vector<8x16xf32>
    %292 = tpu.matmul %288, %290, %cst_151 {dimension_numbers = #tpu.dot_dimension_numbers<[1], [0], [0], [1], [0, 0, 1, 1], [], []>} : vector<8x32xf32>, vector<32x16xf32>, vector<8x16xf32> -> vector<8x16xf32>
    %cst_152 = arith.constant 0.176776692 : f32
    %293 = vector.broadcast %cst_152 : f32 to vector<8x16xf32>
    %294 = arith.mulf %292, %293 : vector<8x16xf32>
    %cst_153 = arith.constant dense<0xFF800000> : vector<16xf32>
    %295 = vector.multi_reduction <maximumf>, %294, %cst_153 [0] : vector<8x16xf32> to vector<16xf32>
    %cst_154 = arith.constant 0xFF800000 : f32
    %296 = vector.broadcast %cst_154 : f32 to vector<16xf32>
    %297 = arith.maximumf %296, %295 : vector<16xf32>
    %298 = vector.shape_cast %297 : vector<16xf32> to vector<1x16xf32>
    %299 = vector.broadcast %298 : vector<1x16xf32> to vector<8x16xf32>
    %300 = arith.subf %294, %299 : vector<8x16xf32>
    %301 = math.exp %300 : vector<8x16xf32>
    %cst_155 = arith.constant dense<0.000000e+00> : vector<16xf32>
    %302 = vector.multi_reduction <add>, %301, %cst_155 [0] : vector<8x16xf32> to vector<16xf32>
    %303 = vector.shape_cast %302 : vector<16xf32> to vector<1x16xf32>
    %304 = vector.broadcast %303 : vector<1x16xf32> to vector<8x16xf32>
    %305 = arith.divf %301, %304 : vector<8x16xf32>
    %cst_156 = arith.constant dense<0.000000e+00> : vector<8xf32>
    %306 = vector.multi_reduction <add>, %305, %cst_156 [1] : vector<8x16xf32> to vector<8xf32>
    %307 = vector.shape_cast %306 : vector<8xf32> to vector<8x1xf32>
    %cst_157 = arith.constant 9.99999993E-9 : f32
    %308 = vector.broadcast %cst_157 : f32 to vector<8x1xf32>
    %309 = arith.addf %307, %308 : vector<8x1xf32>
    %310 = tpu.reciprocal %309 : vector<8x1xf32> -> vector<8x1xf32>
    %311 = vector.broadcast %310 : vector<8x1xf32> to vector<8x16xf32>
    %312 = arith.mulf %305, %311 : vector<8x16xf32>
    %cst_158 = arith.constant dense<0.000000e+00> : vector<8x32xf32>
    %313 = tpu.matmul %312, %291, %cst_158 {dimension_numbers = #tpu.dot_dimension_numbers<[1], [0], [0], [1], [0, 0, 1, 1], [], []>} : vector<8x16xf32>, vector<16x32xf32>, vector<8x32xf32> -> vector<8x32xf32>
    %314 = arith.addf %252, %313 : vector<8x32xf32>
    %c24 = arith.constant 24 : index
    %c0_159 = arith.constant 0 : index
    %315 = vector.load %arg11[%c24, %c0_159] : memref<128x32xf32, #tpu.memory_space<vmem>>, vector<8x32xf32>
    tpu.vector_store %arg11[%c24, %c0_159], %314 {strides = array<i32>} : memref<128x32xf32, #tpu.memory_space<vmem>>, vector<8x32xf32>,
    %cst_160 = arith.constant dense<0.000000e+00> : vector<8x32xf32>
    %316 = tpu.matmul %283, %0, %cst_160 {dimension_numbers = #tpu.dot_dimension_numbers<[1], [0], [0], [1], [0, 0, 1, 1], [], []>} : vector<8x32xf32>, vector<32x32xf32>, vector<8x32xf32> -> vector<8x32xf32>
    %317 = vector.extract_strided_slice %2 {offsets = [3, 0], sizes = [1, 32], strides = [1, 1]} : vector<8x32xf32> to vector<1x32xf32>
    %318 = vector.broadcast %317 : vector<1x32xf32> to vector<8x32xf32>
    %319 = arith.addf %316, %318 : vector<8x32xf32>
    %c11_161 = arith.constant 11 : index
    %c0_162 = arith.constant 0 : index
    %c0_163 = arith.constant 0 : index
    %320 = vector.load %arg9[%c11_161, %c0_162, %c0_163] : memref<16x32x16xf32, #tpu.memory_space<vmem>>, vector<1x32x16xf32>
    %321 = vector.shape_cast %320 : vector<1x32x16xf32> to vector<32x16xf32>
    %c176 = arith.constant 176 : index
    %c0_164 = arith.constant 0 : index
    %322 = vector.load %arg10[%c176, %c0_164] : memref<256x32xf32, #tpu.memory_space<vmem>>, vector<16x32xf32>
    %cst_165 = arith.constant dense<0.000000e+00> : vector<8x16xf32>
    %323 = tpu.matmul %319, %321, %cst_165 {dimension_numbers = #tpu.dot_dimension_numbers<[1], [0], [0], [1], [0, 0, 1, 1], [], []>} : vector<8x32xf32>, vector<32x16xf32>, vector<8x16xf32> -> vector<8x16xf32>
    %cst_166 = arith.constant 0.176776692 : f32
    %324 = vector.broadcast %cst_166 : f32 to vector<8x16xf32>
    %325 = arith.mulf %323, %324 : vector<8x16xf32>
    %cst_167 = arith.constant dense<0xFF800000> : vector<16xf32>
    %326 = vector.multi_reduction <maximumf>, %325, %cst_167 [0] : vector<8x16xf32> to vector<16xf32>
    %cst_168 = arith.constant 0xFF800000 : f32
    %327 = vector.broadcast %cst_168 : f32 to vector<16xf32>
    %328 = arith.maximumf %327, %326 : vector<16xf32>
    %329 = vector.shape_cast %328 : vector<16xf32> to vector<1x16xf32>
    %330 = vector.broadcast %329 : vector<1x16xf32> to vector<8x16xf32>
    %331 = arith.subf %325, %330 : vector<8x16xf32>
    %332 = math.exp %331 : vector<8x16xf32>
    %cst_169 = arith.constant dense<0.000000e+00> : vector<16xf32>
    %333 = vector.multi_reduction <add>, %332, %cst_169 [0] : vector<8x16xf32> to vector<16xf32>
    %334 = vector.shape_cast %333 : vector<16xf32> to vector<1x16xf32>
    %335 = vector.broadcast %334 : vector<1x16xf32> to vector<8x16xf32>
    %336 = arith.divf %332, %335 : vector<8x16xf32>
    %cst_170 = arith.constant dense<0.000000e+00> : vector<8xf32>
    %337 = vector.multi_reduction <add>, %336, %cst_170 [1] : vector<8x16xf32> to vector<8xf32>
    %338 = vector.shape_cast %337 : vector<8xf32> to vector<8x1xf32>
    %cst_171 = arith.constant 9.99999993E-9 : f32
    %339 = vector.broadcast %cst_171 : f32 to vector<8x1xf32>
    %340 = arith.addf %338, %339 : vector<8x1xf32>
    %341 = tpu.reciprocal %340 : vector<8x1xf32> -> vector<8x1xf32>
    %342 = vector.broadcast %341 : vector<8x1xf32> to vector<8x16xf32>
    %343 = arith.mulf %336, %342 : vector<8x16xf32>
    %cst_172 = arith.constant dense<0.000000e+00> : vector<8x32xf32>
    %344 = tpu.matmul %343, %322, %cst_172 {dimension_numbers = #tpu.dot_dimension_numbers<[1], [0], [0], [1], [0, 0, 1, 1], [], []>} : vector<8x16xf32>, vector<16x32xf32>, vector<8x32xf32> -> vector<8x32xf32>
    %345 = arith.addf %283, %344 : vector<8x32xf32>
    %c88 = arith.constant 88 : index
    %c0_173 = arith.constant 0 : index
    %346 = vector.load %arg11[%c88, %c0_173] : memref<128x32xf32, #tpu.memory_space<vmem>>, vector<8x32xf32>
    tpu.vector_store %arg11[%c88, %c0_173], %345 {strides = array<i32>} : memref<128x32xf32, #tpu.memory_space<vmem>>, vector<8x32xf32>,
    %cst_174 = arith.constant dense<0.000000e+00> : vector<8x32xf32>
    %347 = tpu.matmul %314, %0, %cst_174 {dimension_numbers = #tpu.dot_dimension_numbers<[1], [0], [0], [1], [0, 0, 1, 1], [], []>} : vector<8x32xf32>, vector<32x32xf32>, vector<8x32xf32> -> vector<8x32xf32>
    %348 = vector.extract_strided_slice %2 {offsets = [4, 0], sizes = [1, 32], strides = [1, 1]} : vector<8x32xf32> to vector<1x32xf32>
    %349 = vector.broadcast %348 : vector<1x32xf32> to vector<8x32xf32>
    %350 = arith.addf %347, %349 : vector<8x32xf32>
    %c4_175 = arith.constant 4 : index
    %c0_176 = arith.constant 0 : index
    %c0_177 = arith.constant 0 : index
    %351 = vector.load %arg9[%c4_175, %c0_176, %c0_177] : memref<16x32x16xf32, #tpu.memory_space<vmem>>, vector<1x32x16xf32>
    %352 = vector.shape_cast %351 : vector<1x32x16xf32> to vector<32x16xf32>
    %c64_178 = arith.constant 64 : index
    %c0_179 = arith.constant 0 : index
    %353 = vector.load %arg10[%c64_178, %c0_179] : memref<256x32xf32, #tpu.memory_space<vmem>>, vector<16x32xf32>
    %cst_180 = arith.constant dense<0.000000e+00> : vector<8x16xf32>
    %354 = tpu.matmul %350, %352, %cst_180 {dimension_numbers = #tpu.dot_dimension_numbers<[1], [0], [0], [1], [0, 0, 1, 1], [], []>} : vector<8x32xf32>, vector<32x16xf32>, vector<8x16xf32> -> vector<8x16xf32>
    %cst_181 = arith.constant 0.176776692 : f32
    %355 = vector.broadcast %cst_181 : f32 to vector<8x16xf32>
    %356 = arith.mulf %354, %355 : vector<8x16xf32>
    %cst_182 = arith.constant dense<0xFF800000> : vector<16xf32>
    %357 = vector.multi_reduction <maximumf>, %356, %cst_182 [0] : vector<8x16xf32> to vector<16xf32>
    %cst_183 = arith.constant 0xFF800000 : f32
    %358 = vector.broadcast %cst_183 : f32 to vector<16xf32>
    %359 = arith.maximumf %358, %357 : vector<16xf32>
    %360 = vector.shape_cast %359 : vector<16xf32> to vector<1x16xf32>
    %361 = vector.broadcast %360 : vector<1x16xf32> to vector<8x16xf32>
    %362 = arith.subf %356, %361 : vector<8x16xf32>
    %363 = math.exp %362 : vector<8x16xf32>
    %cst_184 = arith.constant dense<0.000000e+00> : vector<16xf32>
    %364 = vector.multi_reduction <add>, %363, %cst_184 [0] : vector<8x16xf32> to vector<16xf32>
    %365 = vector.shape_cast %364 : vector<16xf32> to vector<1x16xf32>
    %366 = vector.broadcast %365 : vector<1x16xf32> to vector<8x16xf32>
    %367 = arith.divf %363, %366 : vector<8x16xf32>
    %cst_185 = arith.constant dense<0.000000e+00> : vector<8xf32>
    %368 = vector.multi_reduction <add>, %367, %cst_185 [1] : vector<8x16xf32> to vector<8xf32>
    %369 = vector.shape_cast %368 : vector<8xf32> to vector<8x1xf32>
    %cst_186 = arith.constant 9.99999993E-9 : f32
    %370 = vector.broadcast %cst_186 : f32 to vector<8x1xf32>
    %371 = arith.addf %369, %370 : vector<8x1xf32>
    %372 = tpu.reciprocal %371 : vector<8x1xf32> -> vector<8x1xf32>
    %373 = vector.broadcast %372 : vector<8x1xf32> to vector<8x16xf32>
    %374 = arith.mulf %367, %373 : vector<8x16xf32>
    %cst_187 = arith.constant dense<0.000000e+00> : vector<8x32xf32>
    %375 = tpu.matmul %374, %353, %cst_187 {dimension_numbers = #tpu.dot_dimension_numbers<[1], [0], [0], [1], [0, 0, 1, 1], [], []>} : vector<8x16xf32>, vector<16x32xf32>, vector<8x32xf32> -> vector<8x32xf32>
    %376 = arith.addf %314, %375 : vector<8x32xf32>
    %c32_188 = arith.constant 32 : index
    %c0_189 = arith.constant 0 : index
    %377 = vector.load %arg11[%c32_188, %c0_189] : memref<128x32xf32, #tpu.memory_space<vmem>>, vector<8x32xf32>
    tpu.vector_store %arg11[%c32_188, %c0_189], %376 {strides = array<i32>} : memref<128x32xf32, #tpu.memory_space<vmem>>, vector<8x32xf32>,
    %cst_190 = arith.constant dense<0.000000e+00> : vector<8x32xf32>
    %378 = tpu.matmul %345, %0, %cst_190 {dimension_numbers = #tpu.dot_dimension_numbers<[1], [0], [0], [1], [0, 0, 1, 1], [], []>} : vector<8x32xf32>, vector<32x32xf32>, vector<8x32xf32> -> vector<8x32xf32>
    %379 = vector.extract_strided_slice %2 {offsets = [4, 0], sizes = [1, 32], strides = [1, 1]} : vector<8x32xf32> to vector<1x32xf32>
    %380 = vector.broadcast %379 : vector<1x32xf32> to vector<8x32xf32>
    %381 = arith.addf %378, %380 : vector<8x32xf32>
    %c12_191 = arith.constant 12 : index
    %c0_192 = arith.constant 0 : index
    %c0_193 = arith.constant 0 : index
    %382 = vector.load %arg9[%c12_191, %c0_192, %c0_193] : memref<16x32x16xf32, #tpu.memory_space<vmem>>, vector<1x32x16xf32>
    %383 = vector.shape_cast %382 : vector<1x32x16xf32> to vector<32x16xf32>
    %c192 = arith.constant 192 : index
    %c0_194 = arith.constant 0 : index
    %384 = vector.load %arg10[%c192, %c0_194] : memref<256x32xf32, #tpu.memory_space<vmem>>, vector<16x32xf32>
    %cst_195 = arith.constant dense<0.000000e+00> : vector<8x16xf32>
    %385 = tpu.matmul %381, %383, %cst_195 {dimension_numbers = #tpu.dot_dimension_numbers<[1], [0], [0], [1], [0, 0, 1, 1], [], []>} : vector<8x32xf32>, vector<32x16xf32>, vector<8x16xf32> -> vector<8x16xf32>
    %cst_196 = arith.constant 0.176776692 : f32
    %386 = vector.broadcast %cst_196 : f32 to vector<8x16xf32>
    %387 = arith.mulf %385, %386 : vector<8x16xf32>
    %cst_197 = arith.constant dense<0xFF800000> : vector<16xf32>
    %388 = vector.multi_reduction <maximumf>, %387, %cst_197 [0] : vector<8x16xf32> to vector<16xf32>
    %cst_198 = arith.constant 0xFF800000 : f32
    %389 = vector.broadcast %cst_198 : f32 to vector<16xf32>
    %390 = arith.maximumf %389, %388 : vector<16xf32>
    %391 = vector.shape_cast %390 : vector<16xf32> to vector<1x16xf32>
    %392 = vector.broadcast %391 : vector<1x16xf32> to vector<8x16xf32>
    %393 = arith.subf %387, %392 : vector<8x16xf32>
    %394 = math.exp %393 : vector<8x16xf32>
    %cst_199 = arith.constant dense<0.000000e+00> : vector<16xf32>
    %395 = vector.multi_reduction <add>, %394, %cst_199 [0] : vector<8x16xf32> to vector<16xf32>
    %396 = vector.shape_cast %395 : vector<16xf32> to vector<1x16xf32>
    %397 = vector.broadcast %396 : vector<1x16xf32> to vector<8x16xf32>
    %398 = arith.divf %394, %397 : vector<8x16xf32>
    %cst_200 = arith.constant dense<0.000000e+00> : vector<8xf32>
    %399 = vector.multi_reduction <add>, %398, %cst_200 [1] : vector<8x16xf32> to vector<8xf32>
    %400 = vector.shape_cast %399 : vector<8xf32> to vector<8x1xf32>
    %cst_201 = arith.constant 9.99999993E-9 : f32
    %401 = vector.broadcast %cst_201 : f32 to vector<8x1xf32>
    %402 = arith.addf %400, %401 : vector<8x1xf32>
    %403 = tpu.reciprocal %402 : vector<8x1xf32> -> vector<8x1xf32>
    %404 = vector.broadcast %403 : vector<8x1xf32> to vector<8x16xf32>
    %405 = arith.mulf %398, %404 : vector<8x16xf32>
    %cst_202 = arith.constant dense<0.000000e+00> : vector<8x32xf32>
    %406 = tpu.matmul %405, %384, %cst_202 {dimension_numbers = #tpu.dot_dimension_numbers<[1], [0], [0], [1], [0, 0, 1, 1], [], []>} : vector<8x16xf32>, vector<16x32xf32>, vector<8x32xf32> -> vector<8x32xf32>
    %407 = arith.addf %345, %406 : vector<8x32xf32>
    %c96 = arith.constant 96 : index
    %c0_203 = arith.constant 0 : index
    %408 = vector.load %arg11[%c96, %c0_203] : memref<128x32xf32, #tpu.memory_space<vmem>>, vector<8x32xf32>
    tpu.vector_store %arg11[%c96, %c0_203], %407 {strides = array<i32>} : memref<128x32xf32, #tpu.memory_space<vmem>>, vector<8x32xf32>,
    %cst_204 = arith.constant dense<0.000000e+00> : vector<8x32xf32>
    %409 = tpu.matmul %376, %0, %cst_204 {dimension_numbers = #tpu.dot_dimension_numbers<[1], [0], [0], [1], [0, 0, 1, 1], [], []>} : vector<8x32xf32>, vector<32x32xf32>, vector<8x32xf32> -> vector<8x32xf32>
    %410 = vector.extract_strided_slice %2 {offsets = [5, 0], sizes = [1, 32], strides = [1, 1]} : vector<8x32xf32> to vector<1x32xf32>
    %411 = vector.broadcast %410 : vector<1x32xf32> to vector<8x32xf32>
    %412 = arith.addf %409, %411 : vector<8x32xf32>
    %c5_205 = arith.constant 5 : index
    %c0_206 = arith.constant 0 : index
    %c0_207 = arith.constant 0 : index
    %413 = vector.load %arg9[%c5_205, %c0_206, %c0_207] : memref<16x32x16xf32, #tpu.memory_space<vmem>>, vector<1x32x16xf32>
    %414 = vector.shape_cast %413 : vector<1x32x16xf32> to vector<32x16xf32>
    %c80_208 = arith.constant 80 : index
    %c0_209 = arith.constant 0 : index
    %415 = vector.load %arg10[%c80_208, %c0_209] : memref<256x32xf32, #tpu.memory_space<vmem>>, vector<16x32xf32>
    %cst_210 = arith.constant dense<0.000000e+00> : vector<8x16xf32>
    %416 = tpu.matmul %412, %414, %cst_210 {dimension_numbers = #tpu.dot_dimension_numbers<[1], [0], [0], [1], [0, 0, 1, 1], [], []>} : vector<8x32xf32>, vector<32x16xf32>, vector<8x16xf32> -> vector<8x16xf32>
    %cst_211 = arith.constant 0.176776692 : f32
    %417 = vector.broadcast %cst_211 : f32 to vector<8x16xf32>
    %418 = arith.mulf %416, %417 : vector<8x16xf32>
    %cst_212 = arith.constant dense<0xFF800000> : vector<16xf32>
    %419 = vector.multi_reduction <maximumf>, %418, %cst_212 [0] : vector<8x16xf32> to vector<16xf32>
    %cst_213 = arith.constant 0xFF800000 : f32
    %420 = vector.broadcast %cst_213 : f32 to vector<16xf32>
    %421 = arith.maximumf %420, %419 : vector<16xf32>
    %422 = vector.shape_cast %421 : vector<16xf32> to vector<1x16xf32>
    %423 = vector.broadcast %422 : vector<1x16xf32> to vector<8x16xf32>
    %424 = arith.subf %418, %423 : vector<8x16xf32>
    %425 = math.exp %424 : vector<8x16xf32>
    %cst_214 = arith.constant dense<0.000000e+00> : vector<16xf32>
    %426 = vector.multi_reduction <add>, %425, %cst_214 [0] : vector<8x16xf32> to vector<16xf32>
    %427 = vector.shape_cast %426 : vector<16xf32> to vector<1x16xf32>
    %428 = vector.broadcast %427 : vector<1x16xf32> to vector<8x16xf32>
    %429 = arith.divf %425, %428 : vector<8x16xf32>
    %cst_215 = arith.constant dense<0.000000e+00> : vector<8xf32>
    %430 = vector.multi_reduction <add>, %429, %cst_215 [1] : vector<8x16xf32> to vector<8xf32>
    %431 = vector.shape_cast %430 : vector<8xf32> to vector<8x1xf32>
    %cst_216 = arith.constant 9.99999993E-9 : f32
    %432 = vector.broadcast %cst_216 : f32 to vector<8x1xf32>
    %433 = arith.addf %431, %432 : vector<8x1xf32>
    %434 = tpu.reciprocal %433 : vector<8x1xf32> -> vector<8x1xf32>
    %435 = vector.broadcast %434 : vector<8x1xf32> to vector<8x16xf32>
    %436 = arith.mulf %429, %435 : vector<8x16xf32>
    %cst_217 = arith.constant dense<0.000000e+00> : vector<8x32xf32>
    %437 = tpu.matmul %436, %415, %cst_217 {dimension_numbers = #tpu.dot_dimension_numbers<[1], [0], [0], [1], [0, 0, 1, 1], [], []>} : vector<8x16xf32>, vector<16x32xf32>, vector<8x32xf32> -> vector<8x32xf32>
    %438 = arith.addf %376, %437 : vector<8x32xf32>
    %c40 = arith.constant 40 : index
    %c0_218 = arith.constant 0 : index
    %439 = vector.load %arg11[%c40, %c0_218] : memref<128x32xf32, #tpu.memory_space<vmem>>, vector<8x32xf32>
    tpu.vector_store %arg11[%c40, %c0_218], %438 {strides = array<i32>} : memref<128x32xf32, #tpu.memory_space<vmem>>, vector<8x32xf32>,
    %cst_219 = arith.constant dense<0.000000e+00> : vector<8x32xf32>
    %440 = tpu.matmul %407, %0, %cst_219 {dimension_numbers = #tpu.dot_dimension_numbers<[1], [0], [0], [1], [0, 0, 1, 1], [], []>} : vector<8x32xf32>, vector<32x32xf32>, vector<8x32xf32> -> vector<8x32xf32>
    %441 = vector.extract_strided_slice %2 {offsets = [5, 0], sizes = [1, 32], strides = [1, 1]} : vector<8x32xf32> to vector<1x32xf32>
    %442 = vector.broadcast %441 : vector<1x32xf32> to vector<8x32xf32>
    %443 = arith.addf %440, %442 : vector<8x32xf32>
    %c13_220 = arith.constant 13 : index
    %c0_221 = arith.constant 0 : index
    %c0_222 = arith.constant 0 : index
    %444 = vector.load %arg9[%c13_220, %c0_221, %c0_222] : memref<16x32x16xf32, #tpu.memory_space<vmem>>, vector<1x32x16xf32>
    %445 = vector.shape_cast %444 : vector<1x32x16xf32> to vector<32x16xf32>
    %c208 = arith.constant 208 : index
    %c0_223 = arith.constant 0 : index
    %446 = vector.load %arg10[%c208, %c0_223] : memref<256x32xf32, #tpu.memory_space<vmem>>, vector<16x32xf32>
    %cst_224 = arith.constant dense<0.000000e+00> : vector<8x16xf32>
    %447 = tpu.matmul %443, %445, %cst_224 {dimension_numbers = #tpu.dot_dimension_numbers<[1], [0], [0], [1], [0, 0, 1, 1], [], []>} : vector<8x32xf32>, vector<32x16xf32>, vector<8x16xf32> -> vector<8x16xf32>
    %cst_225 = arith.constant 0.176776692 : f32
    %448 = vector.broadcast %cst_225 : f32 to vector<8x16xf32>
    %449 = arith.mulf %447, %448 : vector<8x16xf32>
    %cst_226 = arith.constant dense<0xFF800000> : vector<16xf32>
    %450 = vector.multi_reduction <maximumf>, %449, %cst_226 [0] : vector<8x16xf32> to vector<16xf32>
    %cst_227 = arith.constant 0xFF800000 : f32
    %451 = vector.broadcast %cst_227 : f32 to vector<16xf32>
    %452 = arith.maximumf %451, %450 : vector<16xf32>
    %453 = vector.shape_cast %452 : vector<16xf32> to vector<1x16xf32>
    %454 = vector.broadcast %453 : vector<1x16xf32> to vector<8x16xf32>
    %455 = arith.subf %449, %454 : vector<8x16xf32>
    %456 = math.exp %455 : vector<8x16xf32>
    %cst_228 = arith.constant dense<0.000000e+00> : vector<16xf32>
    %457 = vector.multi_reduction <add>, %456, %cst_228 [0] : vector<8x16xf32> to vector<16xf32>
    %458 = vector.shape_cast %457 : vector<16xf32> to vector<1x16xf32>
    %459 = vector.broadcast %458 : vector<1x16xf32> to vector<8x16xf32>
    %460 = arith.divf %456, %459 : vector<8x16xf32>
    %cst_229 = arith.constant dense<0.000000e+00> : vector<8xf32>
    %461 = vector.multi_reduction <add>, %460, %cst_229 [1] : vector<8x16xf32> to vector<8xf32>
    %462 = vector.shape_cast %461 : vector<8xf32> to vector<8x1xf32>
    %cst_230 = arith.constant 9.99999993E-9 : f32
    %463 = vector.broadcast %cst_230 : f32 to vector<8x1xf32>
    %464 = arith.addf %462, %463 : vector<8x1xf32>
    %465 = tpu.reciprocal %464 : vector<8x1xf32> -> vector<8x1xf32>
    %466 = vector.broadcast %465 : vector<8x1xf32> to vector<8x16xf32>
    %467 = arith.mulf %460, %466 : vector<8x16xf32>
    %cst_231 = arith.constant dense<0.000000e+00> : vector<8x32xf32>
    %468 = tpu.matmul %467, %446, %cst_231 {dimension_numbers = #tpu.dot_dimension_numbers<[1], [0], [0], [1], [0, 0, 1, 1], [], []>} : vector<8x16xf32>, vector<16x32xf32>, vector<8x32xf32> -> vector<8x32xf32>
    %469 = arith.addf %407, %468 : vector<8x32xf32>
    %c104 = arith.constant 104 : index
    %c0_232 = arith.constant 0 : index
    %470 = vector.load %arg11[%c104, %c0_232] : memref<128x32xf32, #tpu.memory_space<vmem>>, vector<8x32xf32>
    tpu.vector_store %arg11[%c104, %c0_232], %469 {strides = array<i32>} : memref<128x32xf32, #tpu.memory_space<vmem>>, vector<8x32xf32>,
    %cst_233 = arith.constant dense<0.000000e+00> : vector<8x32xf32>
    %471 = tpu.matmul %438, %0, %cst_233 {dimension_numbers = #tpu.dot_dimension_numbers<[1], [0], [0], [1], [0, 0, 1, 1], [], []>} : vector<8x32xf32>, vector<32x32xf32>, vector<8x32xf32> -> vector<8x32xf32>
    %472 = vector.extract_strided_slice %2 {offsets = [6, 0], sizes = [1, 32], strides = [1, 1]} : vector<8x32xf32> to vector<1x32xf32>
    %473 = vector.broadcast %472 : vector<1x32xf32> to vector<8x32xf32>
    %474 = arith.addf %471, %473 : vector<8x32xf32>
    %c6_234 = arith.constant 6 : index
    %c0_235 = arith.constant 0 : index
    %c0_236 = arith.constant 0 : index
    %475 = vector.load %arg9[%c6_234, %c0_235, %c0_236] : memref<16x32x16xf32, #tpu.memory_space<vmem>>, vector<1x32x16xf32>
    %476 = vector.shape_cast %475 : vector<1x32x16xf32> to vector<32x16xf32>
    %c96_237 = arith.constant 96 : index
    %c0_238 = arith.constant 0 : index
    %477 = vector.load %arg10[%c96_237, %c0_238] : memref<256x32xf32, #tpu.memory_space<vmem>>, vector<16x32xf32>
    %cst_239 = arith.constant dense<0.000000e+00> : vector<8x16xf32>
    %478 = tpu.matmul %474, %476, %cst_239 {dimension_numbers = #tpu.dot_dimension_numbers<[1], [0], [0], [1], [0, 0, 1, 1], [], []>} : vector<8x32xf32>, vector<32x16xf32>, vector<8x16xf32> -> vector<8x16xf32>
    %cst_240 = arith.constant 0.176776692 : f32
    %479 = vector.broadcast %cst_240 : f32 to vector<8x16xf32>
    %480 = arith.mulf %478, %479 : vector<8x16xf32>
    %cst_241 = arith.constant dense<0xFF800000> : vector<16xf32>
    %481 = vector.multi_reduction <maximumf>, %480, %cst_241 [0] : vector<8x16xf32> to vector<16xf32>
    %cst_242 = arith.constant 0xFF800000 : f32
    %482 = vector.broadcast %cst_242 : f32 to vector<16xf32>
    %483 = arith.maximumf %482, %481 : vector<16xf32>
    %484 = vector.shape_cast %483 : vector<16xf32> to vector<1x16xf32>
    %485 = vector.broadcast %484 : vector<1x16xf32> to vector<8x16xf32>
    %486 = arith.subf %480, %485 : vector<8x16xf32>
    %487 = math.exp %486 : vector<8x16xf32>
    %cst_243 = arith.constant dense<0.000000e+00> : vector<16xf32>
    %488 = vector.multi_reduction <add>, %487, %cst_243 [0] : vector<8x16xf32> to vector<16xf32>
    %489 = vector.shape_cast %488 : vector<16xf32> to vector<1x16xf32>
    %490 = vector.broadcast %489 : vector<1x16xf32> to vector<8x16xf32>
    %491 = arith.divf %487, %490 : vector<8x16xf32>
    %cst_244 = arith.constant dense<0.000000e+00> : vector<8xf32>
    %492 = vector.multi_reduction <add>, %491, %cst_244 [1] : vector<8x16xf32> to vector<8xf32>
    %493 = vector.shape_cast %492 : vector<8xf32> to vector<8x1xf32>
    %cst_245 = arith.constant 9.99999993E-9 : f32
    %494 = vector.broadcast %cst_245 : f32 to vector<8x1xf32>
    %495 = arith.addf %493, %494 : vector<8x1xf32>
    %496 = tpu.reciprocal %495 : vector<8x1xf32> -> vector<8x1xf32>
    %497 = vector.broadcast %496 : vector<8x1xf32> to vector<8x16xf32>
    %498 = arith.mulf %491, %497 : vector<8x16xf32>
    %cst_246 = arith.constant dense<0.000000e+00> : vector<8x32xf32>
    %499 = tpu.matmul %498, %477, %cst_246 {dimension_numbers = #tpu.dot_dimension_numbers<[1], [0], [0], [1], [0, 0, 1, 1], [], []>} : vector<8x16xf32>, vector<16x32xf32>, vector<8x32xf32> -> vector<8x32xf32>
    %500 = arith.addf %438, %499 : vector<8x32xf32>
    %c48_247 = arith.constant 48 : index
    %c0_248 = arith.constant 0 : index
    %501 = vector.load %arg11[%c48_247, %c0_248] : memref<128x32xf32, #tpu.memory_space<vmem>>, vector<8x32xf32>
    tpu.vector_store %arg11[%c48_247, %c0_248], %500 {strides = array<i32>} : memref<128x32xf32, #tpu.memory_space<vmem>>, vector<8x32xf32>,
    %cst_249 = arith.constant dense<0.000000e+00> : vector<8x32xf32>
    %502 = tpu.matmul %469, %0, %cst_249 {dimension_numbers = #tpu.dot_dimension_numbers<[1], [0], [0], [1], [0, 0, 1, 1], [], []>} : vector<8x32xf32>, vector<32x32xf32>, vector<8x32xf32> -> vector<8x32xf32>
    %503 = vector.extract_strided_slice %2 {offsets = [6, 0], sizes = [1, 32], strides = [1, 1]} : vector<8x32xf32> to vector<1x32xf32>
    %504 = vector.broadcast %503 : vector<1x32xf32> to vector<8x32xf32>
    %505 = arith.addf %502, %504 : vector<8x32xf32>
    %c14_250 = arith.constant 14 : index
    %c0_251 = arith.constant 0 : index
    %c0_252 = arith.constant 0 : index
    %506 = vector.load %arg9[%c14_250, %c0_251, %c0_252] : memref<16x32x16xf32, #tpu.memory_space<vmem>>, vector<1x32x16xf32>
    %507 = vector.shape_cast %506 : vector<1x32x16xf32> to vector<32x16xf32>
    %c224 = arith.constant 224 : index
    %c0_253 = arith.constant 0 : index
    %508 = vector.load %arg10[%c224, %c0_253] : memref<256x32xf32, #tpu.memory_space<vmem>>, vector<16x32xf32>
    %cst_254 = arith.constant dense<0.000000e+00> : vector<8x16xf32>
    %509 = tpu.matmul %505, %507, %cst_254 {dimension_numbers = #tpu.dot_dimension_numbers<[1], [0], [0], [1], [0, 0, 1, 1], [], []>} : vector<8x32xf32>, vector<32x16xf32>, vector<8x16xf32> -> vector<8x16xf32>
    %cst_255 = arith.constant 0.176776692 : f32
    %510 = vector.broadcast %cst_255 : f32 to vector<8x16xf32>
    %511 = arith.mulf %509, %510 : vector<8x16xf32>
    %cst_256 = arith.constant dense<0xFF800000> : vector<16xf32>
    %512 = vector.multi_reduction <maximumf>, %511, %cst_256 [0] : vector<8x16xf32> to vector<16xf32>
    %cst_257 = arith.constant 0xFF800000 : f32
    %513 = vector.broadcast %cst_257 : f32 to vector<16xf32>
    %514 = arith.maximumf %513, %512 : vector<16xf32>
    %515 = vector.shape_cast %514 : vector<16xf32> to vector<1x16xf32>
    %516 = vector.broadcast %515 : vector<1x16xf32> to vector<8x16xf32>
    %517 = arith.subf %511, %516 : vector<8x16xf32>
    %518 = math.exp %517 : vector<8x16xf32>
    %cst_258 = arith.constant dense<0.000000e+00> : vector<16xf32>
    %519 = vector.multi_reduction <add>, %518, %cst_258 [0] : vector<8x16xf32> to vector<16xf32>
    %520 = vector.shape_cast %519 : vector<16xf32> to vector<1x16xf32>
    %521 = vector.broadcast %520 : vector<1x16xf32> to vector<8x16xf32>
    %522 = arith.divf %518, %521 : vector<8x16xf32>
    %cst_259 = arith.constant dense<0.000000e+00> : vector<8xf32>
    %523 = vector.multi_reduction <add>, %522, %cst_259 [1] : vector<8x16xf32> to vector<8xf32>
    %524 = vector.shape_cast %523 : vector<8xf32> to vector<8x1xf32>
    %cst_260 = arith.constant 9.99999993E-9 : f32
    %525 = vector.broadcast %cst_260 : f32 to vector<8x1xf32>
    %526 = arith.addf %524, %525 : vector<8x1xf32>
    %527 = tpu.reciprocal %526 : vector<8x1xf32> -> vector<8x1xf32>
    %528 = vector.broadcast %527 : vector<8x1xf32> to vector<8x16xf32>
    %529 = arith.mulf %522, %528 : vector<8x16xf32>
    %cst_261 = arith.constant dense<0.000000e+00> : vector<8x32xf32>
    %530 = tpu.matmul %529, %508, %cst_261 {dimension_numbers = #tpu.dot_dimension_numbers<[1], [0], [0], [1], [0, 0, 1, 1], [], []>} : vector<8x16xf32>, vector<16x32xf32>, vector<8x32xf32> -> vector<8x32xf32>
    %531 = arith.addf %469, %530 : vector<8x32xf32>
    %c112 = arith.constant 112 : index
    %c0_262 = arith.constant 0 : index
    %532 = vector.load %arg11[%c112, %c0_262] : memref<128x32xf32, #tpu.memory_space<vmem>>, vector<8x32xf32>
    tpu.vector_store %arg11[%c112, %c0_262], %531 {strides = array<i32>} : memref<128x32xf32, #tpu.memory_space<vmem>>, vector<8x32xf32>,
    %cst_263 = arith.constant dense<0.000000e+00> : vector<8x32xf32>
    %533 = tpu.matmul %500, %0, %cst_263 {dimension_numbers = #tpu.dot_dimension_numbers<[1], [0], [0], [1], [0, 0, 1, 1], [], []>} : vector<8x32xf32>, vector<32x32xf32>, vector<8x32xf32> -> vector<8x32xf32>
    %534 = vector.extract_strided_slice %2 {offsets = [7, 0], sizes = [1, 32], strides = [1, 1]} : vector<8x32xf32> to vector<1x32xf32>
    %535 = vector.broadcast %534 : vector<1x32xf32> to vector<8x32xf32>
    %536 = arith.addf %533, %535 : vector<8x32xf32>
    %c7_264 = arith.constant 7 : index
    %c0_265 = arith.constant 0 : index
    %c0_266 = arith.constant 0 : index
    %537 = vector.load %arg9[%c7_264, %c0_265, %c0_266] : memref<16x32x16xf32, #tpu.memory_space<vmem>>, vector<1x32x16xf32>
    %538 = vector.shape_cast %537 : vector<1x32x16xf32> to vector<32x16xf32>
    %c112_267 = arith.constant 112 : index
    %c0_268 = arith.constant 0 : index
    %539 = vector.load %arg10[%c112_267, %c0_268] : memref<256x32xf32, #tpu.memory_space<vmem>>, vector<16x32xf32>
    %cst_269 = arith.constant dense<0.000000e+00> : vector<8x16xf32>
    %540 = tpu.matmul %536, %538, %cst_269 {dimension_numbers = #tpu.dot_dimension_numbers<[1], [0], [0], [1], [0, 0, 1, 1], [], []>} : vector<8x32xf32>, vector<32x16xf32>, vector<8x16xf32> -> vector<8x16xf32>
    %cst_270 = arith.constant 0.176776692 : f32
    %541 = vector.broadcast %cst_270 : f32 to vector<8x16xf32>
    %542 = arith.mulf %540, %541 : vector<8x16xf32>
    %cst_271 = arith.constant dense<0xFF800000> : vector<16xf32>
    %543 = vector.multi_reduction <maximumf>, %542, %cst_271 [0] : vector<8x16xf32> to vector<16xf32>
    %cst_272 = arith.constant 0xFF800000 : f32
    %544 = vector.broadcast %cst_272 : f32 to vector<16xf32>
    %545 = arith.maximumf %544, %543 : vector<16xf32>
    %546 = vector.shape_cast %545 : vector<16xf32> to vector<1x16xf32>
    %547 = vector.broadcast %546 : vector<1x16xf32> to vector<8x16xf32>
    %548 = arith.subf %542, %547 : vector<8x16xf32>
    %549 = math.exp %548 : vector<8x16xf32>
    %cst_273 = arith.constant dense<0.000000e+00> : vector<16xf32>
    %550 = vector.multi_reduction <add>, %549, %cst_273 [0] : vector<8x16xf32> to vector<16xf32>
    %551 = vector.shape_cast %550 : vector<16xf32> to vector<1x16xf32>
    %552 = vector.broadcast %551 : vector<1x16xf32> to vector<8x16xf32>
    %553 = arith.divf %549, %552 : vector<8x16xf32>
    %cst_274 = arith.constant dense<0.000000e+00> : vector<8xf32>
    %554 = vector.multi_reduction <add>, %553, %cst_274 [1] : vector<8x16xf32> to vector<8xf32>
    %555 = vector.shape_cast %554 : vector<8xf32> to vector<8x1xf32>
    %cst_275 = arith.constant 9.99999993E-9 : f32
    %556 = vector.broadcast %cst_275 : f32 to vector<8x1xf32>
    %557 = arith.addf %555, %556 : vector<8x1xf32>
    %558 = tpu.reciprocal %557 : vector<8x1xf32> -> vector<8x1xf32>
    %559 = vector.broadcast %558 : vector<8x1xf32> to vector<8x16xf32>
    %560 = arith.mulf %553, %559 : vector<8x16xf32>
    %cst_276 = arith.constant dense<0.000000e+00> : vector<8x32xf32>
    %561 = tpu.matmul %560, %539, %cst_276 {dimension_numbers = #tpu.dot_dimension_numbers<[1], [0], [0], [1], [0, 0, 1, 1], [], []>} : vector<8x16xf32>, vector<16x32xf32>, vector<8x32xf32> -> vector<8x32xf32>
    %562 = arith.addf %500, %561 : vector<8x32xf32>
    %c56 = arith.constant 56 : index
    %c0_277 = arith.constant 0 : index
    %563 = vector.load %arg11[%c56, %c0_277] : memref<128x32xf32, #tpu.memory_space<vmem>>, vector<8x32xf32>
    tpu.vector_store %arg11[%c56, %c0_277], %562 {strides = array<i32>} : memref<128x32xf32, #tpu.memory_space<vmem>>, vector<8x32xf32>,
    %cst_278 = arith.constant dense<0.000000e+00> : vector<8x32xf32>
    %564 = tpu.matmul %531, %0, %cst_278 {dimension_numbers = #tpu.dot_dimension_numbers<[1], [0], [0], [1], [0, 0, 1, 1], [], []>} : vector<8x32xf32>, vector<32x32xf32>, vector<8x32xf32> -> vector<8x32xf32>
    %565 = vector.extract_strided_slice %2 {offsets = [7, 0], sizes = [1, 32], strides = [1, 1]} : vector<8x32xf32> to vector<1x32xf32>
    %566 = vector.broadcast %565 : vector<1x32xf32> to vector<8x32xf32>
    %567 = arith.addf %564, %566 : vector<8x32xf32>
    %c15_279 = arith.constant 15 : index
    %c0_280 = arith.constant 0 : index
    %c0_281 = arith.constant 0 : index
    %568 = vector.load %arg9[%c15_279, %c0_280, %c0_281] : memref<16x32x16xf32, #tpu.memory_space<vmem>>, vector<1x32x16xf32>
    %569 = vector.shape_cast %568 : vector<1x32x16xf32> to vector<32x16xf32>
    %c240 = arith.constant 240 : index
    %c0_282 = arith.constant 0 : index
    %570 = vector.load %arg10[%c240, %c0_282] : memref<256x32xf32, #tpu.memory_space<vmem>>, vector<16x32xf32>
    %cst_283 = arith.constant dense<0.000000e+00> : vector<8x16xf32>
    %571 = tpu.matmul %567, %569, %cst_283 {dimension_numbers = #tpu.dot_dimension_numbers<[1], [0], [0], [1], [0, 0, 1, 1], [], []>} : vector<8x32xf32>, vector<32x16xf32>, vector<8x16xf32> -> vector<8x16xf32>
    %cst_284 = arith.constant 0.176776692 : f32
    %572 = vector.broadcast %cst_284 : f32 to vector<8x16xf32>
    %573 = arith.mulf %571, %572 : vector<8x16xf32>
    %cst_285 = arith.constant dense<0xFF800000> : vector<16xf32>
    %574 = vector.multi_reduction <maximumf>, %573, %cst_285 [0] : vector<8x16xf32> to vector<16xf32>
    %cst_286 = arith.constant 0xFF800000 : f32
    %575 = vector.broadcast %cst_286 : f32 to vector<16xf32>
    %576 = arith.maximumf %575, %574 : vector<16xf32>
    %577 = vector.shape_cast %576 : vector<16xf32> to vector<1x16xf32>
    %578 = vector.broadcast %577 : vector<1x16xf32> to vector<8x16xf32>
    %579 = arith.subf %573, %578 : vector<8x16xf32>
    %580 = math.exp %579 : vector<8x16xf32>
    %cst_287 = arith.constant dense<0.000000e+00> : vector<16xf32>
    %581 = vector.multi_reduction <add>, %580, %cst_287 [0] : vector<8x16xf32> to vector<16xf32>
    %582 = vector.shape_cast %581 : vector<16xf32> to vector<1x16xf32>
    %583 = vector.broadcast %582 : vector<1x16xf32> to vector<8x16xf32>
    %584 = arith.divf %580, %583 : vector<8x16xf32>
    %cst_288 = arith.constant dense<0.000000e+00> : vector<8xf32>
    %585 = vector.multi_reduction <add>, %584, %cst_288 [1] : vector<8x16xf32> to vector<8xf32>
    %586 = vector.shape_cast %585 : vector<8xf32> to vector<8x1xf32>
    %cst_289 = arith.constant 9.99999993E-9 : f32
    %587 = vector.broadcast %cst_289 : f32 to vector<8x1xf32>
    %588 = arith.addf %586, %587 : vector<8x1xf32>
    %589 = tpu.reciprocal %588 : vector<8x1xf32> -> vector<8x1xf32>
    %590 = vector.broadcast %589 : vector<8x1xf32> to vector<8x16xf32>
    %591 = arith.mulf %584, %590 : vector<8x16xf32>
    %cst_290 = arith.constant dense<0.000000e+00> : vector<8x32xf32>
    %592 = tpu.matmul %591, %570, %cst_290 {dimension_numbers = #tpu.dot_dimension_numbers<[1], [0], [0], [1], [0, 0, 1, 1], [], []>} : vector<8x16xf32>, vector<16x32xf32>, vector<8x32xf32> -> vector<8x32xf32>
    %593 = arith.addf %531, %592 : vector<8x32xf32>
    %c120 = arith.constant 120 : index
    %c0_291 = arith.constant 0 : index
    %594 = vector.load %arg11[%c120, %c0_291] : memref<128x32xf32, #tpu.memory_space<vmem>>, vector<8x32xf32>
    tpu.vector_store %arg11[%c120, %c0_291], %593 {strides = array<i32>} : memref<128x32xf32, #tpu.memory_space<vmem>>, vector<8x32xf32>,
    %c0_292 = arith.constant 0 : index
    %c0_293 = arith.constant 0 : index
    %595 = vector.load %arg11[%c0_292, %c0_293] : memref<128x32xf32, #tpu.memory_space<vmem>>, vector<128x32xf32>
    %c0_294 = arith.constant 0 : index
    %c0_295 = arith.constant 0 : index
    %596 = vector.load %arg6[%c0_294, %c0_295] : memref<32x32xf32, #tpu.memory_space<vmem>>, vector<32x32xf32>
    %cst_296 = arith.constant dense<0.000000e+00> : vector<128x32xf32>
    %597 = tpu.matmul %595, %596, %cst_296 {dimension_numbers = #tpu.dot_dimension_numbers<[1], [0], [0], [1], [0, 0, 1, 1], [], []>} : vector<128x32xf32>, vector<32x32xf32>, vector<128x32xf32> -> vector<128x32xf32>
    %598 = arith.addf %595, %597 : vector<128x32xf32>
    %599 = vector.extract_strided_slice %595 {offsets = [0, 0], sizes = [64, 32], strides = [1, 1]} : vector<128x32xf32> to vector<64x32xf32>
    %c0_297 = arith.constant 0 : index
    %c0_298 = arith.constant 0 : index
    %c0_299 = arith.constant 0 : index
    %600 = vector.load %arg7[%c0_297, %c0_298, %c0_299] : memref<2x64x32xf32, #tpu.memory_space<vmem>>, vector<1x64x32xf32>
    %601 = vector.shape_cast %600 : vector<1x64x32xf32> to vector<64x32xf32>
    %602 = vector.shape_cast %599 : vector<64x32xf32> to vector<1x64x32xf32>
    tpu.vector_store %arg7[%c0_297, %c0_298, %c0_299], %602 {strides = array<i32>} : memref<2x64x32xf32, #tpu.memory_space<vmem>>, vector<1x64x32xf32>,
    %603 = vector.extract_strided_slice %598 {offsets = [0, 0], sizes = [64, 32], strides = [1, 1]} : vector<128x32xf32> to vector<64x32xf32>
    %c0_300 = arith.constant 0 : index
    %c0_301 = arith.constant 0 : index
    %c0_302 = arith.constant 0 : index
    %604 = vector.load %arg8[%c0_300, %c0_301, %c0_302] : memref<2x64x32xf32, #tpu.memory_space<vmem>>, vector<1x64x32xf32>
    %605 = vector.shape_cast %604 : vector<1x64x32xf32> to vector<64x32xf32>
    %606 = vector.shape_cast %603 : vector<64x32xf32> to vector<1x64x32xf32>
    tpu.vector_store %arg8[%c0_300, %c0_301, %c0_302], %606 {strides = array<i32>} : memref<2x64x32xf32, #tpu.memory_space<vmem>>, vector<1x64x32xf32>,
    %607 = vector.extract_strided_slice %595 {offsets = [64, 0], sizes = [64, 32], strides = [1, 1]} : vector<128x32xf32> to vector<64x32xf32>
    %c1_303 = arith.constant 1 : index
    %c0_304 = arith.constant 0 : index
    %c0_305 = arith.constant 0 : index
    %608 = vector.load %arg7[%c1_303, %c0_304, %c0_305] : memref<2x64x32xf32, #tpu.memory_space<vmem>>, vector<1x64x32xf32>
    %609 = vector.shape_cast %608 : vector<1x64x32xf32> to vector<64x32xf32>
    %610 = vector.shape_cast %607 : vector<64x32xf32> to vector<1x64x32xf32>
    tpu.vector_store %arg7[%c1_303, %c0_304, %c0_305], %610 {strides = array<i32>} : memref<2x64x32xf32, #tpu.memory_space<vmem>>, vector<1x64x32xf32>,
    %611 = vector.extract_strided_slice %598 {offsets = [64, 0], sizes = [64, 32], strides = [1, 1]} : vector<128x32xf32> to vector<64x32xf32>
    %c1_306 = arith.constant 1 : index
    %c0_307 = arith.constant 0 : index
    %c0_308 = arith.constant 0 : index
    %612 = vector.load %arg8[%c1_306, %c0_307, %c0_308] : memref<2x64x32xf32, #tpu.memory_space<vmem>>, vector<1x64x32xf32>
    %613 = vector.shape_cast %612 : vector<1x64x32xf32> to vector<64x32xf32>
    %614 = vector.shape_cast %611 : vector<64x32xf32> to vector<1x64x32xf32>
    tpu.vector_store %arg8[%c1_306, %c0_307, %c0_308], %614 {strides = array<i32>} : memref<2x64x32xf32, #tpu.memory_space<vmem>>, vector<1x64x32xf32>,
    return
  }
  func.func @transform_0(%arg0: i32) -> (i32, i32, i32) {
    %c0_i32 = arith.constant 0 : i32
    %c0_i32_0 = arith.constant 0 : i32
    %c0_i32_1 = arith.constant 0 : i32
    return %arg0, %c0_i32, %c0_i32_0 : i32, i32, i32
  }
  func.func @transform_1(%arg0: i32) -> (i32, i32, i32) {
    %c0_i32 = arith.constant 0 : i32
    %c0_i32_0 = arith.constant 0 : i32
    %c0_i32_1 = arith.constant 0 : i32
    return %arg0, %c0_i32, %c0_i32_0 : i32, i32, i32
  }
  func.func @transform_2(%arg0: i32) -> (i32, i32) {
    %c0_i32 = arith.constant 0 : i32
    %c0_i32_0 = arith.constant 0 : i32
    %c0_i32_1 = arith.constant 0 : i32
    return %c0_i32, %c0_i32_0 : i32, i32
  }
  func.func @transform_3(%arg0: i32) -> (i32, i32) {
    %c0_i32 = arith.constant 0 : i32
    %c0_i32_0 = arith.constant 0 : i32
    %c0_i32_1 = arith.constant 0 : i32
    return %c0_i32, %c0_i32_0 : i32, i32
  }
  func.func @transform_4(%arg0: i32) -> (i32, i32) {
    %c0_i32 = arith.constant 0 : i32
    %c0_i32_0 = arith.constant 0 : i32
    %c0_i32_1 = arith.constant 0 : i32
    return %c0_i32, %c0_i32_0 : i32, i32
  }
  func.func @transform_5(%arg0: i32) -> (i32, i32) {
    %c0_i32 = arith.constant 0 : i32
    %c0_i32_0 = arith.constant 0 : i32
    %c0_i32_1 = arith.constant 0 : i32
    return %c0_i32, %c0_i32_0 : i32, i32
  }
  func.func @transform_6(%arg0: i32) -> (i32, i32, i32) {
    %c0_i32 = arith.constant 0 : i32
    %c0_i32_0 = arith.constant 0 : i32
    %c0_i32_1 = arith.constant 0 : i32
    return %arg0, %c0_i32, %c0_i32_0 : i32, i32, i32
  }
  func.func @transform_7(%arg0: i32) -> (i32, i32, i32) {
    %c0_i32 = arith.constant 0 : i32
    %c0_i32_0 = arith.constant 0 : i32
    %c0_i32_1 = arith.constant 0 : i32
    return %arg0, %c0_i32, %c0_i32_0 : i32, i32, i32
  }
}

</mosaic_0001>

<bundles_post_ra>
// kernel: tpu_custom_call.1
= control target key start
LH: loop header
LB: loop body
LE: loop exit
PB: predicated region body
PF: predicated region fallthrough
CT: control target
= control target key end

     0   :  { %vm30_vm0 = vcmask 261120   ;;  %v6726_v25 = vmov 0.0   ;;  %vm6727_vm1 = vmmov 0   ;;  %vm373_vm2 = vcmask 130048   ;;  %s8029_s4 = inlined_call_operand.vmem [shape: f32[32,64], index: 4, kind: input, shape index: {}]   ;;  %s8030_s1 = inlined_call_operand.vmem [shape: f32[2,128,32], index: 1, kind: input, shape index: {}]   ;;  %s8031_s3 = inlined_call_operand.vmem [shape: f32[32,32], index: 3, kind: input, shape index: {}]   ;;  %s8032_s0 = inlined_call_operand.vmem [shape: f32[2,8,32], index: 0, kind: input, shape index: {}]   ;;  %s8033_s2 = inlined_call_operand.vmem [shape: f32[8,32], index: 2, kind: input, shape index: {}]   ;;  %s8034_s6 = inlined_call_operand.vmem [shape: f32[2,64,32], index: 6, kind: output, shape index: {0}]   ;;  %s8035_s5 = inlined_call_operand.vmem [shape: f32[32,32], index: 5, kind: input, shape index: {}]   ;;  %s8036_s7 = inlined_call_operand.vmem [shape: f32[2,64,32], index: 7, kind: output, shape index: {1}]  }
   0x1   :  { %v6772_v0 = vld [vmem:[%s8029_s4 + $0x18] sm:$0xff]  ;;  %v6777_v1 = vld [vmem:[%s8029_s4 + $0x10] sm:$0xff]  ;;  %v104_v2 = vld [vmem:[%s8030_s1] sm:$0xff]  ;;  %6040 = vmatprep.subr.mxu0 %v6726_v25  ;;  %6048 = vmatprep.mubr.msk.f32.mxu0 %vm6727_vm1, %v6726_v25 }
   0x2   :  { %6051 = vmatprep.subr.mxu1 %v6772_v0  ;;  %v6787_v3 = vld [vmem:[%s8029_s4 + $0x8] sm:$0xff]  ;;  %6059 = vmatprep.mubr.msk.f32.mxu1 %vm30_vm0, %v104_v2  ;;  %v6795_v4 = vld [vmem:[%s8029_s4] sm:$0xff]  ;;  %v106_v6 = vld [vmem:[%s8030_s1 + $0x10] sm:$0xff] }
   0x3   :  { %6052 = vmatpush3.msra.mxu1 %v6772_v0  ;;  %v105_v5 = vld [vmem:[%s8030_s1 + $0x8] sm:$0xff]  ;;  %v107_v7 = vld [vmem:[%s8030_s1 + $0x18] sm:$0xff]  ;;  %v108_v8 = vld [vmem:[%s8030_s1 + $0x20] sm:$0xff] }
   0x4   :  { %6053 = vmatprep.subr.mxu1 %v6777_v1  ;;  %v109_v9 = vld [vmem:[%s8030_s1 + $0x28] sm:$0xff]  ;;  %v110_v10 = vld [vmem:[%s8030_s1 + $0x30] sm:$0xff]  ;;  %v111_v11 = vld [vmem:[%s8030_s1 + $0x38] sm:$0xff] }
   0x5   :  { %6054 = vmatpush3.msra.mxu1 %v6777_v1  ;;  %v112_v12 = vld [vmem:[%s8030_s1 + $0x40] sm:$0xff]  ;;  %v113_v13 = vld [vmem:[%s8030_s1 + $0x48] sm:$0xff]  ;;  %v114_v14 = vld [vmem:[%s8030_s1 + $0x50] sm:$0xff] }
   0x6   :  { %6055 = vmatprep.subr.mxu1 %v6787_v3  ;;  %v115_v15 = vld [vmem:[%s8030_s1 + $0x58] sm:$0xff]  ;;  %v116_v16 = vld [vmem:[%s8030_s1 + $0x60] sm:$0xff]  ;;  %v117_v17 = vld [vmem:[%s8030_s1 + $0x68] sm:$0xff] }
   0x7   :  { %6056 = vmatpush3.msra.mxu1 %v6787_v3  ;;  %v118_v18 = vld [vmem:[%s8030_s1 + $0x70] sm:$0xff]  ;;  %v119_v19 = vld [vmem:[%s8030_s1 + $0x78] sm:$0xff]  ;;  %v5662_v20 = vld [vmem:[%s8030_s1 + $0xc0] sm:$0xff] }
   0x8   :  { %6057 = vmatprep.subr.mxu1 %v6795_v4  ;;  %v5663_v21 = vld [vmem:[%s8030_s1 + $0xc8] sm:$0xff]  ;;  %v5664_v22 = vld [vmem:[%s8030_s1 + $0xd0] sm:$0xff]  ;;  %v5665_v23 = vld [vmem:[%s8030_s1 + $0xd8] sm:$0xff] }
   0x9   :  { %6058 = vmatpush3.msra.mxu1 %v6795_v4  ;;  %v5666_v24 = vld [vmem:[%s8030_s1 + $0xe0] sm:$0xff]  ;;  %v5667_v26 = vld [vmem:[%s8030_s1 + $0xe8] sm:$0xff]  ;;  %v6896_v27 = vld [vmem:[%s8031_s3 + $0x18] sm:$0xff] }
   0xa   :  { %6060 = vmatmul.mubr.msk.f32.vlgmr.msra.gmra.mxu1 %vm30_vm0, %v105_v5  ;;  %6611 = vmatprep.subr.mxu1 %v6772_v0  ;;  %v6904_v28 = vld [vmem:[%s8031_s3 + $0x10] sm:$0xff]  ;;  %v5669_v30 = vld [vmem:[%s8030_s1 + $0xf8] sm:$0xff]  ;;  %v6917_v31 = vld [vmem:[%s8031_s3 + $0x8] sm:$0xff] }
   0xb   :  { %6062 = vmatprep.mubr.msk.f32.mxu1 %vm30_vm0, %v106_v6  ;;  %6615 = vmatpush3.msra.mxu1 %v6772_v0  ;;  %v5668_v29 = vld [vmem:[%s8030_s1 + $0xf0] sm:$0xff]  ;;  %v6927_v32 = vld [vmem:[%s8031_s3] sm:$0xff]  ;;  %v5655_v58 = vld [vmem:[%s8030_s1 + $0x88] sm:$0xff] }
   0xc   :  { %6612 = vmatprep.subr.mxu1 %v6777_v1  ;;  %6041 = vmatpush3.msra.mxu0 %v6896_v27  ;;  %v6939_v33 = vld [vmem:[%s8032_s0] sm:$0xff]  ;;  %v5656_v60 = vld [vmem:[%s8030_s1 + $0x90] sm:$0xff]  ;;  %v5657_v62 = vld [vmem:[%s8030_s1 + $0x98] sm:$0xff] }
   0xd   :  { %6616 = vmatpush3.msra.mxu1 %v6777_v1  ;;  %6042 = vmatprep.subr.mxu0 %v6726_v25  ;;  %v29_v34 = vld [vmem:[%s8033_s2] sm:$0xff]  ;;  %s6728_s2 = smov 96   ;;  %v5660_v5 = vld [vmem:[%s8030_s1 + $0xb0] sm:$0xff] }
   0xe   :  { %6063 = vmatmul.mubr.msk.f32.gmra.mxu1 %vm30_vm0, %v107_v7  ;;  %6613 = vmatprep.subr.mxu1 %v6787_v3  ;;  %v5654_v56 = vld [vmem:[%s8030_s1 + $0x80] sm:$0xff] }
   0xf   :  { %6065 = vmatprep.mubr.msk.f32.mxu1 %vm30_vm0, %v108_v8  ;;  %6617 = vmatpush3.msra.mxu1 %v6787_v3  ;;  %v5658_v63 = vld [vmem:[%s8030_s1 + $0xa0] sm:$0xff] }
  0x10   :  { %6614 = vmatprep.subr.mxu1 %v6795_v4  ;;  %6043 = vmatpush3.msra.mxu0 %v6904_v28 }
  0x11   :  { %6618 = vmatpush3.msra.mxu1 %v6795_v4  ;;  %6044 = vmatprep.subr.mxu0 %v6726_v25 }
  0x12   :  { %6066 = vmatmul.mubr.msk.f32.gmra.mxu1 %vm30_vm0, %v109_v9  ;;  %6115 = vmatprep.subr.mxu1 %v6726_v25  ;;  %v5661_v9 = vld [vmem:[%s8030_s1 + $0xb8] sm:$0xff] }
  0x13   :  { %6068 = vmatprep.mubr.msk.f32.mxu1 %vm30_vm0, %v110_v10  ;;  %6045 = vmatpush3.msra.mxu0 %v6917_v31 }
  0x14   :  { %6046 = vmatprep.subr.mxu0 %v6726_v25 }
  0x15   :  { %6047 = vmatpush3.msra.mxu0 %v6927_v32 }
  0x16   :  { %6069 = vmatmul.mubr.msk.f32.gmra.mxu1 %vm30_vm0, %v111_v11  ;;  %6049 = vmatmul.mubr.msk.f32.vlgmr.msra.gmra.mxu0 %vm30_vm0, %v29_v34 }
  0x17   :  { %6071 = vmatprep.mubr.msk.f32.mxu1 %vm30_vm0, %v112_v12  ;;  %6083 = vmatprep.subr.mxu0 %v6772_v0 }
  0x18   :  { %6084 = vmatpush3.msra.mxu0 %v6772_v0  ;;  %6091 = vmatprep.mubr.msk.f32.mxu0 %vm30_vm0, %v5654_v56 }
  0x19   :  { %6085 = vmatprep.subr.mxu0 %v6777_v1 }
  0x1a   :  { %6072 = vmatmul.mubr.msk.f32.gmra.mxu1 %vm30_vm0, %v113_v13  ;;  %6086 = vmatpush3.msra.mxu0 %v6777_v1  ;;  %v5659_v1 = vld [vmem:[%s8030_s1 + $0xa8] sm:$0xff] }
  0x1b   :  { %6074 = vmatprep.mubr.msk.f32.mxu1 %vm30_vm0, %v114_v14  ;;  %6087 = vmatprep.subr.mxu0 %v6787_v3 }
  0x1c   :  { %6088 = vmatpush3.msra.mxu0 %v6787_v3  ;;  %v1286_v3 = vlaneseq }
  0x1d   :  { %6089 = vmatprep.subr.mxu0 %v6795_v4 }
  0x1e   :  { %6075 = vmatmul.mubr.msk.f32.gmra.mxu1 %vm30_vm0, %v115_v15  ;;  %6090 = vmatpush3.msra.mxu0 %v6795_v4  ;;  %v1287_v6 = vshrl.u32 %v1286_v3, 7 }
  0x1f   :  { %6077 = vmatprep.mubr.msk.f32.mxu1 %vm30_vm0, %v116_v16  ;;  %6126 = vmatprep.subr.mxu0 %v6726_v25 }
  0x20   :  { %6092 = vmatmul.mubr.msk.f32.vlgmr.msra.gmra.mxu0 %vm30_vm0, %v5655_v58  ;;  %v1798_v12 = vsub.s32 1, %v1287_v6  ;;  %v2308_v13 = vsub.s32 2, %v1287_v6 }
  0x21   :  { %6094 = vmatprep.mubr.msk.f32.mxu0 %vm30_vm0, %v5656_v60 }
  0x22   :  { %6078 = vmatmul.mubr.msk.f32.gmra.mxu1 %vm30_vm0, %v117_v17  ;;  %v2818_v17 = vsub.s32 3, %v1287_v6 }
  0x23   :  { %6080 = vmatprep.mubr.msk.f32.mxu1 %vm30_vm0, %v118_v18 }
  0x24   :  { %6095 = vmatmul.mubr.msk.f32.gmra.mxu0 %vm30_vm0, %v5657_v62 }
  0x25   :  { %6097 = vmatprep.mubr.msk.f32.mxu0 %vm30_vm0, %v5658_v63 }
  0x26   :  { %6081 = vmatmul.mubr.msk.f32.gmra.mxu1 %vm30_vm0, %v119_v19  ;;  %v3328_v19 = vsub.s32 4, %v1287_v6 }
  0x27   :  { %6103 = vmatprep.mubr.msk.f32.mxu1 %vm30_vm0, %v5662_v20 }
  0x28   :  { %6098 = vmatmul.mubr.msk.f32.gmra.mxu0 %vm30_vm0, %v5659_v1 }
  0x29   :  { %6100 = vmatprep.mubr.msk.f32.mxu0 %vm30_vm0, %v5660_v5 }
  0x2a   :  { %6104 = vmatmul.mubr.msk.f32.vlgmr.msra.gmra.mxu1 %vm30_vm0, %v5663_v21  ;;  %v3838_v21 = vsub.s32 5, %v1287_v6 }
  0x2b   :  { %6106 = vmatprep.mubr.msk.f32.mxu1 %vm30_vm0, %v5664_v22  ;;  %6116 = vmatpush3.msra.mxu1 %v6896_v27 }
  0x2c   :  { %6117 = vmatprep.subr.mxu1 %v6726_v25  ;;  %6101 = vmatmul.mubr.msk.f32.gmra.mxu0 %vm30_vm0, %v5661_v9 }
  0x2d   :  { %6118 = vmatpush3.msra.mxu1 %v6904_v28  ;;  %6134 = vmatprep.mubr.msk.f32.mxu0 %vm6727_vm1, %v6726_v25 }
  0x2e   :  { %6107 = vmatmul.mubr.msk.f32.gmra.mxu1 %vm30_vm0, %v5665_v23  ;;  %6119 = vmatprep.subr.mxu1 %v6726_v25  ;;  %v4348_v23 = vsub.s32 6, %v1287_v6 }
  0x2f   :  { %6109 = vmatprep.mubr.msk.f32.mxu1 %vm30_vm0, %v5666_v24  ;;  %6120 = vmatpush3.msra.mxu1 %v6917_v31 }
  0x30   :  { %6121 = vmatprep.subr.mxu1 %v6726_v25 }
  0x31   :  { %6122 = vmatpush3.msra.mxu1 %v6927_v32 }
  0x32   :  { %6110 = vmatmul.mubr.msk.f32.gmra.mxu1 %vm30_vm0, %v5667_v26  ;;  %6137 = vmatprep.subr.mxu1 %v6726_v25  ;;  %v4858_v26 = vsub.s32 7, %v1287_v6 }
  0x33   :  { %6112 = vmatprep.mubr.msk.f32.mxu1 %vm30_vm0, %v5668_v29 }
  0x36   :  { %6113 = vmatmul.mubr.msk.f32.gmra.mxu1 %vm30_vm0, %v5669_v30 }
  0x37   :  { %6123 = vmatprep.mubr.msk.f32.mxu1 %vm6727_vm1, %v6726_v25 }
  0x3a   :  { %6124 = vmatmul.mubr.msk.f32.vlgmr.msra.gmra.mxu1 %vm30_vm0, %v6939_v33 }
  0x3b   :  { %6141 = vmatprep.mubr.msk.f32.mxu1 %vm6727_vm1, %v6726_v25 }
  0xca   :  { %v6061_v35 = vpop.f32.mrf.mxu1 }
  0xcb   :  { %318 = vst.msk [vmem:[#allocation3 + $0x8] sm:$0xff] %vm30_vm0, %v6061_v35 }
  0xcc   :  { %v238_v36 = vpop.f32.mrf.mxu1 }
  0xcd   :  { %317 = vst.msk [vmem:[#allocation3] sm:$0xff] %vm30_vm0, %v238_v36  ;;  %335 = vrot.lane.b32.xlu0 %v238_v36, %s6728_s2 }
  0xce   :  { %v6967_v37 = vpop.f32.mrf.mxu1 }
  0xcf   :  { %320 = vst.msk [vmem:[#allocation3 + $0x18] sm:$0xff] %vm30_vm0, %v6967_v37 }
  0xd0   :  { %v6971_v38 = vpop.f32.mrf.mxu1 }
  0xd1   :  { %337 = vrot.lane.b32.xlu0 %v6061_v35, %s6728_s2  ;;  %319 = vst.msk [vmem:[#allocation3 + $0x10] sm:$0xff] %vm30_vm0, %v6971_v38 }
  0xd2   :  { %v1368_v39 = vld [vmem:[#allocation3 + $0x8] sm:$0xff]  ;;  %v6976_v40 = vpop.f32.mrf.mxu1 }
  0xd3   :  { %6138 = vmatpush3.msra.mxu1 %v1368_v39  ;;  %322 = vst.msk [vmem:[#allocation3 + $0x28] sm:$0xff] %vm30_vm0, %v6976_v40  ;;  %v1288_v39 = vsub.s32 0, %v1287_v6 }
  0xd4   :  { %6139 = vmatprep.subr.mxu1 %v6726_v25  ;;  %v1367_v41 = vld [vmem:[#allocation3] sm:$0xff]  ;;  %v6981_v42 = vpop.f32.mrf.mxu1 }
  0xd5   :  { %6140 = vmatpush3.msra.mxu1 %v1367_v41  ;;  %321 = vst.msk [vmem:[#allocation3 + $0x20] sm:$0xff] %vm30_vm0, %v6981_v42 }
  0xd6   :  { %v6985_v43 = vpop.f32.mrf.mxu1  ;;  %6144 = vmatprep.subr.mxu1 %v6726_v25  ;;  %v100_v7 = vpop.f32.mrf.mxu0 }
  0xd7   :  { %324 = vst.msk [vmem:[#allocation3 + $0x38] sm:$0xff] %vm30_vm0, %v6985_v43  ;;  %v7092_v15 = vrot.slane %v100_v7, %v1798_v12  ;;  %v7094_v16 = vrot.slane %v100_v7, %v2308_v13  ;;  %v7096_v18 = vrot.slane %v100_v7, %v2818_v17  ;;  %v7098_v20 = vrot.slane %v100_v7, %v3328_v19 }
  0xd8   :  { %v6990_v44 = vpop.f32.mrf.mxu1  ;;  %v6050_v11 = vpop.f32.mrf.mxu0  ;;  %v7100_v22 = vrot.slane %v100_v7, %v3838_v21  ;;  %v7102_v24 = vrot.slane %v100_v7, %v4348_v23  ;;  %v7104_v29 = vrot.slane %v100_v7, %v4858_v26 }
  0xd9   :  { %323 = vst.msk [vmem:[#allocation3 + $0x30] sm:$0xff] %vm30_vm0, %v6990_v44 }
  0xda   :  { %v6994_v45 = vpop.f32.mrf.mxu1 }
  0xdb   :  { %326 = vst.msk [vmem:[#allocation3 + $0x48] sm:$0xff] %vm30_vm0, %v6994_v45 }
  0xdc   :  { %v6998_v46 = vpop.f32.mrf.mxu1 }
  0xdd   :  { %325 = vst.msk [vmem:[#allocation3 + $0x40] sm:$0xff] %vm30_vm0, %v6998_v46 }
  0xde   :  { %v7002_v47 = vpop.f32.mrf.mxu1 }
  0xdf   :  { %328 = vst.msk [vmem:[#allocation3 + $0x58] sm:$0xff] %vm30_vm0, %v7002_v47 }
  0xe0   :  { %v7006_v48 = vpop.f32.mrf.mxu1  ;;  %v6093_v62 = vpop.f32.mrf.mxu0 }
  0xe1   :  { %327 = vst.msk [vmem:[#allocation3 + $0x50] sm:$0xff] %vm30_vm0, %v7006_v48  ;;  %908 = vst.msk [vmem:[#allocation3 + $0x88] sm:$0xff] %vm30_vm0, %v6093_v62 }
  0xe2   :  { %v7010_v49 = vpop.f32.mrf.mxu1  ;;  %v828_v63 = vpop.f32.mrf.mxu0 }
  0xe3   :  { %330 = vst.msk [vmem:[#allocation3 + $0x68] sm:$0xff] %vm30_vm0, %v7010_v49  ;;  %907 = vst.msk [vmem:[#allocation3 + $0x80] sm:$0xff] %vm30_vm0, %v828_v63 }
  0xe4   :  { %v7014_v50 = vpop.f32.mrf.mxu1  ;;  %v7123_v1 = vpop.f32.mrf.mxu0 }
  0xe5   :  { %329 = vst.msk [vmem:[#allocation3 + $0x60] sm:$0xff] %vm30_vm0, %v7014_v50  ;;  %910 = vst.msk [vmem:[#allocation3 + $0x98] sm:$0xff] %vm30_vm0, %v7123_v1 }
  0xe6   :  { %v7018_v52 = vpop.f32.mrf.mxu1  ;;  %v7127_v3 = vpop.f32.mrf.mxu0 }
  0xe7   :  { %332 = vst.msk [vmem:[#allocation3 + $0x78] sm:$0xff] %vm30_vm0, %v7018_v52  ;;  %909 = vst.msk [vmem:[#allocation3 + $0x90] sm:$0xff] %vm30_vm0, %v7127_v3 }
  0xe8   :  { %v7022_v53 = vpop.f32.mrf.mxu1  ;;  %v7131_v5 = vpop.f32.mrf.mxu0 }
  0xe9   :  { %331 = vst.msk [vmem:[#allocation3 + $0x70] sm:$0xff] %vm30_vm0, %v7022_v53  ;;  %912 = vst.msk [vmem:[#allocation3 + $0xa8] sm:$0xff] %vm30_vm0, %v7131_v5 }
  0xea   :  { %v7026_v55 = vpop.f32.mrf.mxu1  ;;  %v7135_v6 = vpop.f32.mrf.mxu0 }
  0xeb   :  { %916 = vst.msk [vmem:[#allocation3 + $0xc8] sm:$0xff] %vm30_vm0, %v7026_v55  ;;  %911 = vst.msk [vmem:[#allocation3 + $0xa0] sm:$0xff] %vm30_vm0, %v7135_v6 }
  0xec   :  { %v7034_v57 = vpop.f32.mrf.mxu1 }
  0xed   :  { %915 = vst.msk [vmem:[#allocation3 + $0xc0] sm:$0xff] %vm30_vm0, %v7034_v57 }
  0xee   :  { %v7042_v59 = vpop.f32.mrf.mxu1 }
  0xef   :  { %918 = vst.msk [vmem:[#allocation3 + $0xd8] sm:$0xff] %vm30_vm0, %v7042_v59 }
  0xf0   :  { %v7050_v61 = vpop.f32.mrf.mxu1 }
  0xf1   :  { %917 = vst.msk [vmem:[#allocation3 + $0xd0] sm:$0xff] %vm30_vm0, %v7050_v61 }
  0xf2   :  { %v7061_v0 = vpop.f32.mrf.mxu1 }
  0xf3   :  { %920 = vst.msk [vmem:[#allocation3 + $0xe8] sm:$0xff] %vm30_vm0, %v7061_v0 }
  0xf4   :  { %v7069_v2 = vpop.f32.mrf.mxu1 }
  0xf5   :  { %919 = vst.msk [vmem:[#allocation3 + $0xe0] sm:$0xff] %vm30_vm0, %v7069_v2 }
  0xf6   :  { %v7074_v4 = vpop.f32.mrf.mxu1 }
  0xf7   :  { %922 = vst.msk [vmem:[#allocation3 + $0xf8] sm:$0xff] %vm30_vm0, %v7074_v4 }
  0xf8   :  { %v7082_v8 = vpop.f32.mrf.mxu1 }
  0xf9   :  { %921 = vst.msk [vmem:[#allocation3 + $0xf0] sm:$0xff] %vm30_vm0, %v7082_v8 }
  0xfa   :  { %v1359_v10 = vpop.f32.mrf.mxu1 }
  0xfc   :  { %v6125_v14 = vpop.f32.mrf.mxu1 }
 0x13f   :  { %v336_v51 = vpop.permute.xlu0 %335 }
 0x140   :  { %341 = vxpose.xlu1.b32.start [1/2] (short) (narrow) %v336_v51, 32  ;;  %v7110_v51 = vrot.slane %v100_v7, %v1288_v39  ;;  %v7139_v7 = vpop.f32.mrf.mxu0 }
 0x141   :  { %914 = vst.msk [vmem:[#allocation3 + $0xb8] sm:$0xff] %vm30_vm0, %v7139_v7 }
 0x142   :  { %v1360_v56 = vadd.f32 %v1359_v10, %v7110_v51  ;;  %v7143_v9 = vpop.f32.mrf.mxu0 }
 0x143   :  { %v338_v54 = vpop.permute.xlu0 %337  ;;  %913 = vst.msk [vmem:[#allocation3 + $0xb0] sm:$0xff] %vm30_vm0, %v7143_v9 }
 0x144   :  { %342 = vxpose.xlu1.b32.end [2/2] (short) (narrow) %v338_v54, 32 }
 0x16a   :  { %925 = vrot.lane.b32.xlu1 %v828_v63, %s6728_s2 }
 0x1bc   :  { %v357_v30 = vpop.trf.xlu1 }
 0x1bd   :  { %374 = vst.msk [vmem:[#allocation2] sm:$0xff] %vm373_vm2, %v357_v30 }
 0x1c0   :  { %v358_v34 = vpop.trf.xlu1 }
 0x1c1   :  { %375 = vst.msk [vmem:[#allocation2 + $0x8] sm:$0xff] %vm373_vm2, %v358_v34 }
 0x1c4   :  { %v359_v35 = vpop.trf.xlu1  ;;  %v1363_v60 = vld [vmem:[#allocation2] sm:$0xff] }
 0x1c5   :  { %376 = vst.msk [vmem:[#allocation2 + $0x10] sm:$0xff] %vm373_vm2, %v359_v35 }
 0x1c8   :  { %v360_v36 = vpop.trf.xlu1  ;;  %v1364_v58 = vld [vmem:[#allocation2 + $0x8] sm:$0xff] }
 0x1c9   :  { %377 = vst.msk [vmem:[#allocation2 + $0x18] sm:$0xff] %vm373_vm2, %v360_v36 }
 0x1cc   :  { %v1365_v54 = vld [vmem:[#allocation2 + $0x10] sm:$0xff] }
 0x1d0   :  { %v1366_v41 = vld [vmem:[#allocation2 + $0x18] sm:$0xff] }
 0x1d1   :  { %6127 = vmatpush3.msra.mxu0 %v1366_v41 }
 0x1d2   :  { %6128 = vmatprep.subr.mxu0 %v6726_v25 }
 0x1d3   :  { %6129 = vmatpush3.msra.mxu0 %v1365_v54 }
 0x1d4   :  { %6130 = vmatprep.subr.mxu0 %v6726_v25 }
 0x1d5   :  { %6131 = vmatpush3.msra.mxu0 %v1364_v58 }
 0x1d6   :  { %6132 = vmatprep.subr.mxu0 %v6726_v25 }
 0x1d7   :  { %6133 = vmatpush3.msra.mxu0 %v1363_v60 }
 0x1d8   :  { %6135 = vmatmul.mubr.msk.f32.vlgmr.msra.gmra.mxu0 %vm30_vm0, %v1360_v56  ;;  %6155 = vmatprep.subr.mxu0 %v6726_v25 }
 0x1d9   :  { %6163 = vmatprep.mubr.msk.f32.mxu0 %vm6727_vm1, %v6726_v25 }
 0x1dc   :  { %v926_v10 = vpop.permute.xlu1 %925 }
 0x1dd   :  { %931 = vxpose.xlu1.b32.start [1/2] (short) (narrow) %v926_v10, 32 }
 0x298   :  { %v1438_v11 = vpop.f32.mrf.mxu0 }
 0x299   :  { %v1442_v12 = vmul.f32 0.17677669, %v1438_v11 }
 0x29a   :  { %v6136_v13 = vpop.f32.mrf.mxu0 }
 0x29b   :  { %v1443_v14 = vsel %vm373_vm2, %v1442_v12, -inf }
 0x29c   :  { %v1444_v17 = vrot.slane %v1443_v14, 4 }
 0x29e   :  { %v1445_v19 = vmax.f32 %v1443_v14, %v1444_v17 }
 0x2a0   :  { %v1446_v21 = vrot.slane %v1445_v19, 2 }
 0x2a2   :  { %v1447_v23 = vmax.f32 %v1445_v19, %v1446_v21 }
 0x2a4   :  { %v1448_v26 = vrot.slane %v1447_v23, 1 }
 0x2a6   :  { %v1449_v30 = vmax.f32 %v1447_v23, %v1448_v26  ;;  %v1621_v23 = vld [vmem:[#allocation3 + $0x88] sm:$0xff]  ;;  %v1620_v26 = vld [vmem:[#allocation3 + $0x80] sm:$0xff] }
 0x2a8   :  { %v1450_v34 = vsub.f32 %v1442_v12, %v1449_v30 }
 0x2aa   :  { %v1451_v35 = vmul.f32 1.442695, %v1450_v34 }
 0x2ac   :  { %6622 = vpow2.f32 %v1451_v35 }
 0x2b9   :  { %v6623_v36 = vpop.eup %6622 }
 0x2ba   :  { %v1453_v39 = vsel %vm373_vm2, %v6623_v36, 0.0 }
 0x2bb   :  { %v1454_v41 = vrot.slane %v1453_v39, 4 }
 0x2bd   :  { %v1455_v54 = vadd.f32 %v1454_v41, %v1453_v39 }
 0x2bf   :  { %v1456_v56 = vrot.slane %v1455_v54, 2 }
 0x2c1   :  { %v1457_v58 = vadd.f32 %v1456_v56, %v1455_v54 }
 0x2c3   :  { %v1458_v60 = vrot.slane %v1457_v58, 1 }
 0x2c5   :  { %v1459_v63 = vadd.f32 %v1458_v60, %v1457_v58 }
 0x2c7   :  { %6624 = vrcp.f32 %v1459_v63 }
 0x2d4   :  { %v6625_v10 = vpop.eup %6624 }
 0x2d5   :  { %v1461_v11 = vmul.f32 %v6625_v10, %v6623_v36 }
 0x2d7   :  { %v1462_v13 = vsel %vm373_vm2, %v1461_v11, 0.0 }
 0x2d8   :  { %1463 = vadd.xlane.f32.xlu0 %v1462_v13 }
 0x2ee   :  { %927 = vrot.lane.b32.xlu0 %v6093_v62, %s6728_s2  ;;  %v7162_v62 = vld [vmem:[%s8032_s0 + $0x8] sm:$0xff] }
 0x361   :  { %v1464_v12 = vpop.xlane.xlu0 %1463 }
 0x362   :  { %v1465_v14 = vadd.f32 1e-08, %v1464_v12 }
 0x364   :  { %6626 = vrcp.f32 %v1465_v14 }
 0x365   :  { %v928_v17 = vpop.permute.xlu0 %927 }
 0x366   :  { %932 = vxpose.xlu1.b32.end [2/2] (short) (narrow) %v928_v17, 32 }
 0x371   :  { %v6627_v19 = vpop.eup %6626 }
 0x372   :  { %v1467_v21 = vmul.f32 %v6627_v19, %v1461_v11 }
 0x374   :  { %6142 = vmatmul.mubr.msk.f32.vlgmr.msra.gmra.mxu1 %vm373_vm2, %v1467_v21 }
 0x375   :  { %6145 = vmatpush3.msra.mxu1 %v6896_v27  ;;  %6152 = vmatprep.mubr.msk.f32.mxu1 %vm6727_vm1, %v6726_v25 }
 0x376   :  { %6146 = vmatprep.subr.mxu1 %v6726_v25 }
 0x377   :  { %6147 = vmatpush3.msra.mxu1 %v6904_v28 }
 0x378   :  { %6148 = vmatprep.subr.mxu1 %v6726_v25 }
 0x379   :  { %6149 = vmatpush3.msra.mxu1 %v6917_v31 }
 0x37a   :  { %6150 = vmatprep.subr.mxu1 %v6726_v25 }
 0x37b   :  { %6151 = vmatpush3.msra.mxu1 %v6927_v32 }
 0x37c   :  { %6153 = vmatmul.mubr.msk.f32.vlgmr.msra.gmra.mxu1 %vm30_vm0, %v7162_v62  ;;  %6166 = vmatprep.subr.mxu1 %v6726_v25 }
 0x37d   :  { %6167 = vmatpush3.msra.mxu1 %v1621_v23  ;;  %6170 = vmatprep.mubr.msk.f32.mxu1 %vm6727_vm1, %v6726_v25 }
 0x37e   :  { %6168 = vmatprep.subr.mxu1 %v6726_v25 }
 0x37f   :  { %6169 = vmatpush3.msra.mxu1 %v1620_v26 }
 0x380   :  { %6184 = vmatprep.subr.mxu1 %v6726_v25 }
 0x38c   :  { %380 = vrot.lane.b32.xlu1 %v6971_v38, %s6728_s2 }
 0x390   :  { %970 = vrot.lane.b32.xlu1 %v7127_v3, %s6728_s2 }
 0x394   :  { %972 = vrot.lane.b32.xlu1 %v7123_v1, %s6728_s2 }
 0x3de   :  { %v947_v30 = vpop.trf.xlu1 }
 0x3df   :  { %964 = vst.msk [vmem:[#allocation2 + $0x100] sm:$0xff] %vm373_vm2, %v947_v30 }
 0x3e2   :  { %v948_v34 = vpop.trf.xlu1 }
 0x3e3   :  { %965 = vst.msk [vmem:[#allocation2 + $0x108] sm:$0xff] %vm373_vm2, %v948_v34 }
 0x3e6   :  { %v949_v35 = vpop.trf.xlu1  ;;  %v1616_v1 = vld [vmem:[#allocation2 + $0x100] sm:$0xff] }
 0x3e7   :  { %966 = vst.msk [vmem:[#allocation2 + $0x110] sm:$0xff] %vm373_vm2, %v949_v35 }
 0x3ea   :  { %v950_v36 = vpop.trf.xlu1  ;;  %v1617_v3 = vld [vmem:[#allocation2 + $0x108] sm:$0xff] }
 0x3eb   :  { %967 = vst.msk [vmem:[#allocation2 + $0x118] sm:$0xff] %vm373_vm2, %v950_v36 }
 0x3ee   :  { %v1618_v38 = vld [vmem:[#allocation2 + $0x110] sm:$0xff] }
 0x3f2   :  { %v1619_v39 = vld [vmem:[#allocation2 + $0x118] sm:$0xff] }
 0x3f3   :  { %6156 = vmatpush3.msra.mxu0 %v1619_v39 }
 0x3f4   :  { %6157 = vmatprep.subr.mxu0 %v6726_v25 }
 0x3f5   :  { %6158 = vmatpush3.msra.mxu0 %v1618_v38 }
 0x3f6   :  { %6159 = vmatprep.subr.mxu0 %v6726_v25 }
 0x3f7   :  { %6160 = vmatpush3.msra.mxu0 %v1617_v3 }
 0x3f8   :  { %6161 = vmatprep.subr.mxu0 %v6726_v25 }
 0x3f9   :  { %6162 = vmatpush3.msra.mxu0 %v1616_v1 }
 0x3fa   :  { %6173 = vmatprep.subr.mxu0 %v6726_v25 }
 0x434   :  { %v1537_v41 = vpop.f32.mrf.mxu1 }
 0x435   :  { %v7188_v54 = vadd.f32 %v1537_v41, %v6939_v33  ;;  %v1878_v33 = vld [vmem:[#allocation3 + $0x18] sm:$0xff] }
 0x436   :  { %v6143_v56 = vpop.f32.mrf.mxu1 }
 0x437   :  { %1542 = vst.msk [vmem:[#allocation4] sm:$0xff] %vm30_vm0, %v7188_v54 }
 0x43c   :  { %v1612_v58 = vpop.f32.mrf.mxu1 }
 0x43d   :  { %v1613_v60 = vadd.f32 %v1612_v58, %v7110_v51  ;;  %v1877_v51 = vld [vmem:[#allocation3 + $0x10] sm:$0xff] }
 0x43e   :  { %v6154_v63 = vpop.f32.mrf.mxu1  ;;  %v7193_v10 = vld [vmem:[#allocation4] sm:$0xff] }
 0x43f   :  { %6164 = vmatmul.mubr.msk.f32.vlgmr.msra.gmra.mxu0 %vm30_vm0, %v1613_v60  ;;  %5595 = vst.msk [vmem:[%s8034_s6] sm:$0xff] %vm30_vm0, %v7193_v10 }
 0x440   :  { %6174 = vmatpush3.msra.mxu0 %v6896_v27  ;;  %6181 = vmatprep.mubr.msk.f32.mxu0 %vm6727_vm1, %v6726_v25 }
 0x441   :  { %6175 = vmatprep.subr.mxu0 %v6726_v25 }
 0x442   :  { %6176 = vmatpush3.msra.mxu0 %v6904_v28 }
 0x443   :  { %6177 = vmatprep.subr.mxu0 %v6726_v25 }
 0x444   :  { %6178 = vmatpush3.msra.mxu0 %v6917_v31 }
 0x445   :  { %6179 = vmatprep.subr.mxu0 %v6726_v25 }
 0x446   :  { %6180 = vmatpush3.msra.mxu0 %v6927_v32 }
 0x447   :  { %6182 = vmatmul.mubr.msk.f32.vlgmr.msra.gmra.mxu0 %vm30_vm0, %v7188_v54  ;;  %6195 = vmatprep.subr.mxu0 %v6726_v25 }
 0x448   :  { %6196 = vmatpush3.msra.mxu0 %v1878_v33  ;;  %6199 = vmatprep.mubr.msk.f32.mxu0 %vm6727_vm1, %v6726_v25 }
 0x449   :  { %6197 = vmatprep.subr.mxu0 %v6726_v25 }
 0x44a   :  { %6198 = vmatpush3.msra.mxu0 %v1877_v51 }
 0x44b   :  { %6213 = vmatprep.subr.mxu0 %v6726_v25 }
 0x4ff   :  { %v1691_v11 = vpop.f32.mrf.mxu0 }
 0x500   :  { %v1695_v13 = vmul.f32 0.17677669, %v1691_v11 }
 0x501   :  { %v6165_v12 = vpop.f32.mrf.mxu0 }
 0x502   :  { %v1696_v14 = vsel %vm373_vm2, %v1695_v13, -inf }
 0x503   :  { %v1697_v17 = vrot.slane %v1696_v14, 4 }
 0x505   :  { %v1698_v19 = vmax.f32 %v1696_v14, %v1697_v17 }
 0x507   :  { %v1699_v21 = vrot.slane %v1698_v19, 2  ;;  %v1869_v23 = vpop.f32.mrf.mxu0 }
 0x509   :  { %v1700_v26 = vmax.f32 %v1698_v19, %v1699_v21  ;;  %v6183_v30 = vpop.f32.mrf.mxu0 }
 0x50b   :  { %v1701_v34 = vrot.slane %v1700_v26, 1 }
 0x50d   :  { %v1702_v35 = vmax.f32 %v1700_v26, %v1701_v34 }
 0x50f   :  { %v1703_v36 = vsub.f32 %v1695_v13, %v1702_v35  ;;  %v381_v13 = vpop.permute.xlu1 %380 }
 0x511   :  { %v1704_v39 = vmul.f32 1.442695, %v1703_v36 }
 0x513   :  { %6628 = vpow2.f32 %v1704_v39  ;;  %v971_v19 = vpop.permute.xlu1 %970 }
 0x517   :  { %v973_v26 = vpop.permute.xlu1 %972 }
 0x520   :  { %v6629_v38 = vpop.eup %6628 }
 0x521   :  { %v1706_v3 = vsel %vm373_vm2, %v6629_v38, 0.0 }
 0x522   :  { %v1707_v1 = vrot.slane %v1706_v3, 4 }
 0x524   :  { %v1708_v41 = vadd.f32 %v1707_v1, %v1706_v3  ;;  %v1870_v1 = vadd.f32 %v1869_v23, %v7092_v15 }
 0x526   :  { %v1709_v56 = vrot.slane %v1708_v41, 2 }
 0x528   :  { %v1710_v58 = vadd.f32 %v1709_v56, %v1708_v41 }
 0x52a   :  { %v1711_v60 = vrot.slane %v1710_v58, 1 }
 0x52c   :  { %v1712_v63 = vadd.f32 %v1711_v60, %v1710_v58  ;;  %v2131_v60 = vld [vmem:[#allocation3 + $0x98] sm:$0xff] }
 0x52e   :  { %6630 = vrcp.f32 %v1712_v63  ;;  %v2130_v63 = vld [vmem:[#allocation3 + $0x90] sm:$0xff] }
 0x53b   :  { %v6631_v33 = vpop.eup %6630 }
 0x53c   :  { %v1714_v51 = vmul.f32 %v6631_v33, %v6629_v38 }
 0x53e   :  { %v1715_v11 = vsel %vm373_vm2, %v1714_v51, 0.0 }
 0x53f   :  { %1716 = vadd.xlane.f32.xlu0 %v1715_v11 }
 0x555   :  { %382 = vrot.lane.b32.xlu0 %v6967_v37, %s6728_s2 }
 0x573   :  { %386 = vxpose.xlu0.b32.start [1/2] (short) (narrow) %v381_v13, 32 }
 0x5c8   :  { %v1717_v12 = vpop.xlane.xlu0 %1716 }
 0x5c9   :  { %v1718_v14 = vadd.f32 1e-08, %v1717_v12 }
 0x5cb   :  { %6632 = vrcp.f32 %v1718_v14 }
 0x5cc   :  { %v383_v17 = vpop.permute.xlu0 %382 }
 0x5cd   :  { %387 = vxpose.xlu0.b32.end [2/2] (short) (narrow) %v383_v17, 32 }
 0x5d6   :  { %976 = vxpose.xlu0.b32.start [1/2] (short) (narrow) %v971_v19, 32 }
 0x5d8   :  { %v6633_v21 = vpop.eup %6632 }
 0x5d9   :  { %v1720_v30 = vmul.f32 %v6633_v21, %v1714_v51 }
 0x5da   :  { %977 = vxpose.xlu0.b32.end [2/2] (short) (narrow) %v973_v26, 32 }
 0x5db   :  { %6171 = vmatmul.mubr.msk.f32.vlgmr.msra.gmra.mxu1 %vm373_vm2, %v1720_v30 }
 0x5dc   :  { %6192 = vmatprep.mubr.msk.f32.mxu1 %vm6727_vm1, %v6726_v25 }
 0x645   :  { %v402_v34 = vpop.trf.xlu0 }
 0x646   :  { %419 = vst.msk [vmem:[#allocation2 + $0x20] sm:$0xff] %vm373_vm2, %v402_v34 }
 0x649   :  { %v403_v37 = vpop.trf.xlu0 }
 0x64a   :  { %420 = vst.msk [vmem:[#allocation2 + $0x28] sm:$0xff] %vm373_vm2, %v403_v37 }
 0x64d   :  { %v404_v35 = vpop.trf.xlu0  ;;  %v1873_v41 = vld [vmem:[#allocation2 + $0x20] sm:$0xff] }
 0x64e   :  { %421 = vst.msk [vmem:[#allocation2 + $0x30] sm:$0xff] %vm373_vm2, %v404_v35 }
 0x651   :  { %v405_v36 = vpop.trf.xlu0  ;;  %v1874_v3 = vld [vmem:[#allocation2 + $0x28] sm:$0xff] }
 0x652   :  { %422 = vst.msk [vmem:[#allocation2 + $0x38] sm:$0xff] %vm373_vm2, %v405_v36 }
 0x655   :  { %v1875_v38 = vld [vmem:[#allocation2 + $0x30] sm:$0xff]  ;;  %v992_v33 = vpop.trf.xlu0 }
 0x656   :  { %1009 = vst.msk [vmem:[#allocation2 + $0x120] sm:$0xff] %vm373_vm2, %v992_v33 }
 0x659   :  { %v1876_v39 = vld [vmem:[#allocation2 + $0x38] sm:$0xff] }
 0x65a   :  { %6185 = vmatpush3.msra.mxu1 %v1876_v39 }
 0x65b   :  { %6186 = vmatprep.subr.mxu1 %v6726_v25 }
 0x65c   :  { %6187 = vmatpush3.msra.mxu1 %v1875_v38 }
 0x65d   :  { %6188 = vmatprep.subr.mxu1 %v6726_v25 }
 0x65e   :  { %6189 = vmatpush3.msra.mxu1 %v1874_v3 }
 0x65f   :  { %6190 = vmatprep.subr.mxu1 %v6726_v25 }
 0x660   :  { %6191 = vmatpush3.msra.mxu1 %v1873_v41 }
 0x661   :  { %6193 = vmatmul.mubr.msk.f32.vlgmr.msra.gmra.mxu1 %vm30_vm0, %v1870_v1  ;;  %6202 = vmatprep.subr.mxu1 %v6726_v25 }
 0x662   :  { %6203 = vmatpush3.msra.mxu1 %v6896_v27  ;;  %6210 = vmatprep.mubr.msk.f32.mxu1 %vm6727_vm1, %v6726_v25 }
 0x663   :  { %6204 = vmatprep.subr.mxu1 %v6726_v25 }
 0x664   :  { %6205 = vmatpush3.msra.mxu1 %v6904_v28 }
 0x665   :  { %6206 = vmatprep.subr.mxu1 %v6726_v25 }
 0x666   :  { %6207 = vmatpush3.msra.mxu1 %v6917_v31 }
 0x667   :  { %6208 = vmatprep.subr.mxu1 %v6726_v25 }
 0x668   :  { %6209 = vmatpush3.msra.mxu1 %v6927_v32 }
 0x669   :  { %6224 = vmatprep.subr.mxu1 %v6726_v25 }
 0x69b   :  { %v1790_v23 = vpop.f32.mrf.mxu1 }
 0x69c   :  { %v7246_v56 = vadd.f32 %v7162_v62, %v1790_v23 }
 0x69d   :  { %v6172_v58 = vpop.f32.mrf.mxu1 }
 0x69e   :  { %1795 = vst.msk [vmem:[#allocation4 + $0x40] sm:$0xff] %vm30_vm0, %v7246_v56  ;;  %6211 = vmatmul.mubr.msk.f32.vlgmr.msra.gmra.mxu1 %vm30_vm0, %v7246_v56 }
 0x69f   :  { %6225 = vmatpush3.msra.mxu1 %v2131_v60  ;;  %6228 = vmatprep.mubr.msk.f32.mxu1 %vm6727_vm1, %v6726_v25 }
 0x6a0   :  { %6226 = vmatprep.subr.mxu1 %v6726_v25 }
 0x6a1   :  { %6227 = vmatpush3.msra.mxu1 %v2130_v63 }
 0x6a2   :  { %6242 = vmatprep.subr.mxu1 %v6726_v25 }
 0x6a5   :  { %v7256_v62 = vld [vmem:[#allocation4 + $0x40] sm:$0xff] }
 0x6a6   :  { %5751 = vst.msk [vmem:[%s8034_s6 + $0x40] sm:$0xff] %vm30_vm0, %v7256_v62 }
 0x721   :  { %v1948_v51 = vpop.f32.mrf.mxu1 }
 0x722   :  { %v1952_v11 = vmul.f32 0.17677669, %v1948_v51 }
 0x723   :  { %v6194_v13 = vpop.f32.mrf.mxu1 }
 0x724   :  { %v1953_v12 = vsel %vm373_vm2, %v1952_v11, -inf }
 0x725   :  { %v1954_v14 = vrot.slane %v1953_v12, 4 }
 0x727   :  { %v1955_v17 = vmax.f32 %v1953_v12, %v1954_v14 }
 0x729   :  { %v1956_v19 = vrot.slane %v1955_v17, 2 }
 0x72b   :  { %v1957_v21 = vmax.f32 %v1955_v17, %v1956_v19 }
 0x72d   :  { %v1958_v26 = vrot.slane %v1957_v21, 1 }
 0x72f   :  { %v1959_v30 = vmax.f32 %v1957_v21, %v1958_v26 }
 0x731   :  { %v1960_v34 = vsub.f32 %v1952_v11, %v1959_v30  ;;  %v993_v11 = vpop.trf.xlu0 }
 0x732   :  { %1010 = vst.msk [vmem:[#allocation2 + $0x128] sm:$0xff] %vm373_vm2, %v993_v11 }
 0x733   :  { %v1961_v37 = vmul.f32 1.442695, %v1960_v34 }
 0x735   :  { %6634 = vpow2.f32 %v1961_v37  ;;  %v994_v13 = vpop.trf.xlu0 }
 0x736   :  { %1011 = vst.msk [vmem:[#allocation2 + $0x130] sm:$0xff] %vm373_vm2, %v994_v13 }
 0x739   :  { %v995_v12 = vpop.trf.xlu0 }
 0x73a   :  { %1012 = vst.msk [vmem:[#allocation2 + $0x138] sm:$0xff] %vm373_vm2, %v995_v12 }
 0x741   :  { %v2129_v34 = vld [vmem:[#allocation2 + $0x138] sm:$0xff] }
 0x742   :  { %v6635_v35 = vpop.eup %6634 }
 0x743   :  { %v1963_v36 = vsel %vm373_vm2, %v6635_v35, 0.0 }
 0x744   :  { %v1964_v39 = vrot.slane %v1963_v36, 4 }
 0x746   :  { %v1965_v38 = vadd.f32 %v1964_v39, %v1963_v36 }
 0x748   :  { %v1966_v3 = vrot.slane %v1965_v38, 2 }
 0x74a   :  { %v1967_v1 = vadd.f32 %v1966_v3, %v1965_v38 }
 0x74c   :  { %v1968_v41 = vrot.slane %v1967_v1, 1 }
 0x74e   :  { %v1969_v23 = vadd.f32 %v1968_v41, %v1967_v1 }
 0x750   :  { %6636 = vrcp.f32 %v1969_v23 }
 0x75d   :  { %v6637_v58 = vpop.eup %6636 }
 0x75e   :  { %v2122_v60 = vpop.f32.mrf.mxu1  ;;  %v1971_v63 = vmul.f32 %v6637_v58, %v6635_v35  ;;  %v2126_v35 = vld [vmem:[#allocation2 + $0x120] sm:$0xff] }
 0x75f   :  { %v2123_v37 = vadd.f32 %v2122_v60, %v7092_v15 }
 0x760   :  { %v6212_v33 = vpop.f32.mrf.mxu1  ;;  %v1972_v51 = vsel %vm373_vm2, %v1971_v63, 0.0 }
 0x761   :  { %1973 = vadd.xlane.f32.xlu1 %v1972_v51 }
 0x772   :  { %425 = vrot.lane.b32.xlu1 %v6981_v42, %s6728_s2  ;;  %v2127_v42 = vld [vmem:[#allocation2 + $0x128] sm:$0xff] }
 0x776   :  { %427 = vrot.lane.b32.xlu1 %v6976_v40, %s6728_s2  ;;  %v2128_v40 = vld [vmem:[#allocation2 + $0x130] sm:$0xff] }
 0x7ea   :  { %v1974_v14 = vpop.xlane.xlu1 %1973 }
 0x7eb   :  { %v1975_v17 = vadd.f32 1e-08, %v1974_v14 }
 0x7ed   :  { %6638 = vrcp.f32 %v1975_v17 }
 0x7ee   :  { %v426_v19 = vpop.permute.xlu1 %425 }
 0x7ef   :  { %431 = vxpose.xlu1.b32.start [1/2] (short) (narrow) %v426_v19, 32 }
 0x7f2   :  { %v428_v21 = vpop.permute.xlu1 %427 }
 0x7f3   :  { %432 = vxpose.xlu1.b32.end [2/2] (short) (narrow) %v428_v21, 32 }
 0x7fa   :  { %v6639_v26 = vpop.eup %6638 }
 0x7fb   :  { %v1977_v30 = vmul.f32 %v6639_v26, %v1971_v63 }
 0x7fd   :  { %6200 = vmatmul.mubr.msk.f32.vlgmr.msra.gmra.mxu0 %vm373_vm2, %v1977_v30 }
 0x7fe   :  { %6214 = vmatpush3.msra.mxu0 %v2129_v34  ;;  %6221 = vmatprep.mubr.msk.f32.mxu0 %vm6727_vm1, %v6726_v25 }
 0x7ff   :  { %6215 = vmatprep.subr.mxu0 %v6726_v25 }
 0x800   :  { %6216 = vmatpush3.msra.mxu0 %v2128_v40 }
 0x801   :  { %6217 = vmatprep.subr.mxu0 %v6726_v25 }
 0x802   :  { %6218 = vmatpush3.msra.mxu0 %v2127_v42 }
 0x803   :  { %6219 = vmatprep.subr.mxu0 %v6726_v25 }
 0x804   :  { %6220 = vmatpush3.msra.mxu0 %v2126_v35 }
 0x805   :  { %6222 = vmatmul.mubr.msk.f32.vlgmr.msra.gmra.mxu0 %vm30_vm0, %v2123_v37  ;;  %6231 = vmatprep.subr.mxu0 %v6726_v25 }
 0x806   :  { %6232 = vmatpush3.msra.mxu0 %v6896_v27  ;;  %6239 = vmatprep.mubr.msk.f32.mxu0 %vm6727_vm1, %v6726_v25 }
 0x807   :  { %6233 = vmatprep.subr.mxu0 %v6726_v25 }
 0x808   :  { %6234 = vmatpush3.msra.mxu0 %v6904_v28  ;;  %v2388_v28 = vld [vmem:[#allocation3 + $0x28] sm:$0xff] }
 0x809   :  { %6235 = vmatprep.subr.mxu0 %v6726_v25 }
 0x80a   :  { %6236 = vmatpush3.msra.mxu0 %v6917_v31  ;;  %v2387_v31 = vld [vmem:[#allocation3 + $0x20] sm:$0xff] }
 0x80b   :  { %6237 = vmatprep.subr.mxu0 %v6726_v25 }
 0x80c   :  { %6238 = vmatpush3.msra.mxu0 %v6927_v32 }
 0x80d   :  { %6253 = vmatprep.subr.mxu0 %v6726_v25 }
 0x86b   :  { %v447_v40 = vpop.trf.xlu1 }
 0x86c   :  { %464 = vst.msk [vmem:[#allocation2 + $0x40] sm:$0xff] %vm373_vm2, %v447_v40 }
 0x86f   :  { %v448_v37 = vpop.trf.xlu1 }
 0x870   :  { %465 = vst.msk [vmem:[#allocation2 + $0x48] sm:$0xff] %vm373_vm2, %v448_v37 }
 0x873   :  { %v449_v35 = vpop.trf.xlu1 }
 0x874   :  { %466 = vst.msk [vmem:[#allocation2 + $0x50] sm:$0xff] %vm373_vm2, %v449_v35 }
 0x8bd   :  { %v2047_v15 = vpop.f32.mrf.mxu0 }
 0x8be   :  { %v7294_v27 = vadd.f32 %v2047_v15, %v7188_v54  ;;  %v450_v15 = vpop.trf.xlu1 }
 0x8bf   :  { %v6201_v36 = vpop.f32.mrf.mxu0  ;;  %467 = vst.msk [vmem:[#allocation2 + $0x58] sm:$0xff] %vm373_vm2, %v450_v15 }
 0x8c0   :  { %2052 = vst.msk [vmem:[#allocation4 + $0x8] sm:$0xff] %vm30_vm0, %v7294_v27  ;;  %6240 = vmatmul.mubr.msk.f32.vlgmr.msra.gmra.mxu0 %vm30_vm0, %v7294_v27 }
 0x8c1   :  { %6254 = vmatpush3.msra.mxu0 %v2388_v28  ;;  %6257 = vmatprep.mubr.msk.f32.mxu0 %vm6727_vm1, %v6726_v25 }
 0x8c2   :  { %6255 = vmatprep.subr.mxu0 %v6726_v25 }
 0x8c3   :  { %6256 = vmatpush3.msra.mxu0 %v2387_v31 }
 0x8c4   :  { %6271 = vmatprep.subr.mxu0 %v6726_v25 }
 0x8c5   :  { %v2201_v32 = vpop.f32.mrf.mxu0 }
 0x8c6   :  { %v2205_v54 = vmul.f32 0.17677669, %v2201_v32 }
 0x8c7   :  { %v6223_v39 = vpop.f32.mrf.mxu0  ;;  %v7304_v38 = vld [vmem:[#allocation4 + $0x8] sm:$0xff] }
 0x8c8   :  { %v2206_v3 = vsel %vm373_vm2, %v2205_v54, -inf  ;;  %5596 = vst.msk [vmem:[%s8034_s6 + $0x8] sm:$0xff] %vm30_vm0, %v7304_v38 }
 0x8c9   :  { %v2207_v1 = vrot.slane %v2206_v3, 4 }
 0x8cb   :  { %v2208_v41 = vmax.f32 %v2206_v3, %v2207_v1 }
 0x8cd   :  { %v2209_v23 = vrot.slane %v2208_v41, 2 }
 0x8cf   :  { %v2210_v58 = vmax.f32 %v2208_v41, %v2209_v23  ;;  %v2386_v41 = vld [vmem:[#allocation2 + $0x58] sm:$0xff] }
 0x8d1   :  { %v2211_v60 = vrot.slane %v2210_v58, 1 }
 0x8d3   :  { %v2212_v63 = vmax.f32 %v2210_v58, %v2211_v60  ;;  %v2383_v58 = vld [vmem:[#allocation2 + $0x40] sm:$0xff]  ;;  %v7334_v60 = vld [vmem:[%s8031_s3 + $0x18] sm:$0xff] }
 0x8d5   :  { %v2213_v33 = vsub.f32 %v2205_v54, %v2212_v63  ;;  %v7343_v63 = vld [vmem:[%s8031_s3 + $0x10] sm:$0xff] }
 0x8d7   :  { %v2214_v51 = vmul.f32 1.442695, %v2213_v33  ;;  %v7350_v33 = vld [vmem:[%s8031_s3 + $0x8] sm:$0xff] }
 0x8d9   :  { %6640 = vpow2.f32 %v2214_v51  ;;  %v7357_v51 = vld [vmem:[%s8031_s3] sm:$0xff] }
 0x8e6   :  { %v6641_v11 = vpop.eup %6640 }
 0x8e7   :  { %v2216_v13 = vsel %vm373_vm2, %v6641_v11, 0.0 }
 0x8e8   :  { %v2217_v12 = vrot.slane %v2216_v13, 4 }
 0x8ea   :  { %v2218_v14 = vadd.f32 %v2217_v12, %v2216_v13 }
 0x8ec   :  { %v2219_v17 = vrot.slane %v2218_v14, 2 }
 0x8ee   :  { %v2220_v19 = vadd.f32 %v2219_v17, %v2218_v14  ;;  %v2641_v14 = vld [vmem:[#allocation3 + $0xa8] sm:$0xff]  ;;  %v2640_v17 = vld [vmem:[#allocation3 + $0xa0] sm:$0xff] }
 0x8f0   :  { %v2221_v21 = vrot.slane %v2220_v19, 1 }
 0x8f2   :  { %v2222_v26 = vadd.f32 %v2221_v21, %v2220_v19 }
 0x8f4   :  { %6642 = vrcp.f32 %v2222_v26 }
 0x901   :  { %v6643_v30 = vpop.eup %6642 }
 0x902   :  { %v2224_v34 = vmul.f32 %v6643_v30, %v6641_v11 }
 0x904   :  { %v2225_v42 = vsel %vm373_vm2, %v2224_v34, 0.0 }
 0x905   :  { %2226 = vadd.xlane.f32.xlu0 %v2225_v42 }
 0x91b   :  { %1015 = vrot.lane.b32.xlu0 %v7135_v6, %s6728_s2  ;;  %v2384_v6 = vld [vmem:[#allocation2 + $0x48] sm:$0xff] }
 0x91f   :  { %1017 = vrot.lane.b32.xlu0 %v7131_v5, %s6728_s2  ;;  %v2385_v5 = vld [vmem:[#allocation2 + $0x50] sm:$0xff] }
 0x980   :  { %v2379_v36 = vpop.f32.mrf.mxu0 }
 0x981   :  { %v2380_v23 = vadd.f32 %v2379_v36, %v7094_v16 }
 0x982   :  { %v6241_v28 = vpop.f32.mrf.mxu0 }
 0x98e   :  { %v2227_v31 = vpop.xlane.xlu0 %2226 }
 0x98f   :  { %v2228_v32 = vadd.f32 1e-08, %v2227_v31 }
 0x991   :  { %6644 = vrcp.f32 %v2228_v32 }
 0x992   :  { %v1016_v54 = vpop.permute.xlu0 %1015 }
 0x993   :  { %1021 = vxpose.xlu0.b32.start [1/2] (short) (narrow) %v1016_v54, 32 }
 0x996   :  { %v1018_v39 = vpop.permute.xlu0 %1017 }
 0x997   :  { %1022 = vxpose.xlu0.b32.end [2/2] (short) (narrow) %v1018_v39, 32 }
 0x99e   :  { %v6645_v3 = vpop.eup %6644 }
 0x99f   :  { %v2230_v1 = vmul.f32 %v6645_v3, %v2224_v34 }
 0x9a1   :  { %6229 = vmatmul.mubr.msk.f32.vlgmr.msra.gmra.mxu1 %vm373_vm2, %v2230_v1 }
 0x9a2   :  { %6243 = vmatpush3.msra.mxu1 %v2386_v41  ;;  %6250 = vmatprep.mubr.msk.f32.mxu1 %vm6727_vm1, %v6726_v25 }
 0x9a3   :  { %6244 = vmatprep.subr.mxu1 %v6726_v25 }
 0x9a4   :  { %6245 = vmatpush3.msra.mxu1 %v2385_v5 }
 0x9a5   :  { %6246 = vmatprep.subr.mxu1 %v6726_v25 }
 0x9a6   :  { %6247 = vmatpush3.msra.mxu1 %v2384_v6 }
 0x9a7   :  { %6248 = vmatprep.subr.mxu1 %v6726_v25 }
 0x9a8   :  { %6249 = vmatpush3.msra.mxu1 %v2383_v58 }
 0x9a9   :  { %6251 = vmatmul.mubr.msk.f32.vlgmr.msra.gmra.mxu1 %vm30_vm0, %v2380_v23  ;;  %6260 = vmatprep.subr.mxu1 %v6726_v25 }
 0x9aa   :  { %6261 = vmatpush3.msra.mxu1 %v7334_v60  ;;  %6268 = vmatprep.mubr.msk.f32.mxu1 %vm6727_vm1, %v6726_v25 }
 0x9ab   :  { %6262 = vmatprep.subr.mxu1 %v6726_v25 }
 0x9ac   :  { %6263 = vmatpush3.msra.mxu1 %v7343_v63 }
 0x9ad   :  { %6264 = vmatprep.subr.mxu1 %v6726_v25 }
 0x9ae   :  { %6265 = vmatpush3.msra.mxu1 %v7350_v33 }
 0x9af   :  { %6266 = vmatprep.subr.mxu1 %v6726_v25 }
 0x9b0   :  { %6267 = vmatpush3.msra.mxu1 %v7357_v51 }
 0x9b1   :  { %6282 = vmatprep.subr.mxu1 %v6726_v25 }
 0xa0f   :  { %v1037_v58 = vpop.trf.xlu0 }
 0xa10   :  { %1054 = vst.msk [vmem:[#allocation2 + $0x140] sm:$0xff] %vm373_vm2, %v1037_v58 }
 0xa61   :  { %v2300_v11 = vpop.f32.mrf.mxu1 }
 0xa62   :  { %v7362_v13 = vadd.f32 %v2300_v11, %v7246_v56 }
 0xa63   :  { %v6230_v12 = vpop.f32.mrf.mxu1 }
 0xa64   :  { %2305 = vst.msk [vmem:[#allocation4 + $0x48] sm:$0xff] %vm30_vm0, %v7362_v13  ;;  %6269 = vmatmul.mubr.msk.f32.vlgmr.msra.gmra.mxu1 %vm30_vm0, %v7362_v13  ;;  %v1038_v12 = vpop.trf.xlu0 }
 0xa65   :  { %6283 = vmatpush3.msra.mxu1 %v2641_v14  ;;  %6286 = vmatprep.mubr.msk.f32.mxu1 %vm6727_vm1, %v6726_v25  ;;  %1055 = vst.msk [vmem:[#allocation2 + $0x148] sm:$0xff] %vm373_vm2, %v1038_v12 }
 0xa66   :  { %6284 = vmatprep.subr.mxu1 %v6726_v25 }
 0xa67   :  { %6285 = vmatpush3.msra.mxu1 %v2640_v17 }
 0xa68   :  { %6300 = vmatprep.subr.mxu1 %v6726_v25  ;;  %v1039_v14 = vpop.trf.xlu0 }
 0xa69   :  { %v2458_v56 = vpop.f32.mrf.mxu1  ;;  %1056 = vst.msk [vmem:[#allocation2 + $0x150] sm:$0xff] %vm373_vm2, %v1039_v14 }
 0xa6a   :  { %v2462_v19 = vmul.f32 0.17677669, %v2458_v56 }
 0xa6b   :  { %v6252_v21 = vpop.f32.mrf.mxu1  ;;  %v7372_v26 = vld [vmem:[#allocation4 + $0x48] sm:$0xff] }
 0xa6c   :  { %v2463_v30 = vsel %vm373_vm2, %v2462_v19, -inf  ;;  %5752 = vst.msk [vmem:[%s8034_s6 + $0x48] sm:$0xff] %vm30_vm0, %v7372_v26  ;;  %v1040_v17 = vpop.trf.xlu0 }
 0xa6d   :  { %v2464_v34 = vrot.slane %v2463_v30, 4  ;;  %1057 = vst.msk [vmem:[#allocation2 + $0x158] sm:$0xff] %vm373_vm2, %v1040_v17 }
 0xa6f   :  { %v2465_v40 = vmax.f32 %v2463_v30, %v2464_v34 }
 0xa71   :  { %v2466_v42 = vrot.slane %v2465_v40, 2 }
 0xa73   :  { %v2467_v37 = vmax.f32 %v2465_v40, %v2466_v42 }
 0xa75   :  { %v2468_v35 = vrot.slane %v2467_v37, 1 }
 0xa77   :  { %v2469_v15 = vmax.f32 %v2467_v37, %v2468_v35  ;;  %v2639_v35 = vld [vmem:[#allocation2 + $0x158] sm:$0xff] }
 0xa79   :  { %v2470_v36 = vsub.f32 %v2462_v19, %v2469_v15 }
 0xa7b   :  { %v2471_v28 = vmul.f32 1.442695, %v2470_v36  ;;  %v2636_v36 = vld [vmem:[#allocation2 + $0x140] sm:$0xff] }
 0xa7d   :  { %6646 = vpow2.f32 %v2471_v28 }
 0xa8a   :  { %v6647_v31 = vpop.eup %6646 }
 0xa8b   :  { %v2473_v32 = vsel %vm373_vm2, %v6647_v31, 0.0 }
 0xa8c   :  { %v2474_v54 = vrot.slane %v2473_v32, 4 }
 0xa8e   :  { %v2475_v39 = vadd.f32 %v2474_v54, %v2473_v32  ;;  %v2898_v32 = vld [vmem:[#allocation3 + $0x38] sm:$0xff]  ;;  %v2897_v54 = vld [vmem:[#allocation3 + $0x30] sm:$0xff] }
 0xa90   :  { %v2476_v3 = vrot.slane %v2475_v39, 2 }
 0xa92   :  { %v2477_v1 = vadd.f32 %v2476_v3, %v2475_v39 }
 0xa94   :  { %v2478_v41 = vrot.slane %v2477_v1, 1 }
 0xa96   :  { %v2479_v5 = vadd.f32 %v2478_v41, %v2477_v1 }
 0xa98   :  { %6648 = vrcp.f32 %v2479_v5 }
 0xaa5   :  { %v6649_v6 = vpop.eup %6648 }
 0xaa6   :  { %v2481_v23 = vmul.f32 %v6649_v6, %v6647_v31 }
 0xaa8   :  { %v2482_v11 = vsel %vm373_vm2, %v2481_v23, 0.0 }
 0xaa9   :  { %2483 = vadd.xlane.f32.xlu1 %v2482_v11 }
 0xaba   :  { %470 = vrot.lane.b32.xlu1 %v6990_v44, %s6728_s2  ;;  %v2637_v44 = vld [vmem:[#allocation2 + $0x148] sm:$0xff] }
 0xabe   :  { %472 = vrot.lane.b32.xlu1 %v6985_v43, %s6728_s2  ;;  %v2638_v43 = vld [vmem:[#allocation2 + $0x150] sm:$0xff] }
 0xb24   :  { %v2632_v56 = vpop.f32.mrf.mxu1 }
 0xb25   :  { %v2633_v15 = vadd.f32 %v2632_v56, %v7094_v16 }
 0xb26   :  { %v6270_v19 = vpop.f32.mrf.mxu1 }
 0xb32   :  { %v2484_v21 = vpop.xlane.xlu1 %2483 }
 0xb33   :  { %v2485_v30 = vadd.f32 1e-08, %v2484_v21 }
 0xb35   :  { %6650 = vrcp.f32 %v2485_v30 }
 0xb36   :  { %v471_v34 = vpop.permute.xlu1 %470 }
 0xb37   :  { %476 = vxpose.xlu1.b32.start [1/2] (short) (narrow) %v471_v34, 32 }
 0xb3a   :  { %v473_v40 = vpop.permute.xlu1 %472 }
 0xb3b   :  { %477 = vxpose.xlu1.b32.end [2/2] (short) (narrow) %v473_v40, 32 }
 0xb42   :  { %v6651_v42 = vpop.eup %6650 }
 0xb43   :  { %v2487_v37 = vmul.f32 %v6651_v42, %v2481_v23 }
 0xb45   :  { %6258 = vmatmul.mubr.msk.f32.vlgmr.msra.gmra.mxu0 %vm373_vm2, %v2487_v37 }
 0xb46   :  { %6272 = vmatpush3.msra.mxu0 %v2639_v35  ;;  %6279 = vmatprep.mubr.msk.f32.mxu0 %vm6727_vm1, %v6726_v25 }
 0xb47   :  { %6273 = vmatprep.subr.mxu0 %v6726_v25 }
 0xb48   :  { %6274 = vmatpush3.msra.mxu0 %v2638_v43 }
 0xb49   :  { %6275 = vmatprep.subr.mxu0 %v6726_v25 }
 0xb4a   :  { %6276 = vmatpush3.msra.mxu0 %v2637_v44 }
 0xb4b   :  { %6277 = vmatprep.subr.mxu0 %v6726_v25 }
 0xb4c   :  { %6278 = vmatpush3.msra.mxu0 %v2636_v36 }
 0xb4d   :  { %6280 = vmatmul.mubr.msk.f32.vlgmr.msra.gmra.mxu0 %vm30_vm0, %v2633_v15  ;;  %6289 = vmatprep.subr.mxu0 %v6726_v25 }
 0xb4e   :  { %6290 = vmatpush3.msra.mxu0 %v7334_v60  ;;  %6297 = vmatprep.mubr.msk.f32.mxu0 %vm6727_vm1, %v6726_v25 }
 0xb4f   :  { %6291 = vmatprep.subr.mxu0 %v6726_v25 }
 0xb50   :  { %6292 = vmatpush3.msra.mxu0 %v7343_v63 }
 0xb51   :  { %6293 = vmatprep.subr.mxu0 %v6726_v25 }
 0xb52   :  { %6294 = vmatpush3.msra.mxu0 %v7350_v33 }
 0xb53   :  { %6295 = vmatprep.subr.mxu0 %v6726_v25 }
 0xb54   :  { %6296 = vmatpush3.msra.mxu0 %v7357_v51 }
 0xb55   :  { %6311 = vmatprep.subr.mxu0 %v6726_v25 }
 0xbb3   :  { %v492_v44 = vpop.trf.xlu1 }
 0xbb4   :  { %509 = vst.msk [vmem:[#allocation2 + $0x60] sm:$0xff] %vm373_vm2, %v492_v44 }
 0xbb7   :  { %v493_v36 = vpop.trf.xlu1 }
 0xbb8   :  { %510 = vst.msk [vmem:[#allocation2 + $0x68] sm:$0xff] %vm373_vm2, %v493_v36 }
 0xc05   :  { %v2557_v16 = vpop.f32.mrf.mxu0 }
 0xc06   :  { %v7410_v28 = vadd.f32 %v2557_v16, %v7294_v27  ;;  %v494_v16 = vpop.trf.xlu1 }
 0xc07   :  { %v6259_v31 = vpop.f32.mrf.mxu0  ;;  %511 = vst.msk [vmem:[#allocation2 + $0x70] sm:$0xff] %vm373_vm2, %v494_v16 }
 0xc08   :  { %2562 = vst.msk [vmem:[#allocation4 + $0x10] sm:$0xff] %vm30_vm0, %v7410_v28  ;;  %6298 = vmatmul.mubr.msk.f32.vlgmr.msra.gmra.mxu0 %vm30_vm0, %v7410_v28 }
 0xc09   :  { %6312 = vmatpush3.msra.mxu0 %v2898_v32  ;;  %6315 = vmatprep.mubr.msk.f32.mxu0 %vm6727_vm1, %v6726_v25 }
 0xc0a   :  { %6313 = vmatprep.subr.mxu0 %v6726_v25  ;;  %v495_v31 = vpop.trf.xlu1 }
 0xc0b   :  { %6314 = vmatpush3.msra.mxu0 %v2897_v54  ;;  %512 = vst.msk [vmem:[#allocation2 + $0x78] sm:$0xff] %vm373_vm2, %v495_v31 }
 0xc0c   :  { %6329 = vmatprep.subr.mxu0 %v6726_v25 }
 0xc0d   :  { %v2711_v27 = vpop.f32.mrf.mxu0 }
 0xc0e   :  { %v2715_v39 = vmul.f32 0.17677669, %v2711_v27 }
 0xc0f   :  { %v6281_v3 = vpop.f32.mrf.mxu0  ;;  %v7420_v1 = vld [vmem:[#allocation4 + $0x10] sm:$0xff] }
 0xc10   :  { %v2716_v41 = vsel %vm373_vm2, %v2715_v39, -inf  ;;  %5597 = vst.msk [vmem:[%s8034_s6 + $0x10] sm:$0xff] %vm30_vm0, %v7420_v1 }
 0xc11   :  { %v2717_v5 = vrot.slane %v2716_v41, 4 }
 0xc13   :  { %v2718_v6 = vmax.f32 %v2716_v41, %v2717_v5 }
 0xc15   :  { %v2719_v23 = vrot.slane %v2718_v6, 2 }
 0xc17   :  { %v2720_v58 = vmax.f32 %v2718_v6, %v2719_v23  ;;  %v2896_v23 = vld [vmem:[#allocation2 + $0x78] sm:$0xff] }
 0xc19   :  { %v2721_v11 = vrot.slane %v2720_v58, 1 }
 0xc1b   :  { %v2722_v12 = vmax.f32 %v2720_v58, %v2721_v11  ;;  %v2893_v11 = vld [vmem:[#allocation2 + $0x60] sm:$0xff] }
 0xc1d   :  { %v2723_v14 = vsub.f32 %v2715_v39, %v2722_v12 }
 0xc1f   :  { %v2724_v17 = vmul.f32 1.442695, %v2723_v14 }
 0xc21   :  { %6652 = vpow2.f32 %v2724_v17 }
 0xc2e   :  { %v6653_v56 = vpop.eup %6652 }
 0xc2f   :  { %v2726_v19 = vsel %vm373_vm2, %v6653_v56, 0.0 }
 0xc30   :  { %v2727_v21 = vrot.slane %v2726_v19, 4 }
 0xc32   :  { %v2728_v30 = vadd.f32 %v2727_v21, %v2726_v19  ;;  %v3150_v19 = vld [vmem:[#allocation3 + $0xb0] sm:$0xff] }
 0xc34   :  { %v2729_v34 = vrot.slane %v2728_v30, 2 }
 0xc36   :  { %v2730_v40 = vadd.f32 %v2729_v34, %v2728_v30 }
 0xc38   :  { %v2731_v42 = vrot.slane %v2730_v40, 1 }
 0xc3a   :  { %v2732_v37 = vadd.f32 %v2731_v42, %v2730_v40 }
 0xc3c   :  { %6654 = vrcp.f32 %v2732_v37 }
 0xc49   :  { %v6655_v35 = vpop.eup %6654 }
 0xc4a   :  { %v2734_v43 = vmul.f32 %v6655_v35, %v6653_v56  ;;  %v3151_v56 = vld [vmem:[#allocation3 + $0xb8] sm:$0xff] }
 0xc4c   :  { %v2735_v15 = vsel %vm373_vm2, %v2734_v43, 0.0 }
 0xc4d   :  { %2736 = vadd.xlane.f32.xlu0 %v2735_v15 }
 0xc63   :  { %1060 = vrot.lane.b32.xlu0 %v7143_v9, %s6728_s2  ;;  %v2894_v9 = vld [vmem:[#allocation2 + $0x68] sm:$0xff] }
 0xc67   :  { %1062 = vrot.lane.b32.xlu0 %v7139_v7, %s6728_s2  ;;  %v2895_v7 = vld [vmem:[#allocation2 + $0x70] sm:$0xff] }
 0xcc8   :  { %v2889_v32 = vpop.f32.mrf.mxu0 }
 0xcc9   :  { %v2890_v58 = vadd.f32 %v2889_v32, %v7096_v18 }
 0xcca   :  { %v6299_v54 = vpop.f32.mrf.mxu0 }
 0xcd6   :  { %v2737_v27 = vpop.xlane.xlu0 %2736 }
 0xcd7   :  { %v2738_v39 = vadd.f32 1e-08, %v2737_v27 }
 0xcd9   :  { %6656 = vrcp.f32 %v2738_v39 }
 0xcda   :  { %v1061_v3 = vpop.permute.xlu0 %1060 }
 0xcdb   :  { %1066 = vxpose.xlu0.b32.start [1/2] (short) (narrow) %v1061_v3, 32 }
 0xcde   :  { %v1063_v41 = vpop.permute.xlu0 %1062 }
 0xcdf   :  { %1067 = vxpose.xlu0.b32.end [2/2] (short) (narrow) %v1063_v41, 32 }
 0xce6   :  { %v6657_v5 = vpop.eup %6656 }
 0xce7   :  { %v2740_v6 = vmul.f32 %v6657_v5, %v2734_v43 }
 0xce9   :  { %6287 = vmatmul.mubr.msk.f32.vlgmr.msra.gmra.mxu1 %vm373_vm2, %v2740_v6 }
 0xcea   :  { %6301 = vmatpush3.msra.mxu1 %v2896_v23  ;;  %6308 = vmatprep.mubr.msk.f32.mxu1 %vm6727_vm1, %v6726_v25 }
 0xceb   :  { %6302 = vmatprep.subr.mxu1 %v6726_v25 }
 0xcec   :  { %6303 = vmatpush3.msra.mxu1 %v2895_v7 }
 0xced   :  { %6304 = vmatprep.subr.mxu1 %v6726_v25 }
 0xcee   :  { %6305 = vmatpush3.msra.mxu1 %v2894_v9 }
 0xcef   :  { %6306 = vmatprep.subr.mxu1 %v6726_v25 }
 0xcf0   :  { %6307 = vmatpush3.msra.mxu1 %v2893_v11 }
 0xcf1   :  { %6309 = vmatmul.mubr.msk.f32.vlgmr.msra.gmra.mxu1 %vm30_vm0, %v2890_v58  ;;  %6318 = vmatprep.subr.mxu1 %v6726_v25 }
 0xcf2   :  { %6319 = vmatpush3.msra.mxu1 %v7334_v60  ;;  %6326 = vmatprep.mubr.msk.f32.mxu1 %vm6727_vm1, %v6726_v25 }
 0xcf3   :  { %6320 = vmatprep.subr.mxu1 %v6726_v25 }
 0xcf4   :  { %6321 = vmatpush3.msra.mxu1 %v7343_v63 }
 0xcf5   :  { %6322 = vmatprep.subr.mxu1 %v6726_v25 }
 0xcf6   :  { %6323 = vmatpush3.msra.mxu1 %v7350_v33 }
 0xcf7   :  { %6324 = vmatprep.subr.mxu1 %v6726_v25 }
 0xcf8   :  { %6325 = vmatpush3.msra.mxu1 %v7357_v51 }
 0xcf9   :  { %6340 = vmatprep.subr.mxu1 %v6726_v25 }
 0xd57   :  { %v1082_v7 = vpop.trf.xlu0 }
 0xd58   :  { %1099 = vst.msk [vmem:[#allocation2 + $0x160] sm:$0xff] %vm373_vm2, %v1082_v7 }
 0xd5b   :  { %v1083_v58 = vpop.trf.xlu0 }
 0xd5c   :  { %1100 = vst.msk [vmem:[#allocation2 + $0x168] sm:$0xff] %vm373_vm2, %v1083_v58 }
 0xd5f   :  { %v1084_v11 = vpop.trf.xlu0 }
 0xd60   :  { %1101 = vst.msk [vmem:[#allocation2 + $0x170] sm:$0xff] %vm373_vm2, %v1084_v11 }
 0xda9   :  { %v2810_v12 = vpop.f32.mrf.mxu1 }
 0xdaa   :  { %v7458_v14 = vadd.f32 %v2810_v12, %v7362_v13  ;;  %v1085_v12 = vpop.trf.xlu0 }
 0xdab   :  { %v6288_v17 = vpop.f32.mrf.mxu1  ;;  %1102 = vst.msk [vmem:[#allocation2 + $0x178] sm:$0xff] %vm373_vm2, %v1085_v12 }
 0xdac   :  { %2815 = vst.msk [vmem:[#allocation4 + $0x50] sm:$0xff] %vm30_vm0, %v7458_v14  ;;  %6327 = vmatmul.mubr.msk.f32.vlgmr.msra.gmra.mxu1 %vm30_vm0, %v7458_v14 }
 0xdad   :  { %6341 = vmatpush3.msra.mxu1 %v3151_v56  ;;  %6344 = vmatprep.mubr.msk.f32.mxu1 %vm6727_vm1, %v6726_v25 }
 0xdae   :  { %6342 = vmatprep.subr.mxu1 %v6726_v25 }
 0xdaf   :  { %6343 = vmatpush3.msra.mxu1 %v3150_v19 }
 0xdb0   :  { %6358 = vmatprep.subr.mxu1 %v6726_v25 }
 0xdb1   :  { %v2968_v13 = vpop.f32.mrf.mxu1 }
 0xdb2   :  { %v2972_v21 = vmul.f32 0.17677669, %v2968_v13 }
 0xdb3   :  { %v6310_v30 = vpop.f32.mrf.mxu1  ;;  %v7468_v34 = vld [vmem:[#allocation4 + $0x50] sm:$0xff] }
 0xdb4   :  { %v2973_v40 = vsel %vm373_vm2, %v2972_v21, -inf  ;;  %5753 = vst.msk [vmem:[%s8034_s6 + $0x50] sm:$0xff] %vm30_vm0, %v7468_v34 }
 0xdb5   :  { %v2974_v42 = vrot.slane %v2973_v40, 4 }
 0xdb7   :  { %v2975_v37 = vmax.f32 %v2973_v40, %v2974_v42 }
 0xdb9   :  { %v2976_v35 = vrot.slane %v2975_v37, 2 }
 0xdbb   :  { %v2977_v43 = vmax.f32 %v2975_v37, %v2976_v35  ;;  %v3149_v37 = vld [vmem:[#allocation2 + $0x178] sm:$0xff] }
 0xdbd   :  { %v2978_v44 = vrot.slane %v2977_v43, 1 }
 0xdbf   :  { %v2979_v15 = vmax.f32 %v2977_v43, %v2978_v44  ;;  %v3146_v43 = vld [vmem:[#allocation2 + $0x160] sm:$0xff] }
 0xdc1   :  { %v2980_v36 = vsub.f32 %v2972_v21, %v2979_v15 }
 0xdc3   :  { %v2981_v16 = vmul.f32 1.442695, %v2980_v36  ;;  %v3408_v36 = vld [vmem:[#allocation3 + $0x48] sm:$0xff] }
 0xdc5   :  { %6658 = vpow2.f32 %v2981_v16  ;;  %v3407_v16 = vld [vmem:[#allocation3 + $0x40] sm:$0xff] }
 0xdd2   :  { %v6659_v31 = vpop.eup %6658 }
 0xdd3   :  { %v2983_v32 = vsel %vm373_vm2, %v6659_v31, 0.0 }
 0xdd4   :  { %v2984_v54 = vrot.slane %v2983_v32, 4 }
 0xdd6   :  { %v2985_v27 = vadd.f32 %v2984_v54, %v2983_v32 }
 0xdd8   :  { %v2986_v39 = vrot.slane %v2985_v27, 2 }
 0xdda   :  { %v2987_v3 = vadd.f32 %v2986_v39, %v2985_v27 }
 0xddc   :  { %v2988_v41 = vrot.slane %v2987_v3, 1 }
 0xdde   :  { %v2989_v5 = vadd.f32 %v2988_v41, %v2987_v3 }
 0xde0   :  { %6660 = vrcp.f32 %v2989_v5 }
 0xded   :  { %v6661_v6 = vpop.eup %6660 }
 0xdee   :  { %v2991_v23 = vmul.f32 %v6661_v6, %v6659_v31 }
 0xdf0   :  { %v2992_v9 = vsel %vm373_vm2, %v2991_v23, 0.0 }
 0xdf1   :  { %2993 = vadd.xlane.f32.xlu1 %v2992_v9 }
 0xe02   :  { %515 = vrot.lane.b32.xlu1 %v6998_v46, %s6728_s2  ;;  %v3147_v46 = vld [vmem:[#allocation2 + $0x168] sm:$0xff] }
 0xe06   :  { %517 = vrot.lane.b32.xlu1 %v6994_v45, %s6728_s2  ;;  %v3148_v45 = vld [vmem:[#allocation2 + $0x170] sm:$0xff] }
 0xe6c   :  { %v3142_v17 = vpop.f32.mrf.mxu1 }
 0xe6d   :  { %v3143_v35 = vadd.f32 %v3142_v17, %v7096_v18 }
 0xe6e   :  { %v6328_v56 = vpop.f32.mrf.mxu1 }
 0xe7a   :  { %v2994_v19 = vpop.xlane.xlu1 %2993 }
 0xe7b   :  { %v2995_v13 = vadd.f32 1e-08, %v2994_v19 }
 0xe7d   :  { %6662 = vrcp.f32 %v2995_v13 }
 0xe7e   :  { %v516_v21 = vpop.permute.xlu1 %515 }
 0xe7f   :  { %521 = vxpose.xlu1.b32.start [1/2] (short) (narrow) %v516_v21, 32 }
 0xe82   :  { %v518_v30 = vpop.permute.xlu1 %517 }
 0xe83   :  { %522 = vxpose.xlu1.b32.end [2/2] (short) (narrow) %v518_v30, 32 }
 0xe8a   :  { %v6663_v40 = vpop.eup %6662 }
 0xe8b   :  { %v2997_v42 = vmul.f32 %v6663_v40, %v2991_v23 }
 0xe8d   :  { %6316 = vmatmul.mubr.msk.f32.vlgmr.msra.gmra.mxu0 %vm373_vm2, %v2997_v42 }
 0xe8e   :  { %6330 = vmatpush3.msra.mxu0 %v3149_v37  ;;  %6337 = vmatprep.mubr.msk.f32.mxu0 %vm6727_vm1, %v6726_v25 }
 0xe8f   :  { %6331 = vmatprep.subr.mxu0 %v6726_v25 }
 0xe90   :  { %6332 = vmatpush3.msra.mxu0 %v3148_v45 }
 0xe91   :  { %6333 = vmatprep.subr.mxu0 %v6726_v25 }
 0xe92   :  { %6334 = vmatpush3.msra.mxu0 %v3147_v46 }
 0xe93   :  { %6335 = vmatprep.subr.mxu0 %v6726_v25 }
 0xe94   :  { %6336 = vmatpush3.msra.mxu0 %v3146_v43 }
 0xe95   :  { %6338 = vmatmul.mubr.msk.f32.vlgmr.msra.gmra.mxu0 %vm30_vm0, %v3143_v35  ;;  %6347 = vmatprep.subr.mxu0 %v6726_v25 }
 0xe96   :  { %6348 = vmatpush3.msra.mxu0 %v7334_v60  ;;  %6355 = vmatprep.mubr.msk.f32.mxu0 %vm6727_vm1, %v6726_v25 }
 0xe97   :  { %6349 = vmatprep.subr.mxu0 %v6726_v25 }
 0xe98   :  { %6350 = vmatpush3.msra.mxu0 %v7343_v63 }
 0xe99   :  { %6351 = vmatprep.subr.mxu0 %v6726_v25 }
 0xe9a   :  { %6352 = vmatpush3.msra.mxu0 %v7350_v33 }
 0xe9b   :  { %6353 = vmatprep.subr.mxu0 %v6726_v25 }
 0xe9c   :  { %6354 = vmatpush3.msra.mxu0 %v7357_v51 }
 0xe9d   :  { %6369 = vmatprep.subr.mxu0 %v6726_v25 }
 0xefb   :  { %v537_v42 = vpop.trf.xlu1 }
 0xefc   :  { %554 = vst.msk [vmem:[#allocation2 + $0x80] sm:$0xff] %vm373_vm2, %v537_v42 }
 0xeff   :  { %v538_v45 = vpop.trf.xlu1 }
 0xf00   :  { %555 = vst.msk [vmem:[#allocation2 + $0x88] sm:$0xff] %vm373_vm2, %v538_v45 }
 0xf03   :  { %v539_v46 = vpop.trf.xlu1 }
 0xf04   :  { %556 = vst.msk [vmem:[#allocation2 + $0x90] sm:$0xff] %vm373_vm2, %v539_v46 }
 0xf07   :  { %v540_v35 = vpop.trf.xlu1 }
 0xf08   :  { %557 = vst.msk [vmem:[#allocation2 + $0x98] sm:$0xff] %vm373_vm2, %v540_v35 }
 0xf4d   :  { %v3067_v18 = vpop.f32.mrf.mxu0 }
 0xf4e   :  { %v7506_v44 = vadd.f32 %v3067_v18, %v7410_v28 }
 0xf4f   :  { %v6317_v15 = vpop.f32.mrf.mxu0 }
 0xf50   :  { %3072 = vst.msk [vmem:[#allocation4 + $0x18] sm:$0xff] %vm30_vm0, %v7506_v44  ;;  %6356 = vmatmul.mubr.msk.f32.vlgmr.msra.gmra.mxu0 %vm30_vm0, %v7506_v44 }
 0xf51   :  { %6370 = vmatpush3.msra.mxu0 %v3408_v36  ;;  %6373 = vmatprep.mubr.msk.f32.mxu0 %vm6727_vm1, %v6726_v25 }
 0xf52   :  { %6371 = vmatprep.subr.mxu0 %v6726_v25 }
 0xf53   :  { %6372 = vmatpush3.msra.mxu0 %v3407_v16 }
 0xf54   :  { %6387 = vmatprep.subr.mxu0 %v6726_v25 }
 0xf55   :  { %v3221_v28 = vpop.f32.mrf.mxu0 }
 0xf56   :  { %v3225_v31 = vmul.f32 0.17677669, %v3221_v28 }
 0xf57   :  { %v6339_v32 = vpop.f32.mrf.mxu0  ;;  %v7516_v54 = vld [vmem:[#allocation4 + $0x18] sm:$0xff] }
 0xf58   :  { %v3226_v27 = vsel %vm373_vm2, %v3225_v31, -inf  ;;  %5598 = vst.msk [vmem:[%s8034_s6 + $0x18] sm:$0xff] %vm30_vm0, %v7516_v54 }
 0xf59   :  { %v3227_v39 = vrot.slane %v3226_v27, 4 }
 0xf5b   :  { %v3228_v3 = vmax.f32 %v3226_v27, %v3227_v39  ;;  %v3406_v27 = vld [vmem:[#allocation2 + $0x98] sm:$0xff] }
 0xf5d   :  { %v3229_v41 = vrot.slane %v3228_v3, 2 }
 0xf5f   :  { %v3230_v5 = vmax.f32 %v3228_v3, %v3229_v41  ;;  %v3403_v3 = vld [vmem:[#allocation2 + $0x80] sm:$0xff] }
 0xf61   :  { %v3231_v6 = vrot.slane %v3230_v5, 1 }
 0xf63   :  { %v3232_v23 = vmax.f32 %v3230_v5, %v3231_v6 }
 0xf65   :  { %v3233_v7 = vsub.f32 %v3225_v31, %v3232_v23  ;;  %v3661_v23 = vld [vmem:[#allocation3 + $0xc8] sm:$0xff] }
 0xf67   :  { %v3234_v9 = vmul.f32 1.442695, %v3233_v7  ;;  %v3660_v7 = vld [vmem:[#allocation3 + $0xc0] sm:$0xff] }
 0xf69   :  { %6664 = vpow2.f32 %v3234_v9 }
 0xf76   :  { %v6665_v58 = vpop.eup %6664 }
 0xf77   :  { %v3236_v11 = vsel %vm373_vm2, %v6665_v58, 0.0 }
 0xf78   :  { %v3237_v12 = vrot.slane %v3236_v11, 4 }
 0xf7a   :  { %v3238_v17 = vadd.f32 %v3237_v12, %v3236_v11 }
 0xf7c   :  { %v3239_v56 = vrot.slane %v3238_v17, 2 }
 0xf7e   :  { %v3240_v19 = vadd.f32 %v3239_v56, %v3238_v17 }
 0xf80   :  { %v3241_v13 = vrot.slane %v3240_v19, 1 }
 0xf82   :  { %v3242_v21 = vadd.f32 %v3241_v13, %v3240_v19 }
 0xf84   :  { %6666 = vrcp.f32 %v3242_v21 }
 0xf91   :  { %v6667_v30 = vpop.eup %6666 }
 0xf92   :  { %v3244_v40 = vmul.f32 %v6667_v30, %v6665_v58 }
 0xf94   :  { %v3245_v37 = vsel %vm373_vm2, %v3244_v40, 0.0 }
 0xf95   :  { %3246 = vadd.xlane.f32.xlu0 %v3245_v37 }
 0xfab   :  { %1105 = vrot.lane.b32.xlu0 %v7034_v57, %s6728_s2  ;;  %v3404_v57 = vld [vmem:[#allocation2 + $0x88] sm:$0xff] }
 0xfaf   :  { %1107 = vrot.lane.b32.xlu0 %v7026_v55, %s6728_s2  ;;  %v3405_v55 = vld [vmem:[#allocation2 + $0x90] sm:$0xff] }
0x1010   :  { %v3399_v43 = vpop.f32.mrf.mxu0 }
0x1011   :  { %v3400_v39 = vadd.f32 %v3399_v43, %v7098_v20 }
0x1012   :  { %v6357_v18 = vpop.f32.mrf.mxu0 }
0x101e   :  { %v3247_v15 = vpop.xlane.xlu0 %3246 }
0x101f   :  { %v3248_v36 = vadd.f32 1e-08, %v3247_v15 }
0x1021   :  { %6668 = vrcp.f32 %v3248_v36 }
0x1022   :  { %v1106_v16 = vpop.permute.xlu0 %1105 }
0x1023   :  { %1111 = vxpose.xlu0.b32.start [1/2] (short) (narrow) %v1106_v16, 32 }
0x1026   :  { %v1108_v28 = vpop.permute.xlu0 %1107 }
0x1027   :  { %1112 = vxpose.xlu0.b32.end [2/2] (short) (narrow) %v1108_v28, 32 }
0x102e   :  { %v6669_v31 = vpop.eup %6668 }
0x102f   :  { %v3250_v32 = vmul.f32 %v6669_v31, %v3244_v40 }
0x1031   :  { %6345 = vmatmul.mubr.msk.f32.vlgmr.msra.gmra.mxu1 %vm373_vm2, %v3250_v32 }
0x1032   :  { %6359 = vmatpush3.msra.mxu1 %v3406_v27  ;;  %6366 = vmatprep.mubr.msk.f32.mxu1 %vm6727_vm1, %v6726_v25 }
0x1033   :  { %6360 = vmatprep.subr.mxu1 %v6726_v25 }
0x1034   :  { %6361 = vmatpush3.msra.mxu1 %v3405_v55 }
0x1035   :  { %6362 = vmatprep.subr.mxu1 %v6726_v25 }
0x1036   :  { %6363 = vmatpush3.msra.mxu1 %v3404_v57 }
0x1037   :  { %6364 = vmatprep.subr.mxu1 %v6726_v25 }
0x1038   :  { %6365 = vmatpush3.msra.mxu1 %v3403_v3 }
0x1039   :  { %6367 = vmatmul.mubr.msk.f32.vlgmr.msra.gmra.mxu1 %vm30_vm0, %v3400_v39  ;;  %6376 = vmatprep.subr.mxu1 %v6726_v25 }
0x103a   :  { %6377 = vmatpush3.msra.mxu1 %v7334_v60  ;;  %6384 = vmatprep.mubr.msk.f32.mxu1 %vm6727_vm1, %v6726_v25 }
0x103b   :  { %6378 = vmatprep.subr.mxu1 %v6726_v25 }
0x103c   :  { %6379 = vmatpush3.msra.mxu1 %v7343_v63 }
0x103d   :  { %6380 = vmatprep.subr.mxu1 %v6726_v25 }
0x103e   :  { %6381 = vmatpush3.msra.mxu1 %v7350_v33 }
0x103f   :  { %6382 = vmatprep.subr.mxu1 %v6726_v25 }
0x1040   :  { %6383 = vmatpush3.msra.mxu1 %v7357_v51 }
0x1041   :  { %6398 = vmatprep.subr.mxu1 %v6726_v25 }
0x109f   :  { %v1127_v31 = vpop.trf.xlu0 }
0x10a0   :  { %1144 = vst.msk [vmem:[#allocation2 + $0x180] sm:$0xff] %vm373_vm2, %v1127_v31 }
0x10a3   :  { %v1128_v27 = vpop.trf.xlu0 }
0x10a4   :  { %1145 = vst.msk [vmem:[#allocation2 + $0x188] sm:$0xff] %vm373_vm2, %v1128_v27 }
0x10a7   :  { %v1129_v55 = vpop.trf.xlu0 }
0x10a8   :  { %1146 = vst.msk [vmem:[#allocation2 + $0x190] sm:$0xff] %vm373_vm2, %v1129_v55 }
0x10ab   :  { %v1130_v57 = vpop.trf.xlu0 }
0x10ac   :  { %1147 = vst.msk [vmem:[#allocation2 + $0x198] sm:$0xff] %vm373_vm2, %v1130_v57 }
0x10f1   :  { %v3320_v41 = vpop.f32.mrf.mxu1 }
0x10f2   :  { %v7554_v5 = vadd.f32 %v3320_v41, %v7458_v14 }
0x10f3   :  { %v6346_v6 = vpop.f32.mrf.mxu1 }
0x10f4   :  { %3325 = vst.msk [vmem:[#allocation4 + $0x58] sm:$0xff] %vm30_vm0, %v7554_v5  ;;  %6385 = vmatmul.mubr.msk.f32.vlgmr.msra.gmra.mxu1 %vm30_vm0, %v7554_v5 }
0x10f5   :  { %6399 = vmatpush3.msra.mxu1 %v3661_v23  ;;  %6402 = vmatprep.mubr.msk.f32.mxu1 %vm6727_vm1, %v6726_v25 }
0x10f6   :  { %6400 = vmatprep.subr.mxu1 %v6726_v25 }
0x10f7   :  { %6401 = vmatpush3.msra.mxu1 %v3660_v7 }
0x10f8   :  { %6416 = vmatprep.subr.mxu1 %v6726_v25 }
0x10f9   :  { %v3478_v14 = vpop.f32.mrf.mxu1 }
0x10fa   :  { %v3482_v9 = vmul.f32 0.17677669, %v3478_v14 }
0x10fb   :  { %v6368_v58 = vpop.f32.mrf.mxu1  ;;  %v7564_v11 = vld [vmem:[#allocation4 + $0x58] sm:$0xff] }
0x10fc   :  { %v3483_v12 = vsel %vm373_vm2, %v3482_v9, -inf  ;;  %5754 = vst.msk [vmem:[%s8034_s6 + $0x58] sm:$0xff] %vm30_vm0, %v7564_v11  ;;  %v3659_v58 = vld [vmem:[#allocation2 + $0x198] sm:$0xff] }
0x10fd   :  { %v3484_v17 = vrot.slane %v3483_v12, 4 }
0x10ff   :  { %v3485_v56 = vmax.f32 %v3483_v12, %v3484_v17  ;;  %v3656_v17 = vld [vmem:[#allocation2 + $0x180] sm:$0xff] }
0x1101   :  { %v3486_v19 = vrot.slane %v3485_v56, 2 }
0x1103   :  { %v3487_v13 = vmax.f32 %v3485_v56, %v3486_v19 }
0x1105   :  { %v3488_v21 = vrot.slane %v3487_v13, 1 }
0x1107   :  { %v3489_v30 = vmax.f32 %v3487_v13, %v3488_v21 }
0x1109   :  { %v3490_v40 = vsub.f32 %v3482_v9, %v3489_v30 }
0x110b   :  { %v3491_v42 = vmul.f32 1.442695, %v3490_v40 }
0x110d   :  { %6670 = vpow2.f32 %v3491_v42 }
0x111a   :  { %v6671_v37 = vpop.eup %6670 }
0x111b   :  { %v3493_v45 = vsel %vm373_vm2, %v6671_v37, 0.0 }
0x111c   :  { %v3494_v46 = vrot.slane %v3493_v45, 4 }
0x111e   :  { %v3495_v35 = vadd.f32 %v3494_v46, %v3493_v45 }
0x1120   :  { %v3496_v43 = vrot.slane %v3495_v35, 2 }
0x1122   :  { %v3497_v18 = vadd.f32 %v3496_v43, %v3495_v35 }
0x1124   :  { %v3498_v15 = vrot.slane %v3497_v18, 1 }
0x1126   :  { %v3499_v36 = vadd.f32 %v3498_v15, %v3497_v18 }
0x1128   :  { %6672 = vrcp.f32 %v3499_v36 }
0x1135   :  { %v6673_v16 = vpop.eup %6672 }
0x1136   :  { %v3501_v28 = vmul.f32 %v6673_v16, %v6671_v37 }
0x1138   :  { %v3502_v32 = vsel %vm373_vm2, %v3501_v28, 0.0 }
0x1139   :  { %3503 = vadd.xlane.f32.xlu1 %v3502_v32 }
0x114a   :  { %560 = vrot.lane.b32.xlu1 %v7006_v48, %s6728_s2  ;;  %v3657_v48 = vld [vmem:[#allocation2 + $0x188] sm:$0xff] }
0x114e   :  { %562 = vrot.lane.b32.xlu1 %v7002_v47, %s6728_s2  ;;  %v3658_v47 = vld [vmem:[#allocation2 + $0x190] sm:$0xff] }
0x11b4   :  { %v3652_v39 = vpop.f32.mrf.mxu1 }
0x11b5   :  { %v3653_v12 = vadd.f32 %v3652_v39, %v7098_v20 }
0x11b6   :  { %v6386_v3 = vpop.f32.mrf.mxu1 }
0x11c2   :  { %v3504_v41 = vpop.xlane.xlu1 %3503 }
0x11c3   :  { %v3505_v6 = vadd.f32 1e-08, %v3504_v41 }
0x11c5   :  { %6674 = vrcp.f32 %v3505_v6 }
0x11c6   :  { %v561_v23 = vpop.permute.xlu1 %560 }
0x11c7   :  { %566 = vxpose.xlu1.b32.start [1/2] (short) (narrow) %v561_v23, 32 }
0x11ca   :  { %v563_v7 = vpop.permute.xlu1 %562 }
0x11cb   :  { %567 = vxpose.xlu1.b32.end [2/2] (short) (narrow) %v563_v7, 32 }
0x11d2   :  { %v6675_v14 = vpop.eup %6674 }
0x11d3   :  { %v3507_v9 = vmul.f32 %v6675_v14, %v3501_v28 }
0x11d5   :  { %6374 = vmatmul.mubr.msk.f32.vlgmr.msra.gmra.mxu0 %vm373_vm2, %v3507_v9 }
0x11d6   :  { %6388 = vmatpush3.msra.mxu0 %v3659_v58  ;;  %6395 = vmatprep.mubr.msk.f32.mxu0 %vm6727_vm1, %v6726_v25 }
0x11d7   :  { %6389 = vmatprep.subr.mxu0 %v6726_v25 }
0x11d8   :  { %6390 = vmatpush3.msra.mxu0 %v3658_v47 }
0x11d9   :  { %6391 = vmatprep.subr.mxu0 %v6726_v25 }
0x11da   :  { %6392 = vmatpush3.msra.mxu0 %v3657_v48 }
0x11db   :  { %6393 = vmatprep.subr.mxu0 %v6726_v25 }
0x11dc   :  { %6394 = vmatpush3.msra.mxu0 %v3656_v17 }
0x11dd   :  { %6396 = vmatmul.mubr.msk.f32.vlgmr.msra.gmra.mxu0 %vm30_vm0, %v3653_v12  ;;  %6405 = vmatprep.subr.mxu0 %v6726_v25 }
0x11de   :  { %6406 = vmatpush3.msra.mxu0 %v7334_v60  ;;  %6413 = vmatprep.mubr.msk.f32.mxu0 %vm6727_vm1, %v6726_v25 }
0x11df   :  { %6407 = vmatprep.subr.mxu0 %v6726_v25 }
0x11e0   :  { %6408 = vmatpush3.msra.mxu0 %v7343_v63  ;;  %v3918_v63 = vld [vmem:[#allocation3 + $0x58] sm:$0xff] }
0x11e1   :  { %6409 = vmatprep.subr.mxu0 %v6726_v25 }
0x11e2   :  { %6410 = vmatpush3.msra.mxu0 %v7350_v33  ;;  %v3917_v33 = vld [vmem:[#allocation3 + $0x50] sm:$0xff] }
0x11e3   :  { %6411 = vmatprep.subr.mxu0 %v6726_v25 }
0x11e4   :  { %6412 = vmatpush3.msra.mxu0 %v7357_v51 }
0x11e5   :  { %6427 = vmatprep.subr.mxu0 %v6726_v25 }
0x1243   :  { %v582_v39 = vpop.trf.xlu1 }
0x1244   :  { %599 = vst.msk [vmem:[#allocation2 + $0xa0] sm:$0xff] %vm373_vm2, %v582_v39 }
0x1247   :  { %v583_v41 = vpop.trf.xlu1 }
0x1248   :  { %600 = vst.msk [vmem:[#allocation2 + $0xa8] sm:$0xff] %vm373_vm2, %v583_v41 }
0x124b   :  { %v584_v6 = vpop.trf.xlu1 }
0x124c   :  { %601 = vst.msk [vmem:[#allocation2 + $0xb0] sm:$0xff] %vm373_vm2, %v584_v6 }
0x124f   :  { %v585_v23 = vpop.trf.xlu1 }
0x1250   :  { %602 = vst.msk [vmem:[#allocation2 + $0xb8] sm:$0xff] %vm373_vm2, %v585_v23 }
0x1295   :  { %v3577_v20 = vpop.f32.mrf.mxu0 }
0x1296   :  { %v7602_v60 = vadd.f32 %v3577_v20, %v7506_v44  ;;  %v3916_v20 = vld [vmem:[#allocation2 + $0xb8] sm:$0xff] }
0x1297   :  { %v6375_v56 = vpop.f32.mrf.mxu0 }
0x1298   :  { %3582 = vst.msk [vmem:[#allocation4 + $0x20] sm:$0xff] %vm30_vm0, %v7602_v60  ;;  %6414 = vmatmul.mubr.msk.f32.vlgmr.msra.gmra.mxu0 %vm30_vm0, %v7602_v60 }
0x1299   :  { %6428 = vmatpush3.msra.mxu0 %v3918_v63  ;;  %6431 = vmatprep.mubr.msk.f32.mxu0 %vm6727_vm1, %v6726_v25  ;;  %v3913_v63 = vld [vmem:[#allocation2 + $0xa0] sm:$0xff] }
0x129a   :  { %6429 = vmatprep.subr.mxu0 %v6726_v25 }
0x129b   :  { %6430 = vmatpush3.msra.mxu0 %v3917_v33  ;;  %v7642_v33 = vld [vmem:[%s8031_s3 + $0x18] sm:$0xff] }
0x129c   :  { %6445 = vmatprep.subr.mxu0 %v6726_v25 }
0x129d   :  { %v3731_v51 = vpop.f32.mrf.mxu0 }
0x129e   :  { %v3735_v44 = vmul.f32 0.17677669, %v3731_v51  ;;  %v7651_v51 = vld [vmem:[%s8031_s3 + $0x10] sm:$0xff] }
0x129f   :  { %v6397_v19 = vpop.f32.mrf.mxu0  ;;  %v7612_v13 = vld [vmem:[#allocation4 + $0x20] sm:$0xff] }
0x12a0   :  { %v3736_v21 = vsel %vm373_vm2, %v3735_v44, -inf  ;;  %5599 = vst.msk [vmem:[%s8034_s6 + $0x20] sm:$0xff] %vm30_vm0, %v7612_v13  ;;  %v7665_v19 = vld [vmem:[%s8031_s3] sm:$0xff] }
0x12a1   :  { %v3737_v30 = vrot.slane %v3736_v21, 4 }
0x12a3   :  { %v3738_v40 = vmax.f32 %v3736_v21, %v3737_v30 }
0x12a5   :  { %v3739_v42 = vrot.slane %v3738_v40, 2 }
0x12a7   :  { %v3740_v37 = vmax.f32 %v3738_v40, %v3739_v42  ;;  %v4171_v42 = vld [vmem:[#allocation3 + $0xd8] sm:$0xff] }
0x12a9   :  { %v3741_v45 = vrot.slane %v3740_v37, 1 }
0x12ab   :  { %v3742_v46 = vmax.f32 %v3740_v37, %v3741_v45  ;;  %v4170_v37 = vld [vmem:[#allocation3 + $0xd0] sm:$0xff] }
0x12ad   :  { %v3743_v35 = vsub.f32 %v3735_v44, %v3742_v46  ;;  %v7658_v44 = vld [vmem:[%s8031_s3 + $0x8] sm:$0xff] }
0x12af   :  { %v3744_v43 = vmul.f32 1.442695, %v3743_v35 }
0x12b1   :  { %6676 = vpow2.f32 %v3744_v43 }
0x12be   :  { %v6677_v18 = vpop.eup %6676 }
0x12bf   :  { %v3746_v15 = vsel %vm373_vm2, %v6677_v18, 0.0 }
0x12c0   :  { %v3747_v36 = vrot.slane %v3746_v15, 4 }
0x12c2   :  { %v3748_v16 = vadd.f32 %v3747_v36, %v3746_v15 }
0x12c4   :  { %v3749_v28 = vrot.slane %v3748_v16, 2 }
0x12c6   :  { %v3750_v31 = vadd.f32 %v3749_v28, %v3748_v16 }
0x12c8   :  { %v3751_v32 = vrot.slane %v3750_v31, 1 }
0x12ca   :  { %v3752_v27 = vadd.f32 %v3751_v32, %v3750_v31 }
0x12cc   :  { %6678 = vrcp.f32 %v3752_v27 }
0x12d9   :  { %v6679_v55 = vpop.eup %6678 }
0x12da   :  { %v3754_v57 = vmul.f32 %v6679_v55, %v6677_v18 }
0x12dc   :  { %v3755_v3 = vsel %vm373_vm2, %v3754_v57, 0.0 }
0x12dd   :  { %3756 = vadd.xlane.f32.xlu0 %v3755_v3 }
0x12f3   :  { %1150 = vrot.lane.b32.xlu0 %v7050_v61, %s6728_s2  ;;  %v3914_v61 = vld [vmem:[#allocation2 + $0xa8] sm:$0xff] }
0x12f7   :  { %1152 = vrot.lane.b32.xlu0 %v7042_v59, %s6728_s2  ;;  %v3915_v59 = vld [vmem:[#allocation2 + $0xb0] sm:$0xff] }
0x1358   :  { %v3909_v7 = vpop.f32.mrf.mxu0 }
0x1359   :  { %v3910_v56 = vadd.f32 %v3909_v7, %v7100_v22 }
0x135a   :  { %v6415_v14 = vpop.f32.mrf.mxu0 }
0x1366   :  { %v3757_v9 = vpop.xlane.xlu0 %3756 }
0x1367   :  { %v3758_v58 = vadd.f32 1e-08, %v3757_v9 }
0x1369   :  { %6680 = vrcp.f32 %v3758_v58 }
0x136a   :  { %v1151_v47 = vpop.permute.xlu0 %1150 }
0x136b   :  { %1156 = vxpose.xlu0.b32.start [1/2] (short) (narrow) %v1151_v47, 32 }
0x136e   :  { %v1153_v48 = vpop.permute.xlu0 %1152 }
0x136f   :  { %1157 = vxpose.xlu0.b32.end [2/2] (short) (narrow) %v1153_v48, 32 }
0x1376   :  { %v6681_v12 = vpop.eup %6680 }
0x1377   :  { %v3760_v17 = vmul.f32 %v6681_v12, %v3754_v57 }
0x1379   :  { %6403 = vmatmul.mubr.msk.f32.vlgmr.msra.gmra.mxu1 %vm373_vm2, %v3760_v17 }
0x137a   :  { %6417 = vmatpush3.msra.mxu1 %v3916_v20  ;;  %6424 = vmatprep.mubr.msk.f32.mxu1 %vm6727_vm1, %v6726_v25 }
0x137b   :  { %6418 = vmatprep.subr.mxu1 %v6726_v25 }
0x137c   :  { %6419 = vmatpush3.msra.mxu1 %v3915_v59 }
0x137d   :  { %6420 = vmatprep.subr.mxu1 %v6726_v25 }
0x137e   :  { %6421 = vmatpush3.msra.mxu1 %v3914_v61 }
0x137f   :  { %6422 = vmatprep.subr.mxu1 %v6726_v25 }
0x1380   :  { %6423 = vmatpush3.msra.mxu1 %v3913_v63 }
0x1381   :  { %6425 = vmatmul.mubr.msk.f32.vlgmr.msra.gmra.mxu1 %vm30_vm0, %v3910_v56  ;;  %6434 = vmatprep.subr.mxu1 %v6726_v25 }
0x1382   :  { %6435 = vmatpush3.msra.mxu1 %v7642_v33  ;;  %6442 = vmatprep.mubr.msk.f32.mxu1 %vm6727_vm1, %v6726_v25 }
0x1383   :  { %6436 = vmatprep.subr.mxu1 %v6726_v25 }
0x1384   :  { %6437 = vmatpush3.msra.mxu1 %v7651_v51 }
0x1385   :  { %6438 = vmatprep.subr.mxu1 %v6726_v25 }
0x1386   :  { %6439 = vmatpush3.msra.mxu1 %v7658_v44 }
0x1387   :  { %6440 = vmatprep.subr.mxu1 %v6726_v25 }
0x1388   :  { %6441 = vmatpush3.msra.mxu1 %v7665_v19 }
0x1389   :  { %6456 = vmatprep.subr.mxu1 %v6726_v25 }
0x13e7   :  { %v1172_v58 = vpop.trf.xlu0 }
0x13e8   :  { %1189 = vst.msk [vmem:[#allocation2 + $0x1a0] sm:$0xff] %vm373_vm2, %v1172_v58 }
0x13eb   :  { %v1173_v48 = vpop.trf.xlu0 }
0x13ec   :  { %1190 = vst.msk [vmem:[#allocation2 + $0x1a8] sm:$0xff] %vm373_vm2, %v1173_v48 }
0x13ef   :  { %v1174_v12 = vpop.trf.xlu0 }
0x13f0   :  { %1191 = vst.msk [vmem:[#allocation2 + $0x1b0] sm:$0xff] %vm373_vm2, %v1174_v12 }
0x13f3   :  { %v1175_v17 = vpop.trf.xlu0 }
0x13f4   :  { %1192 = vst.msk [vmem:[#allocation2 + $0x1b8] sm:$0xff] %vm373_vm2, %v1175_v17 }
0x1439   :  { %v3830_v21 = vpop.f32.mrf.mxu1 }
0x143a   :  { %v7670_v30 = vadd.f32 %v3830_v21, %v7554_v5 }
0x143b   :  { %v6404_v40 = vpop.f32.mrf.mxu1 }
0x143c   :  { %3835 = vst.msk [vmem:[#allocation4 + $0x60] sm:$0xff] %vm30_vm0, %v7670_v30  ;;  %6443 = vmatmul.mubr.msk.f32.vlgmr.msra.gmra.mxu1 %vm30_vm0, %v7670_v30 }
0x143d   :  { %6457 = vmatpush3.msra.mxu1 %v4171_v42  ;;  %6460 = vmatprep.mubr.msk.f32.mxu1 %vm6727_vm1, %v6726_v25 }
0x143e   :  { %6458 = vmatprep.subr.mxu1 %v6726_v25 }
0x143f   :  { %6459 = vmatpush3.msra.mxu1 %v4170_v37  ;;  %v4169_v37 = vld [vmem:[#allocation2 + $0x1b8] sm:$0xff] }
0x1440   :  { %6474 = vmatprep.subr.mxu1 %v6726_v25 }
0x1441   :  { %v3988_v5 = vpop.f32.mrf.mxu1 }
0x1442   :  { %v3992_v45 = vmul.f32 0.17677669, %v3988_v5 }
0x1443   :  { %v6426_v46 = vpop.f32.mrf.mxu1  ;;  %v7680_v35 = vld [vmem:[#allocation4 + $0x60] sm:$0xff] }
0x1444   :  { %v3993_v43 = vsel %vm373_vm2, %v3992_v45, -inf  ;;  %5755 = vst.msk [vmem:[%s8034_s6 + $0x60] sm:$0xff] %vm30_vm0, %v7680_v35 }
0x1445   :  { %v3994_v18 = vrot.slane %v3993_v43, 4 }
0x1447   :  { %v3995_v15 = vmax.f32 %v3993_v43, %v3994_v18  ;;  %v4428_v18 = vld [vmem:[#allocation3 + $0x68] sm:$0xff] }
0x1449   :  { %v3996_v36 = vrot.slane %v3995_v15, 2 }
0x144b   :  { %v3997_v16 = vmax.f32 %v3995_v15, %v3996_v36  ;;  %v4427_v15 = vld [vmem:[#allocation3 + $0x60] sm:$0xff] }
0x144d   :  { %v3998_v28 = vrot.slane %v3997_v16, 1 }
0x144f   :  { %v3999_v31 = vmax.f32 %v3997_v16, %v3998_v28 }
0x1451   :  { %v4000_v32 = vsub.f32 %v3992_v45, %v3999_v31  ;;  %v4166_v45 = vld [vmem:[#allocation2 + $0x1a0] sm:$0xff] }
0x1453   :  { %v4001_v27 = vmul.f32 1.442695, %v4000_v32 }
0x1455   :  { %6682 = vpow2.f32 %v4001_v27 }
0x1462   :  { %v6683_v55 = vpop.eup %6682 }
0x1463   :  { %v4003_v57 = vsel %vm373_vm2, %v6683_v55, 0.0 }
0x1464   :  { %v4004_v39 = vrot.slane %v4003_v57, 4 }
0x1466   :  { %v4005_v3 = vadd.f32 %v4004_v39, %v4003_v57 }
0x1468   :  { %v4006_v41 = vrot.slane %v4005_v3, 2 }
0x146a   :  { %v4007_v6 = vadd.f32 %v4006_v41, %v4005_v3 }
0x146c   :  { %v4008_v23 = vrot.slane %v4007_v6, 1 }
0x146e   :  { %v4009_v7 = vadd.f32 %v4008_v23, %v4007_v6 }
0x1470   :  { %6684 = vrcp.f32 %v4009_v7 }
0x147d   :  { %v6685_v14 = vpop.eup %6684 }
0x147e   :  { %v4011_v9 = vmul.f32 %v6685_v14, %v6683_v55 }
0x1480   :  { %v4012_v47 = vsel %vm373_vm2, %v4011_v9, 0.0 }
0x1481   :  { %4013 = vadd.xlane.f32.xlu1 %v4012_v47 }
0x1492   :  { %605 = vrot.lane.b32.xlu1 %v7014_v50, %s6728_s2  ;;  %v4167_v50 = vld [vmem:[#allocation2 + $0x1a8] sm:$0xff] }
0x1496   :  { %607 = vrot.lane.b32.xlu1 %v7010_v49, %s6728_s2  ;;  %v4168_v49 = vld [vmem:[#allocation2 + $0x1b0] sm:$0xff] }
0x14fc   :  { %v4162_v20 = vpop.f32.mrf.mxu1 }
0x14fd   :  { %v4163_v5 = vadd.f32 %v4162_v20, %v7100_v22 }
0x14fe   :  { %v6444_v59 = vpop.f32.mrf.mxu1 }
0x150a   :  { %v4014_v61 = vpop.xlane.xlu1 %4013 }
0x150b   :  { %v4015_v56 = vadd.f32 1e-08, %v4014_v61 }
0x150d   :  { %6686 = vrcp.f32 %v4015_v56 }
0x150e   :  { %v606_v63 = vpop.permute.xlu1 %605 }
0x150f   :  { %611 = vxpose.xlu1.b32.start [1/2] (short) (narrow) %v606_v63, 32 }
0x1512   :  { %v608_v21 = vpop.permute.xlu1 %607 }
0x1513   :  { %612 = vxpose.xlu1.b32.end [2/2] (short) (narrow) %v608_v21, 32 }
0x151a   :  { %v6687_v40 = vpop.eup %6686 }
0x151b   :  { %v4017_v42 = vmul.f32 %v6687_v40, %v4011_v9 }
0x151d   :  { %6432 = vmatmul.mubr.msk.f32.vlgmr.msra.gmra.mxu0 %vm373_vm2, %v4017_v42 }
0x151e   :  { %6446 = vmatpush3.msra.mxu0 %v4169_v37  ;;  %6453 = vmatprep.mubr.msk.f32.mxu0 %vm6727_vm1, %v6726_v25 }
0x151f   :  { %6447 = vmatprep.subr.mxu0 %v6726_v25 }
0x1520   :  { %6448 = vmatpush3.msra.mxu0 %v4168_v49 }
0x1521   :  { %6449 = vmatprep.subr.mxu0 %v6726_v25 }
0x1522   :  { %6450 = vmatpush3.msra.mxu0 %v4167_v50 }
0x1523   :  { %6451 = vmatprep.subr.mxu0 %v6726_v25 }
0x1524   :  { %6452 = vmatpush3.msra.mxu0 %v4166_v45 }
0x1525   :  { %6454 = vmatmul.mubr.msk.f32.vlgmr.msra.gmra.mxu0 %vm30_vm0, %v4163_v5  ;;  %6463 = vmatprep.subr.mxu0 %v6726_v25 }
0x1526   :  { %6464 = vmatpush3.msra.mxu0 %v7642_v33  ;;  %6471 = vmatprep.mubr.msk.f32.mxu0 %vm6727_vm1, %v6726_v25 }
0x1527   :  { %6465 = vmatprep.subr.mxu0 %v6726_v25 }
0x1528   :  { %6466 = vmatpush3.msra.mxu0 %v7651_v51 }
0x1529   :  { %6467 = vmatprep.subr.mxu0 %v6726_v25 }
0x152a   :  { %6468 = vmatpush3.msra.mxu0 %v7658_v44 }
0x152b   :  { %6469 = vmatprep.subr.mxu0 %v6726_v25 }
0x152c   :  { %6470 = vmatpush3.msra.mxu0 %v7665_v19 }
0x152d   :  { %6485 = vmatprep.subr.mxu0 %v6726_v25 }
0x158b   :  { %v627_v59 = vpop.trf.xlu1 }
0x158c   :  { %644 = vst.msk [vmem:[#allocation2 + $0xc0] sm:$0xff] %vm373_vm2, %v627_v59 }
0x158f   :  { %v628_v56 = vpop.trf.xlu1 }
0x1590   :  { %645 = vst.msk [vmem:[#allocation2 + $0xc8] sm:$0xff] %vm373_vm2, %v628_v56 }
0x1593   :  { %v629_v63 = vpop.trf.xlu1 }
0x1594   :  { %646 = vst.msk [vmem:[#allocation2 + $0xd0] sm:$0xff] %vm373_vm2, %v629_v63 }
0x1597   :  { %v630_v21 = vpop.trf.xlu1 }
0x1598   :  { %647 = vst.msk [vmem:[#allocation2 + $0xd8] sm:$0xff] %vm373_vm2, %v630_v21 }
0x15dd   :  { %v4087_v22 = vpop.f32.mrf.mxu0 }
0x15de   :  { %v7718_v46 = vadd.f32 %v4087_v22, %v7602_v60 }
0x15df   :  { %v6433_v43 = vpop.f32.mrf.mxu0 }
0x15e0   :  { %4092 = vst.msk [vmem:[#allocation4 + $0x28] sm:$0xff] %vm30_vm0, %v7718_v46  ;;  %6472 = vmatmul.mubr.msk.f32.vlgmr.msra.gmra.mxu0 %vm30_vm0, %v7718_v46  ;;  %v4426_v43 = vld [vmem:[#allocation2 + $0xd8] sm:$0xff] }
0x15e1   :  { %6486 = vmatpush3.msra.mxu0 %v4428_v18  ;;  %6489 = vmatprep.mubr.msk.f32.mxu0 %vm6727_vm1, %v6726_v25 }
0x15e2   :  { %6487 = vmatprep.subr.mxu0 %v6726_v25 }
0x15e3   :  { %6488 = vmatpush3.msra.mxu0 %v4427_v15  ;;  %v4423_v15 = vld [vmem:[#allocation2 + $0xc0] sm:$0xff] }
0x15e4   :  { %6503 = vmatprep.subr.mxu0 %v6726_v25 }
0x15e5   :  { %v4241_v60 = vpop.f32.mrf.mxu0 }
0x15e6   :  { %v4245_v36 = vmul.f32 0.17677669, %v4241_v60 }
0x15e7   :  { %v6455_v16 = vpop.f32.mrf.mxu0  ;;  %v7728_v28 = vld [vmem:[#allocation4 + $0x28] sm:$0xff] }
0x15e8   :  { %v4246_v31 = vsel %vm373_vm2, %v4245_v36, -inf  ;;  %5600 = vst.msk [vmem:[%s8034_s6 + $0x28] sm:$0xff] %vm30_vm0, %v7728_v28 }
0x15e9   :  { %v4247_v32 = vrot.slane %v4246_v31, 4 }
0x15eb   :  { %v4248_v27 = vmax.f32 %v4246_v31, %v4247_v32  ;;  %v4681_v31 = vld [vmem:[#allocation3 + $0xe8] sm:$0xff]  ;;  %v4680_v32 = vld [vmem:[#allocation3 + $0xe0] sm:$0xff] }
0x15ed   :  { %v4249_v55 = vrot.slane %v4248_v27, 2 }
0x15ef   :  { %v4250_v57 = vmax.f32 %v4248_v27, %v4249_v55 }
0x15f1   :  { %v4251_v39 = vrot.slane %v4250_v57, 1 }
0x15f3   :  { %v4252_v3 = vmax.f32 %v4250_v57, %v4251_v39 }
0x15f5   :  { %v4253_v41 = vsub.f32 %v4245_v36, %v4252_v3 }
0x15f7   :  { %v4254_v6 = vmul.f32 1.442695, %v4253_v41 }
0x15f9   :  { %6688 = vpow2.f32 %v4254_v6 }
0x1606   :  { %v6689_v23 = vpop.eup %6688 }
0x1607   :  { %v4256_v7 = vsel %vm373_vm2, %v6689_v23, 0.0 }
0x1608   :  { %v4257_v14 = vrot.slane %v4256_v7, 4 }
0x160a   :  { %v4258_v9 = vadd.f32 %v4257_v14, %v4256_v7 }
0x160c   :  { %v4259_v58 = vrot.slane %v4258_v9, 2 }
0x160e   :  { %v4260_v47 = vadd.f32 %v4259_v58, %v4258_v9 }
0x1610   :  { %v4261_v48 = vrot.slane %v4260_v47, 1 }
0x1612   :  { %v4262_v12 = vadd.f32 %v4261_v48, %v4260_v47 }
0x1614   :  { %6690 = vrcp.f32 %v4262_v12 }
0x1621   :  { %v6691_v17 = vpop.eup %6690 }
0x1622   :  { %v4264_v20 = vmul.f32 %v6691_v17, %v6689_v23 }
0x1624   :  { %v4265_v61 = vsel %vm373_vm2, %v4264_v20, 0.0 }
0x1625   :  { %4266 = vadd.xlane.f32.xlu0 %v4265_v61 }
0x163b   :  { %1195 = vrot.lane.b32.xlu0 %v7069_v2, %s6728_s2  ;;  %v4424_v2 = vld [vmem:[#allocation2 + $0xc8] sm:$0xff] }
0x163f   :  { %1197 = vrot.lane.b32.xlu0 %v7061_v0, %s6728_s2  ;;  %v4425_v0 = vld [vmem:[#allocation2 + $0xd0] sm:$0xff] }
0x16a0   :  { %v4419_v40 = vpop.f32.mrf.mxu0 }
0x16a1   :  { %v4420_v18 = vadd.f32 %v4419_v40, %v7102_v24 }
0x16a2   :  { %v6473_v42 = vpop.f32.mrf.mxu0 }
0x16ae   :  { %v4267_v37 = vpop.xlane.xlu0 %4266 }
0x16af   :  { %v4268_v49 = vadd.f32 1e-08, %v4267_v37 }
0x16b1   :  { %6692 = vrcp.f32 %v4268_v49 }
0x16b2   :  { %v1196_v50 = vpop.permute.xlu0 %1195 }
0x16b3   :  { %1201 = vxpose.xlu0.b32.start [1/2] (short) (narrow) %v1196_v50, 32 }
0x16b6   :  { %v1198_v5 = vpop.permute.xlu0 %1197 }
0x16b7   :  { %1202 = vxpose.xlu0.b32.end [2/2] (short) (narrow) %v1198_v5, 32 }
0x16be   :  { %v6693_v45 = vpop.eup %6692 }
0x16bf   :  { %v4270_v22 = vmul.f32 %v6693_v45, %v4264_v20 }
0x16c1   :  { %6461 = vmatmul.mubr.msk.f32.vlgmr.msra.gmra.mxu1 %vm373_vm2, %v4270_v22 }
0x16c2   :  { %6475 = vmatpush3.msra.mxu1 %v4426_v43  ;;  %6482 = vmatprep.mubr.msk.f32.mxu1 %vm6727_vm1, %v6726_v25 }
0x16c3   :  { %6476 = vmatprep.subr.mxu1 %v6726_v25 }
0x16c4   :  { %6477 = vmatpush3.msra.mxu1 %v4425_v0 }
0x16c5   :  { %6478 = vmatprep.subr.mxu1 %v6726_v25 }
0x16c6   :  { %6479 = vmatpush3.msra.mxu1 %v4424_v2 }
0x16c7   :  { %6480 = vmatprep.subr.mxu1 %v6726_v25 }
0x16c8   :  { %6481 = vmatpush3.msra.mxu1 %v4423_v15 }
0x16c9   :  { %6483 = vmatmul.mubr.msk.f32.vlgmr.msra.gmra.mxu1 %vm30_vm0, %v4420_v18  ;;  %6492 = vmatprep.subr.mxu1 %v6726_v25 }
0x16ca   :  { %6493 = vmatpush3.msra.mxu1 %v7642_v33  ;;  %6500 = vmatprep.mubr.msk.f32.mxu1 %vm6727_vm1, %v6726_v25 }
0x16cb   :  { %6494 = vmatprep.subr.mxu1 %v6726_v25 }
0x16cc   :  { %6495 = vmatpush3.msra.mxu1 %v7651_v51 }
0x16cd   :  { %6496 = vmatprep.subr.mxu1 %v6726_v25 }
0x16ce   :  { %6497 = vmatpush3.msra.mxu1 %v7658_v44 }
0x16cf   :  { %6498 = vmatprep.subr.mxu1 %v6726_v25 }
0x16d0   :  { %6499 = vmatpush3.msra.mxu1 %v7665_v19 }
0x16d1   :  { %6514 = vmatprep.subr.mxu1 %v6726_v25 }
0x172f   :  { %v1217_v40 = vpop.trf.xlu0 }
0x1730   :  { %1234 = vst.msk [vmem:[#allocation2 + $0x1c0] sm:$0xff] %vm373_vm2, %v1217_v40 }
0x1733   :  { %v1218_v37 = vpop.trf.xlu0 }
0x1734   :  { %1235 = vst.msk [vmem:[#allocation2 + $0x1c8] sm:$0xff] %vm373_vm2, %v1218_v37 }
0x1737   :  { %v1219_v49 = vpop.trf.xlu0 }
0x1738   :  { %1236 = vst.msk [vmem:[#allocation2 + $0x1d0] sm:$0xff] %vm373_vm2, %v1219_v49 }
0x173b   :  { %v1220_v50 = vpop.trf.xlu0 }
0x173c   :  { %1237 = vst.msk [vmem:[#allocation2 + $0x1d8] sm:$0xff] %vm373_vm2, %v1220_v50 }
0x1781   :  { %v4340_v60 = vpop.f32.mrf.mxu1 }
0x1782   :  { %v7766_v36 = vadd.f32 %v4340_v60, %v7670_v30  ;;  %v4679_v60 = vld [vmem:[#allocation2 + $0x1d8] sm:$0xff] }
0x1783   :  { %v6462_v16 = vpop.f32.mrf.mxu1 }
0x1784   :  { %4345 = vst.msk [vmem:[#allocation4 + $0x68] sm:$0xff] %vm30_vm0, %v7766_v36  ;;  %6501 = vmatmul.mubr.msk.f32.vlgmr.msra.gmra.mxu1 %vm30_vm0, %v7766_v36 }
0x1785   :  { %6515 = vmatpush3.msra.mxu1 %v4681_v31  ;;  %6518 = vmatprep.mubr.msk.f32.mxu1 %vm6727_vm1, %v6726_v25  ;;  %v4676_v31 = vld [vmem:[#allocation2 + $0x1c0] sm:$0xff] }
0x1786   :  { %6516 = vmatprep.subr.mxu1 %v6726_v25 }
0x1787   :  { %6517 = vmatpush3.msra.mxu1 %v4680_v32 }
0x1788   :  { %6532 = vmatprep.subr.mxu1 %v6726_v25 }
0x1789   :  { %v4498_v30 = vpop.f32.mrf.mxu1 }
0x178a   :  { %v4502_v27 = vmul.f32 0.17677669, %v4498_v30 }
0x178b   :  { %v6484_v55 = vpop.f32.mrf.mxu1  ;;  %v7776_v57 = vld [vmem:[#allocation4 + $0x68] sm:$0xff] }
0x178c   :  { %v4503_v39 = vsel %vm373_vm2, %v4502_v27, -inf  ;;  %5756 = vst.msk [vmem:[%s8034_s6 + $0x68] sm:$0xff] %vm30_vm0, %v7776_v57  ;;  %v4937_v55 = vld [vmem:[#allocation3 + $0x70] sm:$0xff] }
0x178d   :  { %v4504_v3 = vrot.slane %v4503_v39, 4 }
0x178f   :  { %v4505_v41 = vmax.f32 %v4503_v39, %v4504_v3 }
0x1791   :  { %v4506_v6 = vrot.slane %v4505_v41, 2 }
0x1793   :  { %v4507_v23 = vmax.f32 %v4505_v41, %v4506_v6 }
0x1795   :  { %v4508_v7 = vrot.slane %v4507_v23, 1 }
0x1797   :  { %v4509_v14 = vmax.f32 %v4507_v23, %v4508_v7 }
0x1799   :  { %v4510_v9 = vsub.f32 %v4502_v27, %v4509_v14  ;;  %v4938_v27 = vld [vmem:[#allocation3 + $0x78] sm:$0xff] }
0x179b   :  { %v4511_v58 = vmul.f32 1.442695, %v4510_v9 }
0x179d   :  { %6694 = vpow2.f32 %v4511_v58 }
0x17aa   :  { %v6695_v47 = vpop.eup %6694 }
0x17ab   :  { %v4513_v48 = vsel %vm373_vm2, %v6695_v47, 0.0 }
0x17ac   :  { %v4514_v12 = vrot.slane %v4513_v48, 4 }
0x17ae   :  { %v4515_v17 = vadd.f32 %v4514_v12, %v4513_v48 }
0x17b0   :  { %v4516_v20 = vrot.slane %v4515_v17, 2 }
0x17b2   :  { %v4517_v59 = vadd.f32 %v4516_v20, %v4515_v17 }
0x17b4   :  { %v4518_v61 = vrot.slane %v4517_v59, 1 }
0x17b6   :  { %v4519_v56 = vadd.f32 %v4518_v61, %v4517_v59 }
0x17b8   :  { %6696 = vrcp.f32 %v4519_v56 }
0x17c5   :  { %v6697_v63 = vpop.eup %6696 }
0x17c6   :  { %v4521_v21 = vmul.f32 %v6697_v63, %v6695_v47 }
0x17c8   :  { %v4522_v42 = vsel %vm373_vm2, %v4521_v21, 0.0 }
0x17c9   :  { %4523 = vadd.xlane.f32.xlu1 %v4522_v42 }
0x17da   :  { %650 = vrot.lane.b32.xlu1 %v7022_v53, %s6728_s2  ;;  %v4677_v53 = vld [vmem:[#allocation2 + $0x1c8] sm:$0xff] }
0x17de   :  { %652 = vrot.lane.b32.xlu1 %v7018_v52, %s6728_s2  ;;  %v4678_v52 = vld [vmem:[#allocation2 + $0x1d0] sm:$0xff] }
0x1844   :  { %v4672_v5 = vpop.f32.mrf.mxu1 }
0x1845   :  { %v4673_v16 = vadd.f32 %v4672_v5, %v7102_v24 }
0x1846   :  { %v6502_v45 = vpop.f32.mrf.mxu1 }
0x1852   :  { %v4524_v22 = vpop.xlane.xlu1 %4523 }
0x1853   :  { %v4525_v43 = vadd.f32 1e-08, %v4524_v22 }
0x1855   :  { %6698 = vrcp.f32 %v4525_v43 }
0x1856   :  { %v651_v0 = vpop.permute.xlu1 %650 }
0x1857   :  { %656 = vxpose.xlu1.b32.start [1/2] (short) (narrow) %v651_v0, 32 }
0x185a   :  { %v653_v2 = vpop.permute.xlu1 %652 }
0x185b   :  { %657 = vxpose.xlu1.b32.end [2/2] (short) (narrow) %v653_v2, 32 }
0x1862   :  { %v6699_v18 = vpop.eup %6698 }
0x1863   :  { %v4527_v15 = vmul.f32 %v6699_v18, %v4521_v21 }
0x1865   :  { %6490 = vmatmul.mubr.msk.f32.vlgmr.msra.gmra.mxu0 %vm373_vm2, %v4527_v15 }
0x1866   :  { %6504 = vmatpush3.msra.mxu0 %v4679_v60  ;;  %6511 = vmatprep.mubr.msk.f32.mxu0 %vm6727_vm1, %v6726_v25 }
0x1867   :  { %6505 = vmatprep.subr.mxu0 %v6726_v25 }
0x1868   :  { %6506 = vmatpush3.msra.mxu0 %v4678_v52 }
0x1869   :  { %6507 = vmatprep.subr.mxu0 %v6726_v25 }
0x186a   :  { %6508 = vmatpush3.msra.mxu0 %v4677_v53 }
0x186b   :  { %6509 = vmatprep.subr.mxu0 %v6726_v25 }
0x186c   :  { %6510 = vmatpush3.msra.mxu0 %v4676_v31 }
0x186d   :  { %6512 = vmatmul.mubr.msk.f32.vlgmr.msra.gmra.mxu0 %vm30_vm0, %v4673_v16  ;;  %6521 = vmatprep.subr.mxu0 %v6726_v25 }
0x186e   :  { %6522 = vmatpush3.msra.mxu0 %v7642_v33  ;;  %6529 = vmatprep.mubr.msk.f32.mxu0 %vm6727_vm1, %v6726_v25 }
0x186f   :  { %6523 = vmatprep.subr.mxu0 %v6726_v25 }
0x1870   :  { %6524 = vmatpush3.msra.mxu0 %v7651_v51 }
0x1871   :  { %6525 = vmatprep.subr.mxu0 %v6726_v25 }
0x1872   :  { %6526 = vmatpush3.msra.mxu0 %v7658_v44 }
0x1873   :  { %6527 = vmatprep.subr.mxu0 %v6726_v25 }
0x1874   :  { %6528 = vmatpush3.msra.mxu0 %v7665_v19 }
0x1875   :  { %6543 = vmatprep.subr.mxu0 %v6726_v25 }
0x18d3   :  { %v672_v49 = vpop.trf.xlu1 }
0x18d4   :  { %689 = vst.msk [vmem:[#allocation2 + $0xe0] sm:$0xff] %vm373_vm2, %v672_v49 }
0x18d7   :  { %v673_v5 = vpop.trf.xlu1 }
0x18d8   :  { %690 = vst.msk [vmem:[#allocation2 + $0xe8] sm:$0xff] %vm373_vm2, %v673_v5 }
0x18db   :  { %v674_v45 = vpop.trf.xlu1 }
0x18dc   :  { %691 = vst.msk [vmem:[#allocation2 + $0xf0] sm:$0xff] %vm373_vm2, %v674_v45 }
0x18df   :  { %v675_v22 = vpop.trf.xlu1 }
0x18e0   :  { %692 = vst.msk [vmem:[#allocation2 + $0xf8] sm:$0xff] %vm373_vm2, %v675_v22 }
0x18e7   :  { %v4936_v16 = vld [vmem:[#allocation2 + $0xf8] sm:$0xff] }
0x1925   :  { %v4597_v24 = vpop.f32.mrf.mxu0 }
0x1926   :  { %v7814_v32 = vadd.f32 %v4597_v24, %v7718_v46  ;;  %v4933_v24 = vld [vmem:[#allocation2 + $0xe0] sm:$0xff] }
0x1927   :  { %v6491_v30 = vpop.f32.mrf.mxu0 }
0x1928   :  { %4602 = vst.msk [vmem:[#allocation4 + $0x30] sm:$0xff] %vm30_vm0, %v7814_v32  ;;  %6530 = vmatmul.mubr.msk.f32.vlgmr.msra.gmra.mxu0 %vm30_vm0, %v7814_v32 }
0x1929   :  { %6544 = vmatpush3.msra.mxu0 %v4938_v27  ;;  %6547 = vmatprep.mubr.msk.f32.mxu0 %vm6727_vm1, %v6726_v25 }
0x192a   :  { %6545 = vmatprep.subr.mxu0 %v6726_v25 }
0x192b   :  { %6546 = vmatpush3.msra.mxu0 %v4937_v55 }
0x192c   :  { %6561 = vmatprep.subr.mxu0 %v6726_v25 }
0x192d   :  { %v4751_v46 = vpop.f32.mrf.mxu0 }
0x192e   :  { %v4755_v39 = vmul.f32 0.17677669, %v4751_v46 }
0x192f   :  { %v6513_v3 = vpop.f32.mrf.mxu0  ;;  %v7824_v41 = vld [vmem:[#allocation4 + $0x30] sm:$0xff] }
0x1930   :  { %v4756_v6 = vsel %vm373_vm2, %v4755_v39, -inf  ;;  %5601 = vst.msk [vmem:[%s8034_s6 + $0x30] sm:$0xff] %vm30_vm0, %v7824_v41 }
0x1931   :  { %v4757_v23 = vrot.slane %v4756_v6, 4 }
0x1933   :  { %v4758_v7 = vmax.f32 %v4756_v6, %v4757_v23 }
0x1935   :  { %v4759_v14 = vrot.slane %v4758_v7, 2 }
0x1937   :  { %v4760_v9 = vmax.f32 %v4758_v7, %v4759_v14 }
0x1939   :  { %v4761_v58 = vrot.slane %v4760_v9, 1 }
0x193b   :  { %v4762_v47 = vmax.f32 %v4760_v9, %v4761_v58 }
0x193d   :  { %v4763_v48 = vsub.f32 %v4755_v39, %v4762_v47 }
0x193f   :  { %v4764_v12 = vmul.f32 1.442695, %v4763_v48 }
0x1941   :  { %6700 = vpow2.f32 %v4764_v12 }
0x194e   :  { %v6701_v17 = vpop.eup %6700 }
0x194f   :  { %v4766_v20 = vsel %vm373_vm2, %v6701_v17, 0.0 }
0x1950   :  { %v4767_v59 = vrot.slane %v4766_v20, 4 }
0x1952   :  { %v4768_v61 = vadd.f32 %v4767_v59, %v4766_v20 }
0x1954   :  { %v4769_v56 = vrot.slane %v4768_v61, 2 }
0x1956   :  { %v4770_v63 = vadd.f32 %v4769_v56, %v4768_v61 }
0x1958   :  { %v4771_v21 = vrot.slane %v4770_v63, 1 }
0x195a   :  { %v4772_v40 = vadd.f32 %v4771_v21, %v4770_v63 }
0x195c   :  { %6702 = vrcp.f32 %v4772_v40 }
0x1969   :  { %v6703_v42 = vpop.eup %6702 }
0x196a   :  { %v4774_v37 = vmul.f32 %v6703_v42, %v6701_v17 }
0x196c   :  { %v4775_v50 = vsel %vm373_vm2, %v4774_v37, 0.0 }
0x196d   :  { %4776 = vadd.xlane.f32.xlu0 %v4775_v50 }
0x1983   :  { %1240 = vrot.lane.b32.xlu0 %v7082_v8, %s6728_s2  ;;  %v4934_v8 = vld [vmem:[#allocation2 + $0xe8] sm:$0xff] }
0x1987   :  { %1242 = vrot.lane.b32.xlu0 %v7074_v4, %s6728_s2  ;;  %v4935_v4 = vld [vmem:[#allocation2 + $0xf0] sm:$0xff] }
0x19e8   :  { %v4929_v43 = vpop.f32.mrf.mxu0 }
0x19e9   :  { %v4930_v31 = vadd.f32 %v4929_v43, %v7104_v29 }
0x19ea   :  { %v6531_v0 = vpop.f32.mrf.mxu0 }
0x19f6   :  { %v4777_v2 = vpop.xlane.xlu0 %4776 }
0x19f7   :  { %v4778_v18 = vadd.f32 1e-08, %v4777_v2 }
0x19f9   :  { %6704 = vrcp.f32 %v4778_v18 }
0x19fa   :  { %v1241_v15 = vpop.permute.xlu0 %1240 }
0x19fb   :  { %1246 = vxpose.xlu0.b32.start [1/2] (short) (narrow) %v1241_v15, 32 }
0x19fe   :  { %v1243_v60 = vpop.permute.xlu0 %1242 }
0x19ff   :  { %1247 = vxpose.xlu0.b32.end [2/2] (short) (narrow) %v1243_v60, 32 }
0x1a06   :  { %v6705_v52 = vpop.eup %6704 }
0x1a07   :  { %v4780_v53 = vmul.f32 %v6705_v52, %v4774_v37 }
0x1a09   :  { %6519 = vmatmul.mubr.msk.f32.vlgmr.msra.gmra.mxu1 %vm373_vm2, %v4780_v53  ;;  %v5385_v53 = vld [vmem:[%s8035_s5 + $0x18] sm:$0xff] }
0x1a0a   :  { %6533 = vmatpush3.msra.mxu1 %v4936_v16  ;;  %6540 = vmatprep.mubr.msk.f32.mxu1 %vm6727_vm1, %v6726_v25 }
0x1a0b   :  { %6534 = vmatprep.subr.mxu1 %v6726_v25 }
0x1a0c   :  { %6535 = vmatpush3.msra.mxu1 %v4935_v4 }
0x1a0d   :  { %6536 = vmatprep.subr.mxu1 %v6726_v25 }
0x1a0e   :  { %6537 = vmatpush3.msra.mxu1 %v4934_v8  ;;  %v5384_v8 = vld [vmem:[%s8035_s5 + $0x10] sm:$0xff] }
0x1a0f   :  { %6538 = vmatprep.subr.mxu1 %v6726_v25 }
0x1a10   :  { %6539 = vmatpush3.msra.mxu1 %v4933_v24 }
0x1a11   :  { %6541 = vmatmul.mubr.msk.f32.vlgmr.msra.gmra.mxu1 %vm30_vm0, %v4930_v31  ;;  %6550 = vmatprep.subr.mxu1 %v6726_v25  ;;  %v5383_v31 = vld [vmem:[%s8035_s5 + $0x8] sm:$0xff] }
0x1a12   :  { %6551 = vmatpush3.msra.mxu1 %v7642_v33  ;;  %6558 = vmatprep.mubr.msk.f32.mxu1 %vm6727_vm1, %v6726_v25 }
0x1a13   :  { %6552 = vmatprep.subr.mxu1 %v6726_v25 }
0x1a14   :  { %6553 = vmatpush3.msra.mxu1 %v7651_v51  ;;  %v5191_v51 = vld [vmem:[#allocation3 + $0xf8] sm:$0xff] }
0x1a15   :  { %6554 = vmatprep.subr.mxu1 %v6726_v25 }
0x1a16   :  { %6555 = vmatpush3.msra.mxu1 %v7658_v44  ;;  %v5190_v44 = vld [vmem:[#allocation3 + $0xf0] sm:$0xff] }
0x1a17   :  { %6556 = vmatprep.subr.mxu1 %v6726_v25 }
0x1a18   :  { %6557 = vmatpush3.msra.mxu1 %v7665_v19 }
0x1a19   :  { %6572 = vmatprep.subr.mxu1 %v6726_v25 }
0x1a77   :  { %v1262_v42 = vpop.trf.xlu0 }
0x1a78   :  { %1279 = vst.msk [vmem:[#allocation2 + $0x1e0] sm:$0xff] %vm373_vm2, %v1262_v42 }
0x1a7b   :  { %v1263_v49 = vpop.trf.xlu0 }
0x1a7c   :  { %1280 = vst.msk [vmem:[#allocation2 + $0x1e8] sm:$0xff] %vm373_vm2, %v1263_v49 }
0x1a7f   :  { %v1264_v50 = vpop.trf.xlu0  ;;  %v5186_v4 = vld [vmem:[#allocation2 + $0x1e0] sm:$0xff] }
0x1a80   :  { %1281 = vst.msk [vmem:[#allocation2 + $0x1f0] sm:$0xff] %vm373_vm2, %v1264_v50 }
0x1a83   :  { %v1265_v5 = vpop.trf.xlu0  ;;  %v5187_v52 = vld [vmem:[#allocation2 + $0x1e8] sm:$0xff] }
0x1a84   :  { %1282 = vst.msk [vmem:[#allocation2 + $0x1f8] sm:$0xff] %vm373_vm2, %v1265_v5 }
0x1a87   :  { %v5188_v60 = vld [vmem:[#allocation2 + $0x1f0] sm:$0xff] }
0x1a8b   :  { %v5189_v15 = vld [vmem:[#allocation2 + $0x1f8] sm:$0xff] }
0x1ac9   :  { %v4850_v30 = vpop.f32.mrf.mxu1 }
0x1aca   :  { %v7862_v33 = vadd.f32 %v4850_v30, %v7766_v36 }
0x1acb   :  { %v6520_v27 = vpop.f32.mrf.mxu1 }
0x1acc   :  { %4855 = vst.msk [vmem:[#allocation4 + $0x70] sm:$0xff] %vm30_vm0, %v7862_v33  ;;  %6559 = vmatmul.mubr.msk.f32.vlgmr.msra.gmra.mxu1 %vm30_vm0, %v7862_v33 }
0x1acd   :  { %6573 = vmatpush3.msra.mxu1 %v5191_v51  ;;  %6576 = vmatprep.mubr.msk.f32.mxu1 %vm6727_vm1, %v6726_v25 }
0x1ace   :  { %6574 = vmatprep.subr.mxu1 %v6726_v25 }
0x1acf   :  { %6575 = vmatpush3.msra.mxu1 %v5190_v44 }
0x1ad1   :  { %v5008_v19 = vpop.f32.mrf.mxu1 }
0x1ad2   :  { %v5012_v55 = vmul.f32 0.17677669, %v5008_v19 }
0x1ad3   :  { %v6542_v36 = vpop.f32.mrf.mxu1  ;;  %v7871_v46 = vld [vmem:[#allocation4 + $0x70] sm:$0xff] }
0x1ad4   :  { %v5013_v39 = vsel %vm373_vm2, %v5012_v55, -inf  ;;  %5757 = vst.msk [vmem:[%s8034_s6 + $0x70] sm:$0xff] %vm30_vm0, %v7871_v46 }
0x1ad5   :  { %v5014_v3 = vrot.slane %v5013_v39, 4 }
0x1ad7   :  { %v5015_v6 = vmax.f32 %v5013_v39, %v5014_v3 }
0x1ad9   :  { %v5016_v23 = vrot.slane %v5015_v6, 2 }
0x1adb   :  { %v5017_v7 = vmax.f32 %v5015_v6, %v5016_v23 }
0x1add   :  { %v5018_v14 = vrot.slane %v5017_v7, 1 }
0x1adf   :  { %v5019_v9 = vmax.f32 %v5017_v7, %v5018_v14 }
0x1ae1   :  { %v5020_v58 = vsub.f32 %v5012_v55, %v5019_v9 }
0x1ae3   :  { %v5021_v47 = vmul.f32 1.442695, %v5020_v58 }
0x1ae5   :  { %6706 = vpow2.f32 %v5021_v47 }
0x1af2   :  { %v6707_v48 = vpop.eup %6706 }
0x1af3   :  { %v5023_v12 = vsel %vm373_vm2, %v6707_v48, 0.0 }
0x1af4   :  { %v5024_v17 = vrot.slane %v5023_v12, 4 }
0x1af6   :  { %v5025_v20 = vadd.f32 %v5024_v17, %v5023_v12 }
0x1af8   :  { %v5026_v59 = vrot.slane %v5025_v20, 2 }
0x1afa   :  { %v5027_v61 = vadd.f32 %v5026_v59, %v5025_v20 }
0x1afc   :  { %v5028_v56 = vrot.slane %v5027_v61, 1 }
0x1afe   :  { %v5029_v63 = vadd.f32 %v5028_v56, %v5027_v61 }
0x1b00   :  { %6708 = vrcp.f32 %v5029_v63 }
0x1b0d   :  { %v6709_v21 = vpop.eup %6708 }
0x1b0e   :  { %v5031_v40 = vmul.f32 %v6709_v21, %v6707_v48 }
0x1b10   :  { %v5032_v37 = vsel %vm373_vm2, %v5031_v40, 0.0 }
0x1b11   :  { %5033 = vadd.xlane.f32.xlu1 %v5032_v37 }
0x1b8c   :  { %v5182_v45 = vpop.f32.mrf.mxu1 }
0x1b8d   :  { %v5183_v16 = vadd.f32 %v5182_v45, %v7104_v29 }
0x1b8e   :  { %v6560_v22 = vpop.f32.mrf.mxu1 }
0x1b9a   :  { %v5034_v43 = vpop.xlane.xlu1 %5033 }
0x1b9b   :  { %v5035_v0 = vadd.f32 1e-08, %v5034_v43 }
0x1b9d   :  { %6710 = vrcp.f32 %v5035_v0 }
0x1baa   :  { %v6711_v2 = vpop.eup %6710 }
0x1bab   :  { %v5037_v18 = vmul.f32 %v6711_v2, %v5031_v40 }
0x1bad   :  { %6548 = vmatmul.mubr.msk.f32.vlgmr.msra.gmra.mxu0 %vm373_vm2, %v5037_v18 }
0x1bae   :  { %6562 = vmatpush3.msra.mxu0 %v5189_v15  ;;  %6569 = vmatprep.mubr.msk.f32.mxu0 %vm6727_vm1, %v6726_v25 }
0x1baf   :  { %6563 = vmatprep.subr.mxu0 %v6726_v25 }
0x1bb0   :  { %6564 = vmatpush3.msra.mxu0 %v5188_v60 }
0x1bb1   :  { %6565 = vmatprep.subr.mxu0 %v6726_v25 }
0x1bb2   :  { %6566 = vmatpush3.msra.mxu0 %v5187_v52 }
0x1bb3   :  { %6567 = vmatprep.subr.mxu0 %v6726_v25  ;;  %v5382_v25 = vld [vmem:[%s8035_s5] sm:$0xff] }
0x1bb4   :  { %6568 = vmatpush3.msra.mxu0 %v5186_v4 }
0x1bb5   :  { %6570 = vmatmul.mubr.msk.f32.vlgmr.msra.gmra.mxu0 %vm30_vm0, %v5183_v16  ;;  %6579 = vmatprep.subr.mxu0 %v5385_v53 }
0x1bb6   :  { %6580 = vmatpush3.msra.mxu0 %v5385_v53  ;;  %6587 = vmatprep.mubr.msk.f32.mxu0 %vm30_vm0, %v7193_v10 }
0x1bb7   :  { %6581 = vmatprep.subr.mxu0 %v5384_v8 }
0x1bb8   :  { %6582 = vmatpush3.msra.mxu0 %v5384_v8 }
0x1bb9   :  { %6583 = vmatprep.subr.mxu0 %v5383_v31 }
0x1bba   :  { %6584 = vmatpush3.msra.mxu0 %v5383_v31 }
0x1bbb   :  { %6585 = vmatprep.subr.mxu0 %v5382_v25 }
0x1bbc   :  { %6586 = vmatpush3.msra.mxu0 %v5382_v25 }
0x1bbd   :  { %6588 = vmatmul.mubr.msk.f32.vlgmr.msra.gmra.mxu0 %vm30_vm0, %v7304_v38 }
0x1bbe   :  { %6590 = vmatprep.mubr.msk.f32.mxu0 %vm30_vm0, %v7420_v1 }
0x1bc1   :  { %6591 = vmatmul.mubr.msk.f32.gmra.mxu0 %vm30_vm0, %v7516_v54 }
0x1bc2   :  { %6593 = vmatprep.mubr.msk.f32.mxu0 %vm30_vm0, %v7612_v13 }
0x1bc5   :  { %6594 = vmatmul.mubr.msk.f32.gmra.mxu0 %vm30_vm0, %v7728_v28 }
0x1bc6   :  { %6596 = vmatprep.mubr.msk.f32.mxu0 %vm30_vm0, %v7824_v41 }
0x1c6d   :  { %v5107_v29 = vpop.f32.mrf.mxu0 }
0x1c6e   :  { %v5111_v24 = vadd.f32 %v5107_v29, %v7814_v32 }
0x1c6f   :  { %v6549_v30 = vpop.f32.mrf.mxu0 }
0x1c70   :  { %5112 = vst.msk [vmem:[#allocation4 + $0x38] sm:$0xff] %vm30_vm0, %v5111_v24 }
0x1c75   :  { %v5261_v27 = vpop.f32.mrf.mxu0 }
0x1c76   :  { %v5265_v51 = vmul.f32 0.17677669, %v5261_v27 }
0x1c77   :  { %v6571_v44 = vpop.f32.mrf.mxu0  ;;  %v5373_v19 = vld [vmem:[#allocation4 + $0x38] sm:$0xff] }
0x1c78   :  { %v5266_v55 = vsel %vm373_vm2, %v5265_v51, -inf  ;;  %6597 = vmatmul.mubr.msk.f32.gmra.mxu0 %vm30_vm0, %v5373_v19  ;;  %5602 = vst.msk [vmem:[%s8034_s6 + $0x38] sm:$0xff] %vm30_vm0, %v5373_v19 }
0x1c79   :  { %v5267_v36 = vrot.slane %v5266_v55, 4  ;;  %6599 = vmatprep.mubr.msk.f32.mxu0 %vm30_vm0, %v7256_v62 }
0x1c7b   :  { %v5268_v32 = vmax.f32 %v5266_v55, %v5267_v36 }
0x1c7c   :  { %6600 = vmatmul.mubr.msk.f32.gmra.mxu0 %vm30_vm0, %v7372_v26 }
0x1c7d   :  { %v5269_v39 = vrot.slane %v5268_v32, 2  ;;  %v6589_v3 = vpop.f32.mrf.mxu0  ;;  %6602 = vmatprep.mubr.msk.f32.mxu0 %vm30_vm0, %v7468_v34 }
0x1c7e   :  { %v5580_v6 = vadd.f32 %v6589_v3, %v7304_v38 }
0x1c7f   :  { %v5270_v23 = vmax.f32 %v5268_v32, %v5269_v39  ;;  %v5500_v7 = vpop.f32.mrf.mxu0 }
0x1c80   :  { %5604 = vst.msk [vmem:[%s8036_s7 + $0x8] sm:$0xff] %vm30_vm0, %v5580_v6  ;;  %v5579_v14 = vadd.f32 %v5500_v7, %v7193_v10  ;;  %6603 = vmatmul.mubr.msk.f32.gmra.mxu0 %vm30_vm0, %v7564_v11 }
0x1c81   :  { %v5271_v9 = vrot.slane %v5270_v23, 1  ;;  %v6592_v58 = vpop.f32.mrf.mxu0  ;;  %6605 = vmatprep.mubr.msk.f32.mxu0 %vm30_vm0, %v7680_v35 }
0x1c82   :  { %5603 = vst.msk [vmem:[%s8036_s7] sm:$0xff] %vm30_vm0, %v5579_v14  ;;  %v5582_v38 = vadd.f32 %v6592_v58, %v7516_v54 }
0x1c83   :  { %v5272_v47 = vmax.f32 %v5270_v23, %v5271_v9  ;;  %v5510_v48 = vpop.f32.mrf.mxu0 }
0x1c84   :  { %5606 = vst.msk [vmem:[%s8036_s7 + $0x18] sm:$0xff] %vm30_vm0, %v5582_v38  ;;  %v5581_v10 = vadd.f32 %v5510_v48, %v7420_v1  ;;  %6606 = vmatmul.mubr.msk.f32.gmra.mxu0 %vm30_vm0, %v7776_v57 }
0x1c85   :  { %v5273_v12 = vsub.f32 %v5265_v51, %v5272_v47  ;;  %v6595_v17 = vpop.f32.mrf.mxu0  ;;  %6608 = vmatprep.mubr.msk.f32.mxu0 %vm30_vm0, %v7871_v46 }
0x1c86   :  { %5605 = vst.msk [vmem:[%s8036_s7 + $0x10] sm:$0xff] %vm30_vm0, %v5581_v10  ;;  %v5584_v54 = vadd.f32 %v6595_v17, %v7728_v28 }
0x1c87   :  { %v5274_v20 = vmul.f32 1.442695, %v5273_v12  ;;  %v5520_v59 = vpop.f32.mrf.mxu0 }
0x1c88   :  { %5608 = vst.msk [vmem:[%s8036_s7 + $0x28] sm:$0xff] %vm30_vm0, %v5584_v54  ;;  %v5583_v1 = vadd.f32 %v5520_v59, %v7612_v13 }
0x1c89   :  { %6712 = vpow2.f32 %v5274_v20 }
0x1c8a   :  { %5607 = vst.msk [vmem:[%s8036_s7 + $0x20] sm:$0xff] %vm30_vm0, %v5583_v1 }
0x1c96   :  { %v6713_v61 = vpop.eup %6712 }
0x1c97   :  { %v5276_v56 = vsel %vm373_vm2, %v6713_v61, 0.0 }
0x1c98   :  { %v5277_v63 = vrot.slane %v5276_v56, 4 }
0x1c9a   :  { %v5278_v28 = vadd.f32 %v5277_v63, %v5276_v56 }
0x1c9c   :  { %v5279_v21 = vrot.slane %v5278_v28, 2 }
0x1c9e   :  { %v5280_v40 = vadd.f32 %v5279_v21, %v5278_v28 }
0x1ca0   :  { %v5281_v42 = vrot.slane %v5280_v40, 1 }
0x1ca2   :  { %v5282_v37 = vadd.f32 %v5281_v42, %v5280_v40 }
0x1ca4   :  { %6714 = vrcp.f32 %v5282_v37 }
0x1cb1   :  { %v6715_v49 = vpop.eup %6714 }
0x1cb2   :  { %v5284_v50 = vmul.f32 %v6715_v49, %v6713_v61 }
0x1cb4   :  { %v5285_v13 = vsel %vm373_vm2, %v5284_v50, 0.0 }
0x1cb5   :  { %5286 = vadd.xlane.f32.xlu0 %v5285_v13 }
0x1d38   :  { %v6598_v5 = vpop.f32.mrf.mxu0 }
0x1d39   :  { %v5586_v45 = vadd.f32 %v6598_v5, %v5373_v19 }
0x1d3a   :  { %v5530_v22 = vpop.f32.mrf.mxu0 }
0x1d3b   :  { %5610 = vst.msk [vmem:[%s8036_s7 + $0x38] sm:$0xff] %vm30_vm0, %v5586_v45  ;;  %v5585_v43 = vadd.f32 %v5530_v22, %v7824_v41 }
0x1d3c   :  { %v6601_v0 = vpop.f32.mrf.mxu0 }
0x1d3d   :  { %5609 = vst.msk [vmem:[%s8036_s7 + $0x30] sm:$0xff] %vm30_vm0, %v5585_v43  ;;  %v5588_v2 = vadd.f32 %v6601_v0, %v7372_v26 }
0x1d3e   :  { %v5287_v18 = vpop.xlane.xlu0 %5286  ;;  %v5540_v15 = vpop.f32.mrf.mxu0 }
0x1d3f   :  { %5760 = vst.msk [vmem:[%s8036_s7 + $0x48] sm:$0xff] %vm30_vm0, %v5588_v2  ;;  %v5288_v60 = vadd.f32 1e-08, %v5287_v18  ;;  %v5587_v52 = vadd.f32 %v5540_v15, %v7256_v62 }
0x1d40   :  { %v6604_v53 = vpop.f32.mrf.mxu0 }
0x1d41   :  { %6716 = vrcp.f32 %v5288_v60  ;;  %5759 = vst.msk [vmem:[%s8036_s7 + $0x40] sm:$0xff] %vm30_vm0, %v5587_v52  ;;  %v5590_v41 = vadd.f32 %v6604_v53, %v7564_v11 }
0x1d42   :  { %v5550_v26 = vpop.f32.mrf.mxu0 }
0x1d43   :  { %5762 = vst.msk [vmem:[%s8036_s7 + $0x58] sm:$0xff] %vm30_vm0, %v5590_v41  ;;  %v5589_v16 = vadd.f32 %v5550_v26, %v7468_v34 }
0x1d44   :  { %v6607_v4 = vpop.f32.mrf.mxu0 }
0x1d45   :  { %5761 = vst.msk [vmem:[%s8036_s7 + $0x50] sm:$0xff] %vm30_vm0, %v5589_v16  ;;  %v5592_v62 = vadd.f32 %v6607_v4, %v7776_v57 }
0x1d46   :  { %v5560_v8 = vpop.f32.mrf.mxu0 }
0x1d47   :  { %5764 = vst.msk [vmem:[%s8036_s7 + $0x68] sm:$0xff] %vm30_vm0, %v5592_v62  ;;  %v5591_v11 = vadd.f32 %v5560_v8, %v7680_v35 }
0x1d49   :  { %5763 = vst.msk [vmem:[%s8036_s7 + $0x60] sm:$0xff] %vm30_vm0, %v5591_v11 }
0x1d4e   :  { %v6717_v34 = vpop.eup %6716 }
0x1d4f   :  { %v5290_v31 = vmul.f32 %v6717_v34, %v5284_v50 }
0x1d51   :  { %6577 = vmatmul.mubr.msk.f32.vlgmr.msra.gmra.mxu1 %vm373_vm2, %v5290_v31 }
0x1e11   :  { %v5360_v25 = vpop.f32.mrf.mxu1 }
0x1e12   :  { %v5364_v57 = vadd.f32 %v5360_v25, %v7862_v33 }
0x1e13   :  { %v6578_v29 = vpop.f32.mrf.mxu1 }
0x1e14   :  { %5365 = vst.msk [vmem:[#allocation4 + $0x78] sm:$0xff] %vm30_vm0, %v5364_v57 }
0x1e1b   :  { %v5381_v24 = vld [vmem:[#allocation4 + $0x78] sm:$0xff] }
0x1e1c   :  { %6609 = vmatmul.mubr.msk.f32.gmra.mxu0 %vm30_vm0, %v5381_v24  ;;  %5758 = vst.msk [vmem:[%s8034_s6 + $0x78] sm:$0xff] %vm30_vm0, %v5381_v24 }
0x1edc   :  { %v6610_v35 = vpop.f32.mrf.mxu0 }
0x1edd   :  { %v5594_v30 = vadd.f32 %v6610_v35, %v5381_v24 }
0x1ede   :  { %v5570_v27 = vpop.f32.mrf.mxu0 }
0x1edf   :  { %5766 = vst.msk [vmem:[%s8036_s7 + $0x78] sm:$0xff] %vm30_vm0, %v5594_v30  ;;  %v5593_v33 = vadd.f32 %v5570_v27, %v7871_v46 }
0x1ee1   :  { %5765 = vst.msk [vmem:[%s8036_s7 + $0x70] sm:$0xff] %vm30_vm0, %v5593_v33 }

</bundles_post_ra>
